<compile_context>
chip_gen: v7x
topology: tpu7x:2x2x1
jax: 0.10.0
libtpu: 0.0.40
codegen_flags: <defaults>
</compile_context>

<pallas_src>
import functools

import jax
import jax.numpy as jnp
from jax.experimental import pallas as pl
from jax.experimental.pallas import tpu as pltpu


def _ceil_to(n, m):
    return ((n + m - 1) // m) * m


def _sigmoid(x):
    # exp on the EUP; the divide also goes to the EUP via the approximate reciprocal.
    return pl.reciprocal(1.0 + jnp.exp(-x), approx=True)


# ----------------------------------------------------------------------------
# The single fused forward kernel
# ----------------------------------------------------------------------------

def _fused_forward_kernel(*args, L, T, B, H, Cout, n_pool, pool2):
    """args = [x_tm] + [w_ih_l, w_hh_l, b_l]*L +
              [patches, conv_w, conv_b, w1_lstm, w1_conv, b1, w2, b2] + [out_ref]."""
    x_ref = args[0]
    (pat_ref, cw_ref, cb_ref, w1l_ref, w1c_ref, b1_ref, w2_ref, b2_ref,
     out_ref) = args[1 + 3 * L:]
    F1p = b1_ref.shape[1]

    # ------------------- LSTM branch (all layers fused) ---------------------
    src = x_ref[...]                                          # (T*B, D) bf16, time-major
    h = jnp.zeros((B, H), jnp.float32)
    for l in range(L):
        w_ih = args[1 + 3 * l][...]                           # (in_dim, 4H) bf16
        w_hh = args[2 + 3 * l][...]                           # (H, 4H)      bf16
        bias = args[3 + 3 * l][...]                           # (1, 4H)      f32 (b_ih+b_hh)
        # Input projection for ALL timesteps in one MXU matmul; gx never leaves VMEM.
        gx = jnp.dot(src.astype(jnp.bfloat16), w_ih,
                     preferred_element_type=jnp.float32) + bias      # (T*B, 4H) f32
        h = jnp.zeros((B, H), jnp.float32)
        c = jnp.zeros((B, H), jnp.float32)
        hs = []
        for t in range(T):                                    # unrolled recurrence
            gates = gx[t * B:(t + 1) * B, :] + jnp.dot(
                h.astype(jnp.bfloat16), w_hh, preferred_element_type=jnp.float32)
            sig = _sigmoid(gates)                             # one full-width EUP op
            th = jnp.tanh(gates)                              # one full-width EUP op
            i_g = sig[:, 0 * H:1 * H]
            f_g = sig[:, 1 * H:2 * H]
            g_g = th[:, 2 * H:3 * H]
            o_g = sig[:, 3 * H:4 * H]
            c = f_g * c + i_g * g_g
            h = o_g * jnp.tanh(c)
            if l + 1 < L:
                hs.append(h)
        if l + 1 < L:
            # Next layer consumes the full hidden sequence (time-major rows).
            src = jnp.concatenate(hs, axis=0)                 # (T*B, H) f32
            # TODO(synk): train-mode inter-layer LSTM dropout not applied (eval semantics).
    lstm_last = h                                             # (B, H) == lstm_out[:, -1, :]

    # ------------- Conv2d + bias + ReLU (single im2col MXU matmul) ----------
    y = jnp.dot(cw_ref[...], pat_ref[...],
                preferred_element_type=jnp.float32) + cb_ref[...]    # (Cout, B*pool2*n_pool)
    y = jnp.maximum(y, 0.0)

    # ------------- Head: concat + fc1 + ReLU + fc2 (all in-VMEM) ------------
    h1 = jnp.dot(lstm_last.astype(jnp.bfloat16), w1l_ref[...],
                 preferred_element_type=jnp.float32) + b1_ref[...]   # (B, F1p)
    rows = []
    for b in range(B):
        base = b * pool2 * n_pool
        # Fused MaxPool: max over the pool^2 contiguous lane slabs of batch b.
        mb = y[:, base:base + n_pool]                         # (Cout, n_pool)
        for j in range(1, pool2):
            mb = jnp.maximum(mb, y[:, base + j * n_pool:base + (j + 1) * n_pool])
        # fc1 conv-half: contract (channel, pooled-position) per batch row without ever
        # building the flattened/concatenated feature vector (torch's c-major .view order
        # matches w1_conv row order c*n_pool + q).
        zb = jnp.zeros((1, F1p), jnp.float32)
        for cc in range(Cout):
            zb = zb + jnp.dot(mb[cc:cc + 1, :].astype(jnp.bfloat16),
                              w1c_ref[cc * n_pool:(cc + 1) * n_pool, :],
                              preferred_element_type=jnp.float32)
        rows.append(zb)
    h1 = jnp.maximum(h1 + jnp.concatenate(rows, axis=0), 0.0)        # fused ReLU
    out_ref[...] = jnp.dot(h1.astype(jnp.bfloat16), w2_ref[...],
                           preferred_element_type=jnp.float32) + b2_ref[...]


# ----------------------------------------------------------------------------
# Host-side glue (im2col layout prep, params, forward orchestration)
# ----------------------------------------------------------------------------

def build_conv_patches(x_img, K, stride, padding, pool, out_h, out_w):
    """im2col with lanes ordered (batch, pool-window offset, pooled output position).

    Returns (Cin*K*K, B * pool*pool * out_h*out_w); lane = b*(pool^2*n_pool)
    + (py*pool+px)*n_pool + (oh*out_w+ow), so the kernel pools via maxima over
    contiguous lane slabs and the conv output is fed to the MXU as one matmul.
    """
    # TODO(synk): at production image sizes this should become an in-kernel DMA/shift
    # gather (9x HBM expansion of the image otherwise); trivial at these shapes.
    B, Cin, Himg, Wimg = x_img.shape
    Hc = (Himg - K + 2 * padding) // stride + 1
    Wc = (Wimg - K + 2 * padding) // stride + 1
    hc_used, wc_used = out_h * pool, out_w * pool        # MaxPool2d floors the remainder
    xp = jnp.pad(x_img, ((0, 0), (0, 0), (padding, padding), (padding, padding)))
    cols = []
    for ky in range(K):
        for kx in range(K):
            sl = xp[:, :, ky: ky + (Hc - 1) * stride + 1: stride,
                          kx: kx + (Wc - 1) * stride + 1: stride]     # (B, Cin, Hc, Wc)
            cols.append(sl[:, :, :hc_used, :wc_used])
    pat = jnp.stack(cols, axis=2)                         # (B, Cin, K*K, hc, wc)
    pat = pat.reshape(B, Cin * K * K, out_h, pool, out_w, pool)
    pat = pat.transpose(1, 0, 3, 5, 2, 4)                 # (CKK, B, py, px, oh, ow)
    return pat.reshape(Cin * K * K, B * pool * pool * out_h * out_w)


def init_params(key, cfg):
    D, H, L = cfg["lstm_input_size"], cfg["lstm_hidden_size"], cfg["lstm_num_layers"]
    Cin, Cout, K = cfg["conv_in_channels"], cfg["conv_out_channels"], cfg["conv_kernel_size"]
    stride, pad, pool = cfg["stride"], cfg["padding"], cfg["pool_kernel_size"]
    F1, F2 = cfg["fc1_output_size"], cfg["fc2_output_size"]
    in_h, in_w = cfg["input_shape"]
    cnn_h = ((in_h - K + 2 * pad) // stride + 1) // pool
    cnn_w = ((in_w - K + 2 * pad) // stride + 1) // pool
    cnn_size = Cout * cnn_h * cnn_w
    F1p, F2p = _ceil_to(F1, 128), _ceil_to(F2, 128)

    it = iter(jax.random.split(key, 4 * L + 8))
    s = 0.1
    p = {}
    for l in range(L):
        in_dim = D if l == 0 else H
        p[f"lstm_w_ih_{l}"] = (s * jax.random.normal(next(it), (in_dim, 4 * H))).astype(jnp.bfloat16)
        p[f"lstm_w_hh_{l}"] = (s * jax.random.normal(next(it), (H, 4 * H))).astype(jnp.bfloat16)
        b_ih = s * jax.random.normal(next(it), (4 * H,))
        b_hh = s * jax.random.normal(next(it), (4 * H,))
        p[f"lstm_b_{l}"] = (b_ih + b_hh).reshape(1, 4 * H).astype(jnp.float32)   # fold once
    p["conv_w"] = (s * jax.random.normal(next(it), (Cout, Cin * K * K))).astype(jnp.bfloat16)
    p["conv_b"] = (s * jax.random.normal(next(it), (Cout, 1))).astype(jnp.float32)
    # fc1/fc2 lane widths zero-padded to 128 so every MXU push / store is lane-dense;
    # padded columns stay exactly zero through ReLU and contribute nothing to fc2.
    w1l = s * jax.random.normal(next(it), (H, F1))
    w1c = s * jax.random.normal(next(it), (cnn_size, F1))
    b1 = s * jax.random.normal(next(it), (1, F1))
    w2 = s * jax.random.normal(next(it), (F1, F2))
    b2 = s * jax.random.normal(next(it), (1, F2))
    p["fc1_w_lstm"] = jnp.pad(w1l, ((0, 0), (0, F1p - F1))).astype(jnp.bfloat16)
    p["fc1_w_conv"] = jnp.pad(w1c, ((0, 0), (0, F1p - F1))).astype(jnp.bfloat16)
    p["fc1_b"] = jnp.pad(b1, ((0, 0), (0, F1p - F1))).astype(jnp.float32)
    p["fc2_w"] = jnp.pad(w2, ((0, F1p - F1), (0, F2p - F2))).astype(jnp.bfloat16)
    p["fc2_b"] = jnp.pad(b2, ((0, 0), (0, F2p - F2))).astype(jnp.float32)
    return p


def parallel_lstm_conv2d_forward(params, x, cfg):
    B, T, D = x.shape
    H, L = cfg["lstm_hidden_size"], cfg["lstm_num_layers"]
    Cout, K = cfg["conv_out_channels"], cfg["conv_kernel_size"]
    stride, pad, pool = cfg["stride"], cfg["padding"], cfg["pool_kernel_size"]
    in_h, in_w = cfg["input_shape"]
    cnn_h = ((in_h - K + 2 * pad) // stride + 1) // pool
    cnn_w = ((in_w - K + 2 * pad) // stride + 1) // pool
    n_pool, pool2 = cnn_h * cnn_w, pool * pool
    F2 = cfg["fc2_output_size"]
    F2p = params["fc2_b"].shape[1]

    # LSTM input, time-major, row = t*B + b (bf16 feed for the MXU).
    x_tm = jnp.transpose(x, (1, 0, 2)).reshape(T * B, D).astype(jnp.bfloat16)
    # Conv input: x.unsqueeze(1) -> im2col columns.
    patches = build_conv_patches(x[:, None, :, :], K, stride, pad, pool,
                                 cnn_h, cnn_w).astype(jnp.bfloat16)

    inputs = [x_tm]
    for l in range(L):
        inputs += [params[f"lstm_w_ih_{l}"], params[f"lstm_w_hh_{l}"], params[f"lstm_b_{l}"]]
    inputs += [patches, params["conv_w"], params["conv_b"],
               params["fc1_w_lstm"], params["fc1_w_conv"], params["fc1_b"],
               params["fc2_w"], params["fc2_b"]]

    kernel = functools.partial(_fused_forward_kernel, L=L, T=T, B=B, H=H,
                               Cout=Cout, n_pool=n_pool, pool2=pool2)

    # Single-block pallas_call: every operand fits comfortably in VMEM at these shapes.
    # TODO(synk): at production batch/seq sizes re-introduce row tiling (BlockSpec grid
    # over batch/time rows, tiles 256-512 with an explicit vmem_limit_bytes) and, on v7x,
    # split the LSTM and conv/head branches across the two TensorCores via pl.core_map.
    out = pl.pallas_call(
        kernel,
        grid=(1,),
        in_specs=[pl.BlockSpec(a.shape, lambda i: (0, 0)) for a in inputs],
        out_specs=pl.BlockSpec((B, F2p), lambda i: (0, 0)),
        out_shape=jax.ShapeDtypeStruct((B, F2p), jnp.float32),
        compiler_params=pltpu.CompilerParams(dimension_semantics=("arbitrary",)),
    )(*inputs)
    return out[:, :F2]                                   # slice off the lane padding


if __name__ == "__main__":
    cfg = dict(
        lstm_input_size=16, lstm_hidden_size=32, lstm_num_layers=2, dropout=0.1,
        conv_in_channels=1, conv_out_channels=4, conv_kernel_size=3, stride=1,
        padding=1, pool_kernel_size=2, fc1_output_size=64, fc2_output_size=10,
        input_shape=(16, 16),
    )
    B = 2
    T, D = cfg["input_shape"]        # same tensor feeds LSTM (B,T,D) and conv (B,1,H,W)

    root = jax.random.PRNGKey(0)
    k_param, k_input = jax.random.split(root)
    params = init_params(k_param, cfg)
    x = jax.random.normal(k_input, (B, T, D), jnp.float32)

    fwd = jax.jit(lambda p, xx: parallel_lstm_conv2d_forward(p, xx, cfg))
    out = jax.block_until_ready(fwd(params, x))

    assert out.shape == (B, cfg["fc2_output_size"])
    assert bool(jnp.all(jnp.isfinite(out)))
    print("KERNEL_OK")
</pallas_src>

<mosaic_0001>
module attributes {stable_mosaic.version = 11 : i64} {
  func.func @_fused_forward_kernel(%arg0: i32, %arg1: memref<32x16xbf16, #tpu.memory_space<vmem>>, %arg2: memref<16x128xbf16, #tpu.memory_space<vmem>>, %arg3: memref<32x128xbf16, #tpu.memory_space<vmem>>, %arg4: memref<1x128xf32, #tpu.memory_space<vmem>>, %arg5: memref<32x128xbf16, #tpu.memory_space<vmem>>, %arg6: memref<32x128xbf16, #tpu.memory_space<vmem>>, %arg7: memref<1x128xf32, #tpu.memory_space<vmem>>, %arg8: memref<9x512xbf16, #tpu.memory_space<vmem>>, %arg9: memref<4x9xbf16, #tpu.memory_space<vmem>>, %arg10: memref<4x1xf32, #tpu.memory_space<vmem>>, %arg11: memref<32x128xbf16, #tpu.memory_space<vmem>>, %arg12: memref<256x128xbf16, #tpu.memory_space<vmem>>, %arg13: memref<1x128xf32, #tpu.memory_space<vmem>>, %arg14: memref<128x128xbf16, #tpu.memory_space<vmem>>, %arg15: memref<1x128xf32, #tpu.memory_space<vmem>>, %arg16: memref<2x128xf32, #tpu.memory_space<vmem>>) attributes {dimension_semantics = [#tpu.dimension_semantics<arbitrary>], iteration_bounds = array<i64: 1>, scalar_prefetch = 0 : i64, scratch_operands = 0 : i64, tpu.core_type = #tpu.core_type<tc>, window_params = [{pipeline_mode = #tpu.pipeline_mode<synchronous>, transform_indices = @transform_0, window_bounds = array<i64: 32, 16>}, {pipeline_mode = #tpu.pipeline_mode<synchronous>, transform_indices = @transform_1, window_bounds = array<i64: 16, 128>}, {pipeline_mode = #tpu.pipeline_mode<synchronous>, transform_indices = @transform_2, window_bounds = array<i64: 32, 128>}, {pipeline_mode = #tpu.pipeline_mode<synchronous>, transform_indices = @transform_3, window_bounds = array<i64: 1, 128>}, {pipeline_mode = #tpu.pipeline_mode<synchronous>, transform_indices = @transform_4, window_bounds = array<i64: 32, 128>}, {pipeline_mode = #tpu.pipeline_mode<synchronous>, transform_indices = @transform_5, window_bounds = array<i64: 32, 128>}, {pipeline_mode = #tpu.pipeline_mode<synchronous>, transform_indices = @transform_6, window_bounds = array<i64: 1, 128>}, {pipeline_mode = #tpu.pipeline_mode<synchronous>, transform_indices = @transform_7, window_bounds = array<i64: 9, 512>}, {pipeline_mode = #tpu.pipeline_mode<synchronous>, transform_indices = @transform_8, window_bounds = array<i64: 4, 9>}, {pipeline_mode = #tpu.pipeline_mode<synchronous>, transform_indices = @transform_9, window_bounds = array<i64: 4, 1>}, {pipeline_mode = #tpu.pipeline_mode<synchronous>, transform_indices = @transform_10, window_bounds = array<i64: 32, 128>}, {pipeline_mode = #tpu.pipeline_mode<synchronous>, transform_indices = @transform_11, window_bounds = array<i64: 256, 128>}, {pipeline_mode = #tpu.pipeline_mode<synchronous>, transform_indices = @transform_12, window_bounds = array<i64: 1, 128>}, {pipeline_mode = #tpu.pipeline_mode<synchronous>, transform_indices = @transform_13, window_bounds = array<i64: 128, 128>}, {pipeline_mode = #tpu.pipeline_mode<synchronous>, transform_indices = @transform_14, window_bounds = array<i64: 1, 128>}, {pipeline_mode = #tpu.pipeline_mode<synchronous>, transform_indices = @transform_15, window_bounds = array<i64: 2, 128>}]} {
    %c0 = arith.constant 0 : index
    %c0_0 = arith.constant 0 : index
    %0 = vector.load %arg1[%c0, %c0_0] : memref<32x16xbf16, #tpu.memory_space<vmem>>, vector<32x16xbf16>
    %c0_1 = arith.constant 0 : index
    %c0_2 = arith.constant 0 : index
    %1 = vector.load %arg2[%c0_1, %c0_2] : memref<16x128xbf16, #tpu.memory_space<vmem>>, vector<16x128xbf16>
    %c0_3 = arith.constant 0 : index
    %c0_4 = arith.constant 0 : index
    %2 = vector.load %arg3[%c0_3, %c0_4] : memref<32x128xbf16, #tpu.memory_space<vmem>>, vector<32x128xbf16>
    %c0_5 = arith.constant 0 : index
    %c0_6 = arith.constant 0 : index
    %3 = vector.load %arg4[%c0_5, %c0_6] : memref<1x128xf32, #tpu.memory_space<vmem>>, vector<1x128xf32>
    %cst = arith.constant dense<0.000000e+00> : vector<32x128xf32>
    %4 = tpu.matmul %0, %1, %cst {dimension_numbers = #tpu.dot_dimension_numbers<[1], [0], [0], [1], [0, 0, 1, 1], [], []>} : vector<32x16xbf16>, vector<16x128xbf16>, vector<32x128xf32> -> vector<32x128xf32>
    %5 = vector.broadcast %3 : vector<1x128xf32> to vector<32x128xf32>
    %6 = arith.addf %4, %5 : vector<32x128xf32>
    %cst_7 = arith.constant 0.000000e+00 : f32
    %7 = vector.broadcast %cst_7 : f32 to vector<2x32xf32>
    %cst_8 = arith.constant 0.000000e+00 : f32
    %8 = vector.broadcast %cst_8 : f32 to vector<2x32xf32>
    %9 = vector.extract_strided_slice %6 {offsets = [0, 0], sizes = [2, 128], strides = [1, 1]} : vector<32x128xf32> to vector<2x128xf32>
    %10 = arith.truncf %7 : vector<2x32xf32> to vector<2x32xbf16>
    %cst_9 = arith.constant dense<0.000000e+00> : vector<2x128xf32>
    %11 = tpu.matmul %10, %2, %cst_9 {dimension_numbers = #tpu.dot_dimension_numbers<[1], [0], [0], [1], [0, 0, 1, 1], [], []>} : vector<2x32xbf16>, vector<32x128xbf16>, vector<2x128xf32> -> vector<2x128xf32>
    %12 = arith.addf %9, %11 : vector<2x128xf32>
    %cst_10 = arith.constant 0.000000e+00 : f32
    %13 = vector.broadcast %cst_10 : f32 to vector<2x128xf32>
    %14 = arith.subf %13, %12 : vector<2x128xf32>
    %15 = math.exp %14 : vector<2x128xf32>
    %cst_11 = arith.constant 1.000000e+00 : f32
    %16 = vector.broadcast %cst_11 : f32 to vector<2x128xf32>
    %17 = arith.addf %16, %15 : vector<2x128xf32>
    %18 = tpu.reciprocal %17 {approx = true} : vector<2x128xf32> -> vector<2x128xf32>
    %19 = math.tanh %12 : vector<2x128xf32>
    %20 = vector.extract_strided_slice %18 {offsets = [0, 0], sizes = [2, 32], strides = [1, 1]} : vector<2x128xf32> to vector<2x32xf32>
    %21 = vector.extract_strided_slice %18 {offsets = [0, 32], sizes = [2, 32], strides = [1, 1]} : vector<2x128xf32> to vector<2x32xf32>
    %22 = vector.extract_strided_slice %19 {offsets = [0, 64], sizes = [2, 32], strides = [1, 1]} : vector<2x128xf32> to vector<2x32xf32>
    %23 = vector.extract_strided_slice %18 {offsets = [0, 96], sizes = [2, 32], strides = [1, 1]} : vector<2x128xf32> to vector<2x32xf32>
    %24 = arith.mulf %21, %8 : vector<2x32xf32>
    %25 = arith.mulf %20, %22 : vector<2x32xf32>
    %26 = arith.addf %24, %25 : vector<2x32xf32>
    %27 = math.tanh %26 : vector<2x32xf32>
    %28 = arith.mulf %23, %27 : vector<2x32xf32>
    %29 = vector.extract_strided_slice %6 {offsets = [2, 0], sizes = [2, 128], strides = [1, 1]} : vector<32x128xf32> to vector<2x128xf32>
    %30 = arith.truncf %28 : vector<2x32xf32> to vector<2x32xbf16>
    %cst_12 = arith.constant dense<0.000000e+00> : vector<2x128xf32>
    %31 = tpu.matmul %30, %2, %cst_12 {dimension_numbers = #tpu.dot_dimension_numbers<[1], [0], [0], [1], [0, 0, 1, 1], [], []>} : vector<2x32xbf16>, vector<32x128xbf16>, vector<2x128xf32> -> vector<2x128xf32>
    %32 = arith.addf %29, %31 : vector<2x128xf32>
    %cst_13 = arith.constant 0.000000e+00 : f32
    %33 = vector.broadcast %cst_13 : f32 to vector<2x128xf32>
    %34 = arith.subf %33, %32 : vector<2x128xf32>
    %35 = math.exp %34 : vector<2x128xf32>
    %cst_14 = arith.constant 1.000000e+00 : f32
    %36 = vector.broadcast %cst_14 : f32 to vector<2x128xf32>
    %37 = arith.addf %36, %35 : vector<2x128xf32>
    %38 = tpu.reciprocal %37 {approx = true} : vector<2x128xf32> -> vector<2x128xf32>
    %39 = math.tanh %32 : vector<2x128xf32>
    %40 = vector.extract_strided_slice %38 {offsets = [0, 0], sizes = [2, 32], strides = [1, 1]} : vector<2x128xf32> to vector<2x32xf32>
    %41 = vector.extract_strided_slice %38 {offsets = [0, 32], sizes = [2, 32], strides = [1, 1]} : vector<2x128xf32> to vector<2x32xf32>
    %42 = vector.extract_strided_slice %39 {offsets = [0, 64], sizes = [2, 32], strides = [1, 1]} : vector<2x128xf32> to vector<2x32xf32>
    %43 = vector.extract_strided_slice %38 {offsets = [0, 96], sizes = [2, 32], strides = [1, 1]} : vector<2x128xf32> to vector<2x32xf32>
    %44 = arith.mulf %41, %26 : vector<2x32xf32>
    %45 = arith.mulf %40, %42 : vector<2x32xf32>
    %46 = arith.addf %44, %45 : vector<2x32xf32>
    %47 = math.tanh %46 : vector<2x32xf32>
    %48 = arith.mulf %43, %47 : vector<2x32xf32>
    %49 = vector.extract_strided_slice %6 {offsets = [4, 0], sizes = [2, 128], strides = [1, 1]} : vector<32x128xf32> to vector<2x128xf32>
    %50 = arith.truncf %48 : vector<2x32xf32> to vector<2x32xbf16>
    %cst_15 = arith.constant dense<0.000000e+00> : vector<2x128xf32>
    %51 = tpu.matmul %50, %2, %cst_15 {dimension_numbers = #tpu.dot_dimension_numbers<[1], [0], [0], [1], [0, 0, 1, 1], [], []>} : vector<2x32xbf16>, vector<32x128xbf16>, vector<2x128xf32> -> vector<2x128xf32>
    %52 = arith.addf %49, %51 : vector<2x128xf32>
    %cst_16 = arith.constant 0.000000e+00 : f32
    %53 = vector.broadcast %cst_16 : f32 to vector<2x128xf32>
    %54 = arith.subf %53, %52 : vector<2x128xf32>
    %55 = math.exp %54 : vector<2x128xf32>
    %cst_17 = arith.constant 1.000000e+00 : f32
    %56 = vector.broadcast %cst_17 : f32 to vector<2x128xf32>
    %57 = arith.addf %56, %55 : vector<2x128xf32>
    %58 = tpu.reciprocal %57 {approx = true} : vector<2x128xf32> -> vector<2x128xf32>
    %59 = math.tanh %52 : vector<2x128xf32>
    %60 = vector.extract_strided_slice %58 {offsets = [0, 0], sizes = [2, 32], strides = [1, 1]} : vector<2x128xf32> to vector<2x32xf32>
    %61 = vector.extract_strided_slice %58 {offsets = [0, 32], sizes = [2, 32], strides = [1, 1]} : vector<2x128xf32> to vector<2x32xf32>
    %62 = vector.extract_strided_slice %59 {offsets = [0, 64], sizes = [2, 32], strides = [1, 1]} : vector<2x128xf32> to vector<2x32xf32>
    %63 = vector.extract_strided_slice %58 {offsets = [0, 96], sizes = [2, 32], strides = [1, 1]} : vector<2x128xf32> to vector<2x32xf32>
    %64 = arith.mulf %61, %46 : vector<2x32xf32>
    %65 = arith.mulf %60, %62 : vector<2x32xf32>
    %66 = arith.addf %64, %65 : vector<2x32xf32>
    %67 = math.tanh %66 : vector<2x32xf32>
    %68 = arith.mulf %63, %67 : vector<2x32xf32>
    %69 = vector.extract_strided_slice %6 {offsets = [6, 0], sizes = [2, 128], strides = [1, 1]} : vector<32x128xf32> to vector<2x128xf32>
    %70 = arith.truncf %68 : vector<2x32xf32> to vector<2x32xbf16>
    %cst_18 = arith.constant dense<0.000000e+00> : vector<2x128xf32>
    %71 = tpu.matmul %70, %2, %cst_18 {dimension_numbers = #tpu.dot_dimension_numbers<[1], [0], [0], [1], [0, 0, 1, 1], [], []>} : vector<2x32xbf16>, vector<32x128xbf16>, vector<2x128xf32> -> vector<2x128xf32>
    %72 = arith.addf %69, %71 : vector<2x128xf32>
    %cst_19 = arith.constant 0.000000e+00 : f32
    %73 = vector.broadcast %cst_19 : f32 to vector<2x128xf32>
    %74 = arith.subf %73, %72 : vector<2x128xf32>
    %75 = math.exp %74 : vector<2x128xf32>
    %cst_20 = arith.constant 1.000000e+00 : f32
    %76 = vector.broadcast %cst_20 : f32 to vector<2x128xf32>
    %77 = arith.addf %76, %75 : vector<2x128xf32>
    %78 = tpu.reciprocal %77 {approx = true} : vector<2x128xf32> -> vector<2x128xf32>
    %79 = math.tanh %72 : vector<2x128xf32>
    %80 = vector.extract_strided_slice %78 {offsets = [0, 0], sizes = [2, 32], strides = [1, 1]} : vector<2x128xf32> to vector<2x32xf32>
    %81 = vector.extract_strided_slice %78 {offsets = [0, 32], sizes = [2, 32], strides = [1, 1]} : vector<2x128xf32> to vector<2x32xf32>
    %82 = vector.extract_strided_slice %79 {offsets = [0, 64], sizes = [2, 32], strides = [1, 1]} : vector<2x128xf32> to vector<2x32xf32>
    %83 = vector.extract_strided_slice %78 {offsets = [0, 96], sizes = [2, 32], strides = [1, 1]} : vector<2x128xf32> to vector<2x32xf32>
    %84 = arith.mulf %81, %66 : vector<2x32xf32>
    %85 = arith.mulf %80, %82 : vector<2x32xf32>
    %86 = arith.addf %84, %85 : vector<2x32xf32>
    %87 = math.tanh %86 : vector<2x32xf32>
    %88 = arith.mulf %83, %87 : vector<2x32xf32>
    %89 = vector.extract_strided_slice %6 {offsets = [8, 0], sizes = [2, 128], strides = [1, 1]} : vector<32x128xf32> to vector<2x128xf32>
    %90 = arith.truncf %88 : vector<2x32xf32> to vector<2x32xbf16>
    %cst_21 = arith.constant dense<0.000000e+00> : vector<2x128xf32>
    %91 = tpu.matmul %90, %2, %cst_21 {dimension_numbers = #tpu.dot_dimension_numbers<[1], [0], [0], [1], [0, 0, 1, 1], [], []>} : vector<2x32xbf16>, vector<32x128xbf16>, vector<2x128xf32> -> vector<2x128xf32>
    %92 = arith.addf %89, %91 : vector<2x128xf32>
    %cst_22 = arith.constant 0.000000e+00 : f32
    %93 = vector.broadcast %cst_22 : f32 to vector<2x128xf32>
    %94 = arith.subf %93, %92 : vector<2x128xf32>
    %95 = math.exp %94 : vector<2x128xf32>
    %cst_23 = arith.constant 1.000000e+00 : f32
    %96 = vector.broadcast %cst_23 : f32 to vector<2x128xf32>
    %97 = arith.addf %96, %95 : vector<2x128xf32>
    %98 = tpu.reciprocal %97 {approx = true} : vector<2x128xf32> -> vector<2x128xf32>
    %99 = math.tanh %92 : vector<2x128xf32>
    %100 = vector.extract_strided_slice %98 {offsets = [0, 0], sizes = [2, 32], strides = [1, 1]} : vector<2x128xf32> to vector<2x32xf32>
    %101 = vector.extract_strided_slice %98 {offsets = [0, 32], sizes = [2, 32], strides = [1, 1]} : vector<2x128xf32> to vector<2x32xf32>
    %102 = vector.extract_strided_slice %99 {offsets = [0, 64], sizes = [2, 32], strides = [1, 1]} : vector<2x128xf32> to vector<2x32xf32>
    %103 = vector.extract_strided_slice %98 {offsets = [0, 96], sizes = [2, 32], strides = [1, 1]} : vector<2x128xf32> to vector<2x32xf32>
    %104 = arith.mulf %101, %86 : vector<2x32xf32>
    %105 = arith.mulf %100, %102 : vector<2x32xf32>
    %106 = arith.addf %104, %105 : vector<2x32xf32>
    %107 = math.tanh %106 : vector<2x32xf32>
    %108 = arith.mulf %103, %107 : vector<2x32xf32>
    %109 = vector.extract_strided_slice %6 {offsets = [10, 0], sizes = [2, 128], strides = [1, 1]} : vector<32x128xf32> to vector<2x128xf32>
    %110 = arith.truncf %108 : vector<2x32xf32> to vector<2x32xbf16>
    %cst_24 = arith.constant dense<0.000000e+00> : vector<2x128xf32>
    %111 = tpu.matmul %110, %2, %cst_24 {dimension_numbers = #tpu.dot_dimension_numbers<[1], [0], [0], [1], [0, 0, 1, 1], [], []>} : vector<2x32xbf16>, vector<32x128xbf16>, vector<2x128xf32> -> vector<2x128xf32>
    %112 = arith.addf %109, %111 : vector<2x128xf32>
    %cst_25 = arith.constant 0.000000e+00 : f32
    %113 = vector.broadcast %cst_25 : f32 to vector<2x128xf32>
    %114 = arith.subf %113, %112 : vector<2x128xf32>
    %115 = math.exp %114 : vector<2x128xf32>
    %cst_26 = arith.constant 1.000000e+00 : f32
    %116 = vector.broadcast %cst_26 : f32 to vector<2x128xf32>
    %117 = arith.addf %116, %115 : vector<2x128xf32>
    %118 = tpu.reciprocal %117 {approx = true} : vector<2x128xf32> -> vector<2x128xf32>
    %119 = math.tanh %112 : vector<2x128xf32>
    %120 = vector.extract_strided_slice %118 {offsets = [0, 0], sizes = [2, 32], strides = [1, 1]} : vector<2x128xf32> to vector<2x32xf32>
    %121 = vector.extract_strided_slice %118 {offsets = [0, 32], sizes = [2, 32], strides = [1, 1]} : vector<2x128xf32> to vector<2x32xf32>
    %122 = vector.extract_strided_slice %119 {offsets = [0, 64], sizes = [2, 32], strides = [1, 1]} : vector<2x128xf32> to vector<2x32xf32>
    %123 = vector.extract_strided_slice %118 {offsets = [0, 96], sizes = [2, 32], strides = [1, 1]} : vector<2x128xf32> to vector<2x32xf32>
    %124 = arith.mulf %121, %106 : vector<2x32xf32>
    %125 = arith.mulf %120, %122 : vector<2x32xf32>
    %126 = arith.addf %124, %125 : vector<2x32xf32>
    %127 = math.tanh %126 : vector<2x32xf32>
    %128 = arith.mulf %123, %127 : vector<2x32xf32>
    %129 = vector.extract_strided_slice %6 {offsets = [12, 0], sizes = [2, 128], strides = [1, 1]} : vector<32x128xf32> to vector<2x128xf32>
    %130 = arith.truncf %128 : vector<2x32xf32> to vector<2x32xbf16>
    %cst_27 = arith.constant dense<0.000000e+00> : vector<2x128xf32>
    %131 = tpu.matmul %130, %2, %cst_27 {dimension_numbers = #tpu.dot_dimension_numbers<[1], [0], [0], [1], [0, 0, 1, 1], [], []>} : vector<2x32xbf16>, vector<32x128xbf16>, vector<2x128xf32> -> vector<2x128xf32>
    %132 = arith.addf %129, %131 : vector<2x128xf32>
    %cst_28 = arith.constant 0.000000e+00 : f32
    %133 = vector.broadcast %cst_28 : f32 to vector<2x128xf32>
    %134 = arith.subf %133, %132 : vector<2x128xf32>
    %135 = math.exp %134 : vector<2x128xf32>
    %cst_29 = arith.constant 1.000000e+00 : f32
    %136 = vector.broadcast %cst_29 : f32 to vector<2x128xf32>
    %137 = arith.addf %136, %135 : vector<2x128xf32>
    %138 = tpu.reciprocal %137 {approx = true} : vector<2x128xf32> -> vector<2x128xf32>
    %139 = math.tanh %132 : vector<2x128xf32>
    %140 = vector.extract_strided_slice %138 {offsets = [0, 0], sizes = [2, 32], strides = [1, 1]} : vector<2x128xf32> to vector<2x32xf32>
    %141 = vector.extract_strided_slice %138 {offsets = [0, 32], sizes = [2, 32], strides = [1, 1]} : vector<2x128xf32> to vector<2x32xf32>
    %142 = vector.extract_strided_slice %139 {offsets = [0, 64], sizes = [2, 32], strides = [1, 1]} : vector<2x128xf32> to vector<2x32xf32>
    %143 = vector.extract_strided_slice %138 {offsets = [0, 96], sizes = [2, 32], strides = [1, 1]} : vector<2x128xf32> to vector<2x32xf32>
    %144 = arith.mulf %141, %126 : vector<2x32xf32>
    %145 = arith.mulf %140, %142 : vector<2x32xf32>
    %146 = arith.addf %144, %145 : vector<2x32xf32>
    %147 = math.tanh %146 : vector<2x32xf32>
    %148 = arith.mulf %143, %147 : vector<2x32xf32>
    %149 = vector.extract_strided_slice %6 {offsets = [14, 0], sizes = [2, 128], strides = [1, 1]} : vector<32x128xf32> to vector<2x128xf32>
    %150 = arith.truncf %148 : vector<2x32xf32> to vector<2x32xbf16>
    %cst_30 = arith.constant dense<0.000000e+00> : vector<2x128xf32>
    %151 = tpu.matmul %150, %2, %cst_30 {dimension_numbers = #tpu.dot_dimension_numbers<[1], [0], [0], [1], [0, 0, 1, 1], [], []>} : vector<2x32xbf16>, vector<32x128xbf16>, vector<2x128xf32> -> vector<2x128xf32>
    %152 = arith.addf %149, %151 : vector<2x128xf32>
    %cst_31 = arith.constant 0.000000e+00 : f32
    %153 = vector.broadcast %cst_31 : f32 to vector<2x128xf32>
    %154 = arith.subf %153, %152 : vector<2x128xf32>
    %155 = math.exp %154 : vector<2x128xf32>
    %cst_32 = arith.constant 1.000000e+00 : f32
    %156 = vector.broadcast %cst_32 : f32 to vector<2x128xf32>
    %157 = arith.addf %156, %155 : vector<2x128xf32>
    %158 = tpu.reciprocal %157 {approx = true} : vector<2x128xf32> -> vector<2x128xf32>
    %159 = math.tanh %152 : vector<2x128xf32>
    %160 = vector.extract_strided_slice %158 {offsets = [0, 0], sizes = [2, 32], strides = [1, 1]} : vector<2x128xf32> to vector<2x32xf32>
    %161 = vector.extract_strided_slice %158 {offsets = [0, 32], sizes = [2, 32], strides = [1, 1]} : vector<2x128xf32> to vector<2x32xf32>
    %162 = vector.extract_strided_slice %159 {offsets = [0, 64], sizes = [2, 32], strides = [1, 1]} : vector<2x128xf32> to vector<2x32xf32>
    %163 = vector.extract_strided_slice %158 {offsets = [0, 96], sizes = [2, 32], strides = [1, 1]} : vector<2x128xf32> to vector<2x32xf32>
    %164 = arith.mulf %161, %146 : vector<2x32xf32>
    %165 = arith.mulf %160, %162 : vector<2x32xf32>
    %166 = arith.addf %164, %165 : vector<2x32xf32>
    %167 = math.tanh %166 : vector<2x32xf32>
    %168 = arith.mulf %163, %167 : vector<2x32xf32>
    %169 = vector.extract_strided_slice %6 {offsets = [16, 0], sizes = [2, 128], strides = [1, 1]} : vector<32x128xf32> to vector<2x128xf32>
    %170 = arith.truncf %168 : vector<2x32xf32> to vector<2x32xbf16>
    %cst_33 = arith.constant dense<0.000000e+00> : vector<2x128xf32>
    %171 = tpu.matmul %170, %2, %cst_33 {dimension_numbers = #tpu.dot_dimension_numbers<[1], [0], [0], [1], [0, 0, 1, 1], [], []>} : vector<2x32xbf16>, vector<32x128xbf16>, vector<2x128xf32> -> vector<2x128xf32>
    %172 = arith.addf %169, %171 : vector<2x128xf32>
    %cst_34 = arith.constant 0.000000e+00 : f32
    %173 = vector.broadcast %cst_34 : f32 to vector<2x128xf32>
    %174 = arith.subf %173, %172 : vector<2x128xf32>
    %175 = math.exp %174 : vector<2x128xf32>
    %cst_35 = arith.constant 1.000000e+00 : f32
    %176 = vector.broadcast %cst_35 : f32 to vector<2x128xf32>
    %177 = arith.addf %176, %175 : vector<2x128xf32>
    %178 = tpu.reciprocal %177 {approx = true} : vector<2x128xf32> -> vector<2x128xf32>
    %179 = math.tanh %172 : vector<2x128xf32>
    %180 = vector.extract_strided_slice %178 {offsets = [0, 0], sizes = [2, 32], strides = [1, 1]} : vector<2x128xf32> to vector<2x32xf32>
    %181 = vector.extract_strided_slice %178 {offsets = [0, 32], sizes = [2, 32], strides = [1, 1]} : vector<2x128xf32> to vector<2x32xf32>
    %182 = vector.extract_strided_slice %179 {offsets = [0, 64], sizes = [2, 32], strides = [1, 1]} : vector<2x128xf32> to vector<2x32xf32>
    %183 = vector.extract_strided_slice %178 {offsets = [0, 96], sizes = [2, 32], strides = [1, 1]} : vector<2x128xf32> to vector<2x32xf32>
    %184 = arith.mulf %181, %166 : vector<2x32xf32>
    %185 = arith.mulf %180, %182 : vector<2x32xf32>
    %186 = arith.addf %184, %185 : vector<2x32xf32>
    %187 = math.tanh %186 : vector<2x32xf32>
    %188 = arith.mulf %183, %187 : vector<2x32xf32>
    %189 = vector.extract_strided_slice %6 {offsets = [18, 0], sizes = [2, 128], strides = [1, 1]} : vector<32x128xf32> to vector<2x128xf32>
    %190 = arith.truncf %188 : vector<2x32xf32> to vector<2x32xbf16>
    %cst_36 = arith.constant dense<0.000000e+00> : vector<2x128xf32>
    %191 = tpu.matmul %190, %2, %cst_36 {dimension_numbers = #tpu.dot_dimension_numbers<[1], [0], [0], [1], [0, 0, 1, 1], [], []>} : vector<2x32xbf16>, vector<32x128xbf16>, vector<2x128xf32> -> vector<2x128xf32>
    %192 = arith.addf %189, %191 : vector<2x128xf32>
    %cst_37 = arith.constant 0.000000e+00 : f32
    %193 = vector.broadcast %cst_37 : f32 to vector<2x128xf32>
    %194 = arith.subf %193, %192 : vector<2x128xf32>
    %195 = math.exp %194 : vector<2x128xf32>
    %cst_38 = arith.constant 1.000000e+00 : f32
    %196 = vector.broadcast %cst_38 : f32 to vector<2x128xf32>
    %197 = arith.addf %196, %195 : vector<2x128xf32>
    %198 = tpu.reciprocal %197 {approx = true} : vector<2x128xf32> -> vector<2x128xf32>
    %199 = math.tanh %192 : vector<2x128xf32>
    %200 = vector.extract_strided_slice %198 {offsets = [0, 0], sizes = [2, 32], strides = [1, 1]} : vector<2x128xf32> to vector<2x32xf32>
    %201 = vector.extract_strided_slice %198 {offsets = [0, 32], sizes = [2, 32], strides = [1, 1]} : vector<2x128xf32> to vector<2x32xf32>
    %202 = vector.extract_strided_slice %199 {offsets = [0, 64], sizes = [2, 32], strides = [1, 1]} : vector<2x128xf32> to vector<2x32xf32>
    %203 = vector.extract_strided_slice %198 {offsets = [0, 96], sizes = [2, 32], strides = [1, 1]} : vector<2x128xf32> to vector<2x32xf32>
    %204 = arith.mulf %201, %186 : vector<2x32xf32>
    %205 = arith.mulf %200, %202 : vector<2x32xf32>
    %206 = arith.addf %204, %205 : vector<2x32xf32>
    %207 = math.tanh %206 : vector<2x32xf32>
    %208 = arith.mulf %203, %207 : vector<2x32xf32>
    %209 = vector.extract_strided_slice %6 {offsets = [20, 0], sizes = [2, 128], strides = [1, 1]} : vector<32x128xf32> to vector<2x128xf32>
    %210 = arith.truncf %208 : vector<2x32xf32> to vector<2x32xbf16>
    %cst_39 = arith.constant dense<0.000000e+00> : vector<2x128xf32>
    %211 = tpu.matmul %210, %2, %cst_39 {dimension_numbers = #tpu.dot_dimension_numbers<[1], [0], [0], [1], [0, 0, 1, 1], [], []>} : vector<2x32xbf16>, vector<32x128xbf16>, vector<2x128xf32> -> vector<2x128xf32>
    %212 = arith.addf %209, %211 : vector<2x128xf32>
    %cst_40 = arith.constant 0.000000e+00 : f32
    %213 = vector.broadcast %cst_40 : f32 to vector<2x128xf32>
    %214 = arith.subf %213, %212 : vector<2x128xf32>
    %215 = math.exp %214 : vector<2x128xf32>
    %cst_41 = arith.constant 1.000000e+00 : f32
    %216 = vector.broadcast %cst_41 : f32 to vector<2x128xf32>
    %217 = arith.addf %216, %215 : vector<2x128xf32>
    %218 = tpu.reciprocal %217 {approx = true} : vector<2x128xf32> -> vector<2x128xf32>
    %219 = math.tanh %212 : vector<2x128xf32>
    %220 = vector.extract_strided_slice %218 {offsets = [0, 0], sizes = [2, 32], strides = [1, 1]} : vector<2x128xf32> to vector<2x32xf32>
    %221 = vector.extract_strided_slice %218 {offsets = [0, 32], sizes = [2, 32], strides = [1, 1]} : vector<2x128xf32> to vector<2x32xf32>
    %222 = vector.extract_strided_slice %219 {offsets = [0, 64], sizes = [2, 32], strides = [1, 1]} : vector<2x128xf32> to vector<2x32xf32>
    %223 = vector.extract_strided_slice %218 {offsets = [0, 96], sizes = [2, 32], strides = [1, 1]} : vector<2x128xf32> to vector<2x32xf32>
    %224 = arith.mulf %221, %206 : vector<2x32xf32>
    %225 = arith.mulf %220, %222 : vector<2x32xf32>
    %226 = arith.addf %224, %225 : vector<2x32xf32>
    %227 = math.tanh %226 : vector<2x32xf32>
    %228 = arith.mulf %223, %227 : vector<2x32xf32>
    %229 = vector.extract_strided_slice %6 {offsets = [22, 0], sizes = [2, 128], strides = [1, 1]} : vector<32x128xf32> to vector<2x128xf32>
    %230 = arith.truncf %228 : vector<2x32xf32> to vector<2x32xbf16>
    %cst_42 = arith.constant dense<0.000000e+00> : vector<2x128xf32>
    %231 = tpu.matmul %230, %2, %cst_42 {dimension_numbers = #tpu.dot_dimension_numbers<[1], [0], [0], [1], [0, 0, 1, 1], [], []>} : vector<2x32xbf16>, vector<32x128xbf16>, vector<2x128xf32> -> vector<2x128xf32>
    %232 = arith.addf %229, %231 : vector<2x128xf32>
    %cst_43 = arith.constant 0.000000e+00 : f32
    %233 = vector.broadcast %cst_43 : f32 to vector<2x128xf32>
    %234 = arith.subf %233, %232 : vector<2x128xf32>
    %235 = math.exp %234 : vector<2x128xf32>
    %cst_44 = arith.constant 1.000000e+00 : f32
    %236 = vector.broadcast %cst_44 : f32 to vector<2x128xf32>
    %237 = arith.addf %236, %235 : vector<2x128xf32>
    %238 = tpu.reciprocal %237 {approx = true} : vector<2x128xf32> -> vector<2x128xf32>
    %239 = math.tanh %232 : vector<2x128xf32>
    %240 = vector.extract_strided_slice %238 {offsets = [0, 0], sizes = [2, 32], strides = [1, 1]} : vector<2x128xf32> to vector<2x32xf32>
    %241 = vector.extract_strided_slice %238 {offsets = [0, 32], sizes = [2, 32], strides = [1, 1]} : vector<2x128xf32> to vector<2x32xf32>
    %242 = vector.extract_strided_slice %239 {offsets = [0, 64], sizes = [2, 32], strides = [1, 1]} : vector<2x128xf32> to vector<2x32xf32>
    %243 = vector.extract_strided_slice %238 {offsets = [0, 96], sizes = [2, 32], strides = [1, 1]} : vector<2x128xf32> to vector<2x32xf32>
    %244 = arith.mulf %241, %226 : vector<2x32xf32>
    %245 = arith.mulf %240, %242 : vector<2x32xf32>
    %246 = arith.addf %244, %245 : vector<2x32xf32>
    %247 = math.tanh %246 : vector<2x32xf32>
    %248 = arith.mulf %243, %247 : vector<2x32xf32>
    %249 = vector.extract_strided_slice %6 {offsets = [24, 0], sizes = [2, 128], strides = [1, 1]} : vector<32x128xf32> to vector<2x128xf32>
    %250 = arith.truncf %248 : vector<2x32xf32> to vector<2x32xbf16>
    %cst_45 = arith.constant dense<0.000000e+00> : vector<2x128xf32>
    %251 = tpu.matmul %250, %2, %cst_45 {dimension_numbers = #tpu.dot_dimension_numbers<[1], [0], [0], [1], [0, 0, 1, 1], [], []>} : vector<2x32xbf16>, vector<32x128xbf16>, vector<2x128xf32> -> vector<2x128xf32>
    %252 = arith.addf %249, %251 : vector<2x128xf32>
    %cst_46 = arith.constant 0.000000e+00 : f32
    %253 = vector.broadcast %cst_46 : f32 to vector<2x128xf32>
    %254 = arith.subf %253, %252 : vector<2x128xf32>
    %255 = math.exp %254 : vector<2x128xf32>
    %cst_47 = arith.constant 1.000000e+00 : f32
    %256 = vector.broadcast %cst_47 : f32 to vector<2x128xf32>
    %257 = arith.addf %256, %255 : vector<2x128xf32>
    %258 = tpu.reciprocal %257 {approx = true} : vector<2x128xf32> -> vector<2x128xf32>
    %259 = math.tanh %252 : vector<2x128xf32>
    %260 = vector.extract_strided_slice %258 {offsets = [0, 0], sizes = [2, 32], strides = [1, 1]} : vector<2x128xf32> to vector<2x32xf32>
    %261 = vector.extract_strided_slice %258 {offsets = [0, 32], sizes = [2, 32], strides = [1, 1]} : vector<2x128xf32> to vector<2x32xf32>
    %262 = vector.extract_strided_slice %259 {offsets = [0, 64], sizes = [2, 32], strides = [1, 1]} : vector<2x128xf32> to vector<2x32xf32>
    %263 = vector.extract_strided_slice %258 {offsets = [0, 96], sizes = [2, 32], strides = [1, 1]} : vector<2x128xf32> to vector<2x32xf32>
    %264 = arith.mulf %261, %246 : vector<2x32xf32>
    %265 = arith.mulf %260, %262 : vector<2x32xf32>
    %266 = arith.addf %264, %265 : vector<2x32xf32>
    %267 = math.tanh %266 : vector<2x32xf32>
    %268 = arith.mulf %263, %267 : vector<2x32xf32>
    %269 = vector.extract_strided_slice %6 {offsets = [26, 0], sizes = [2, 128], strides = [1, 1]} : vector<32x128xf32> to vector<2x128xf32>
    %270 = arith.truncf %268 : vector<2x32xf32> to vector<2x32xbf16>
    %cst_48 = arith.constant dense<0.000000e+00> : vector<2x128xf32>
    %271 = tpu.matmul %270, %2, %cst_48 {dimension_numbers = #tpu.dot_dimension_numbers<[1], [0], [0], [1], [0, 0, 1, 1], [], []>} : vector<2x32xbf16>, vector<32x128xbf16>, vector<2x128xf32> -> vector<2x128xf32>
    %272 = arith.addf %269, %271 : vector<2x128xf32>
    %cst_49 = arith.constant 0.000000e+00 : f32
    %273 = vector.broadcast %cst_49 : f32 to vector<2x128xf32>
    %274 = arith.subf %273, %272 : vector<2x128xf32>
    %275 = math.exp %274 : vector<2x128xf32>
    %cst_50 = arith.constant 1.000000e+00 : f32
    %276 = vector.broadcast %cst_50 : f32 to vector<2x128xf32>
    %277 = arith.addf %276, %275 : vector<2x128xf32>
    %278 = tpu.reciprocal %277 {approx = true} : vector<2x128xf32> -> vector<2x128xf32>
    %279 = math.tanh %272 : vector<2x128xf32>
    %280 = vector.extract_strided_slice %278 {offsets = [0, 0], sizes = [2, 32], strides = [1, 1]} : vector<2x128xf32> to vector<2x32xf32>
    %281 = vector.extract_strided_slice %278 {offsets = [0, 32], sizes = [2, 32], strides = [1, 1]} : vector<2x128xf32> to vector<2x32xf32>
    %282 = vector.extract_strided_slice %279 {offsets = [0, 64], sizes = [2, 32], strides = [1, 1]} : vector<2x128xf32> to vector<2x32xf32>
    %283 = vector.extract_strided_slice %278 {offsets = [0, 96], sizes = [2, 32], strides = [1, 1]} : vector<2x128xf32> to vector<2x32xf32>
    %284 = arith.mulf %281, %266 : vector<2x32xf32>
    %285 = arith.mulf %280, %282 : vector<2x32xf32>
    %286 = arith.addf %284, %285 : vector<2x32xf32>
    %287 = math.tanh %286 : vector<2x32xf32>
    %288 = arith.mulf %283, %287 : vector<2x32xf32>
    %289 = vector.extract_strided_slice %6 {offsets = [28, 0], sizes = [2, 128], strides = [1, 1]} : vector<32x128xf32> to vector<2x128xf32>
    %290 = arith.truncf %288 : vector<2x32xf32> to vector<2x32xbf16>
    %cst_51 = arith.constant dense<0.000000e+00> : vector<2x128xf32>
    %291 = tpu.matmul %290, %2, %cst_51 {dimension_numbers = #tpu.dot_dimension_numbers<[1], [0], [0], [1], [0, 0, 1, 1], [], []>} : vector<2x32xbf16>, vector<32x128xbf16>, vector<2x128xf32> -> vector<2x128xf32>
    %292 = arith.addf %289, %291 : vector<2x128xf32>
    %cst_52 = arith.constant 0.000000e+00 : f32
    %293 = vector.broadcast %cst_52 : f32 to vector<2x128xf32>
    %294 = arith.subf %293, %292 : vector<2x128xf32>
    %295 = math.exp %294 : vector<2x128xf32>
    %cst_53 = arith.constant 1.000000e+00 : f32
    %296 = vector.broadcast %cst_53 : f32 to vector<2x128xf32>
    %297 = arith.addf %296, %295 : vector<2x128xf32>
    %298 = tpu.reciprocal %297 {approx = true} : vector<2x128xf32> -> vector<2x128xf32>
    %299 = math.tanh %292 : vector<2x128xf32>
    %300 = vector.extract_strided_slice %298 {offsets = [0, 0], sizes = [2, 32], strides = [1, 1]} : vector<2x128xf32> to vector<2x32xf32>
    %301 = vector.extract_strided_slice %298 {offsets = [0, 32], sizes = [2, 32], strides = [1, 1]} : vector<2x128xf32> to vector<2x32xf32>
    %302 = vector.extract_strided_slice %299 {offsets = [0, 64], sizes = [2, 32], strides = [1, 1]} : vector<2x128xf32> to vector<2x32xf32>
    %303 = vector.extract_strided_slice %298 {offsets = [0, 96], sizes = [2, 32], strides = [1, 1]} : vector<2x128xf32> to vector<2x32xf32>
    %304 = arith.mulf %301, %286 : vector<2x32xf32>
    %305 = arith.mulf %300, %302 : vector<2x32xf32>
    %306 = arith.addf %304, %305 : vector<2x32xf32>
    %307 = math.tanh %306 : vector<2x32xf32>
    %308 = arith.mulf %303, %307 : vector<2x32xf32>
    %309 = vector.extract_strided_slice %6 {offsets = [30, 0], sizes = [2, 128], strides = [1, 1]} : vector<32x128xf32> to vector<2x128xf32>
    %310 = arith.truncf %308 : vector<2x32xf32> to vector<2x32xbf16>
    %cst_54 = arith.constant dense<0.000000e+00> : vector<2x128xf32>
    %311 = tpu.matmul %310, %2, %cst_54 {dimension_numbers = #tpu.dot_dimension_numbers<[1], [0], [0], [1], [0, 0, 1, 1], [], []>} : vector<2x32xbf16>, vector<32x128xbf16>, vector<2x128xf32> -> vector<2x128xf32>
    %312 = arith.addf %309, %311 : vector<2x128xf32>
    %cst_55 = arith.constant 0.000000e+00 : f32
    %313 = vector.broadcast %cst_55 : f32 to vector<2x128xf32>
    %314 = arith.subf %313, %312 : vector<2x128xf32>
    %315 = math.exp %314 : vector<2x128xf32>
    %cst_56 = arith.constant 1.000000e+00 : f32
    %316 = vector.broadcast %cst_56 : f32 to vector<2x128xf32>
    %317 = arith.addf %316, %315 : vector<2x128xf32>
    %318 = tpu.reciprocal %317 {approx = true} : vector<2x128xf32> -> vector<2x128xf32>
    %319 = math.tanh %312 : vector<2x128xf32>
    %320 = vector.extract_strided_slice %318 {offsets = [0, 0], sizes = [2, 32], strides = [1, 1]} : vector<2x128xf32> to vector<2x32xf32>
    %321 = vector.extract_strided_slice %318 {offsets = [0, 32], sizes = [2, 32], strides = [1, 1]} : vector<2x128xf32> to vector<2x32xf32>
    %322 = vector.extract_strided_slice %319 {offsets = [0, 64], sizes = [2, 32], strides = [1, 1]} : vector<2x128xf32> to vector<2x32xf32>
    %323 = vector.extract_strided_slice %318 {offsets = [0, 96], sizes = [2, 32], strides = [1, 1]} : vector<2x128xf32> to vector<2x32xf32>
    %324 = arith.mulf %321, %306 : vector<2x32xf32>
    %325 = arith.mulf %320, %322 : vector<2x32xf32>
    %326 = arith.addf %324, %325 : vector<2x32xf32>
    %327 = math.tanh %326 : vector<2x32xf32>
    %328 = arith.mulf %323, %327 : vector<2x32xf32>
    %329 = tpu.concatenate %28, %48, %68, %88, %108, %128, %148, %168, %188, %208, %228, %248, %268, %288, %308, %328 in 0 : vector<2x32xf32>, vector<2x32xf32>, vector<2x32xf32>, vector<2x32xf32>, vector<2x32xf32>, vector<2x32xf32>, vector<2x32xf32>, vector<2x32xf32>, vector<2x32xf32>, vector<2x32xf32>, vector<2x32xf32>, vector<2x32xf32>, vector<2x32xf32>, vector<2x32xf32>, vector<2x32xf32>, vector<2x32xf32> -> vector<32x32xf32>
    %c0_57 = arith.constant 0 : index
    %c0_58 = arith.constant 0 : index
    %330 = vector.load %arg5[%c0_57, %c0_58] : memref<32x128xbf16, #tpu.memory_space<vmem>>, vector<32x128xbf16>
    %c0_59 = arith.constant 0 : index
    %c0_60 = arith.constant 0 : index
    %331 = vector.load %arg6[%c0_59, %c0_60] : memref<32x128xbf16, #tpu.memory_space<vmem>>, vector<32x128xbf16>
    %c0_61 = arith.constant 0 : index
    %c0_62 = arith.constant 0 : index
    %332 = vector.load %arg7[%c0_61, %c0_62] : memref<1x128xf32, #tpu.memory_space<vmem>>, vector<1x128xf32>
    %333 = arith.truncf %329 : vector<32x32xf32> to vector<32x32xbf16>
    %cst_63 = arith.constant dense<0.000000e+00> : vector<32x128xf32>
    %334 = tpu.matmul %333, %330, %cst_63 {dimension_numbers = #tpu.dot_dimension_numbers<[1], [0], [0], [1], [0, 0, 1, 1], [], []>} : vector<32x32xbf16>, vector<32x128xbf16>, vector<32x128xf32> -> vector<32x128xf32>
    %335 = vector.broadcast %332 : vector<1x128xf32> to vector<32x128xf32>
    %336 = arith.addf %334, %335 : vector<32x128xf32>
    %cst_64 = arith.constant 0.000000e+00 : f32
    %337 = vector.broadcast %cst_64 : f32 to vector<2x32xf32>
    %cst_65 = arith.constant 0.000000e+00 : f32
    %338 = vector.broadcast %cst_65 : f32 to vector<2x32xf32>
    %339 = vector.extract_strided_slice %336 {offsets = [0, 0], sizes = [2, 128], strides = [1, 1]} : vector<32x128xf32> to vector<2x128xf32>
    %340 = arith.truncf %337 : vector<2x32xf32> to vector<2x32xbf16>
    %cst_66 = arith.constant dense<0.000000e+00> : vector<2x128xf32>
    %341 = tpu.matmul %340, %331, %cst_66 {dimension_numbers = #tpu.dot_dimension_numbers<[1], [0], [0], [1], [0, 0, 1, 1], [], []>} : vector<2x32xbf16>, vector<32x128xbf16>, vector<2x128xf32> -> vector<2x128xf32>
    %342 = arith.addf %339, %341 : vector<2x128xf32>
    %cst_67 = arith.constant 0.000000e+00 : f32
    %343 = vector.broadcast %cst_67 : f32 to vector<2x128xf32>
    %344 = arith.subf %343, %342 : vector<2x128xf32>
    %345 = math.exp %344 : vector<2x128xf32>
    %cst_68 = arith.constant 1.000000e+00 : f32
    %346 = vector.broadcast %cst_68 : f32 to vector<2x128xf32>
    %347 = arith.addf %346, %345 : vector<2x128xf32>
    %348 = tpu.reciprocal %347 {approx = true} : vector<2x128xf32> -> vector<2x128xf32>
    %349 = math.tanh %342 : vector<2x128xf32>
    %350 = vector.extract_strided_slice %348 {offsets = [0, 0], sizes = [2, 32], strides = [1, 1]} : vector<2x128xf32> to vector<2x32xf32>
    %351 = vector.extract_strided_slice %348 {offsets = [0, 32], sizes = [2, 32], strides = [1, 1]} : vector<2x128xf32> to vector<2x32xf32>
    %352 = vector.extract_strided_slice %349 {offsets = [0, 64], sizes = [2, 32], strides = [1, 1]} : vector<2x128xf32> to vector<2x32xf32>
    %353 = vector.extract_strided_slice %348 {offsets = [0, 96], sizes = [2, 32], strides = [1, 1]} : vector<2x128xf32> to vector<2x32xf32>
    %354 = arith.mulf %351, %338 : vector<2x32xf32>
    %355 = arith.mulf %350, %352 : vector<2x32xf32>
    %356 = arith.addf %354, %355 : vector<2x32xf32>
    %357 = math.tanh %356 : vector<2x32xf32>
    %358 = arith.mulf %353, %357 : vector<2x32xf32>
    %359 = vector.extract_strided_slice %336 {offsets = [2, 0], sizes = [2, 128], strides = [1, 1]} : vector<32x128xf32> to vector<2x128xf32>
    %360 = arith.truncf %358 : vector<2x32xf32> to vector<2x32xbf16>
    %cst_69 = arith.constant dense<0.000000e+00> : vector<2x128xf32>
    %361 = tpu.matmul %360, %331, %cst_69 {dimension_numbers = #tpu.dot_dimension_numbers<[1], [0], [0], [1], [0, 0, 1, 1], [], []>} : vector<2x32xbf16>, vector<32x128xbf16>, vector<2x128xf32> -> vector<2x128xf32>
    %362 = arith.addf %359, %361 : vector<2x128xf32>
    %cst_70 = arith.constant 0.000000e+00 : f32
    %363 = vector.broadcast %cst_70 : f32 to vector<2x128xf32>
    %364 = arith.subf %363, %362 : vector<2x128xf32>
    %365 = math.exp %364 : vector<2x128xf32>
    %cst_71 = arith.constant 1.000000e+00 : f32
    %366 = vector.broadcast %cst_71 : f32 to vector<2x128xf32>
    %367 = arith.addf %366, %365 : vector<2x128xf32>
    %368 = tpu.reciprocal %367 {approx = true} : vector<2x128xf32> -> vector<2x128xf32>
    %369 = math.tanh %362 : vector<2x128xf32>
    %370 = vector.extract_strided_slice %368 {offsets = [0, 0], sizes = [2, 32], strides = [1, 1]} : vector<2x128xf32> to vector<2x32xf32>
    %371 = vector.extract_strided_slice %368 {offsets = [0, 32], sizes = [2, 32], strides = [1, 1]} : vector<2x128xf32> to vector<2x32xf32>
    %372 = vector.extract_strided_slice %369 {offsets = [0, 64], sizes = [2, 32], strides = [1, 1]} : vector<2x128xf32> to vector<2x32xf32>
    %373 = vector.extract_strided_slice %368 {offsets = [0, 96], sizes = [2, 32], strides = [1, 1]} : vector<2x128xf32> to vector<2x32xf32>
    %374 = arith.mulf %371, %356 : vector<2x32xf32>
    %375 = arith.mulf %370, %372 : vector<2x32xf32>
    %376 = arith.addf %374, %375 : vector<2x32xf32>
    %377 = math.tanh %376 : vector<2x32xf32>
    %378 = arith.mulf %373, %377 : vector<2x32xf32>
    %379 = vector.extract_strided_slice %336 {offsets = [4, 0], sizes = [2, 128], strides = [1, 1]} : vector<32x128xf32> to vector<2x128xf32>
    %380 = arith.truncf %378 : vector<2x32xf32> to vector<2x32xbf16>
    %cst_72 = arith.constant dense<0.000000e+00> : vector<2x128xf32>
    %381 = tpu.matmul %380, %331, %cst_72 {dimension_numbers = #tpu.dot_dimension_numbers<[1], [0], [0], [1], [0, 0, 1, 1], [], []>} : vector<2x32xbf16>, vector<32x128xbf16>, vector<2x128xf32> -> vector<2x128xf32>
    %382 = arith.addf %379, %381 : vector<2x128xf32>
    %cst_73 = arith.constant 0.000000e+00 : f32
    %383 = vector.broadcast %cst_73 : f32 to vector<2x128xf32>
    %384 = arith.subf %383, %382 : vector<2x128xf32>
    %385 = math.exp %384 : vector<2x128xf32>
    %cst_74 = arith.constant 1.000000e+00 : f32
    %386 = vector.broadcast %cst_74 : f32 to vector<2x128xf32>
    %387 = arith.addf %386, %385 : vector<2x128xf32>
    %388 = tpu.reciprocal %387 {approx = true} : vector<2x128xf32> -> vector<2x128xf32>
    %389 = math.tanh %382 : vector<2x128xf32>
    %390 = vector.extract_strided_slice %388 {offsets = [0, 0], sizes = [2, 32], strides = [1, 1]} : vector<2x128xf32> to vector<2x32xf32>
    %391 = vector.extract_strided_slice %388 {offsets = [0, 32], sizes = [2, 32], strides = [1, 1]} : vector<2x128xf32> to vector<2x32xf32>
    %392 = vector.extract_strided_slice %389 {offsets = [0, 64], sizes = [2, 32], strides = [1, 1]} : vector<2x128xf32> to vector<2x32xf32>
    %393 = vector.extract_strided_slice %388 {offsets = [0, 96], sizes = [2, 32], strides = [1, 1]} : vector<2x128xf32> to vector<2x32xf32>
    %394 = arith.mulf %391, %376 : vector<2x32xf32>
    %395 = arith.mulf %390, %392 : vector<2x32xf32>
    %396 = arith.addf %394, %395 : vector<2x32xf32>
    %397 = math.tanh %396 : vector<2x32xf32>
    %398 = arith.mulf %393, %397 : vector<2x32xf32>
    %399 = vector.extract_strided_slice %336 {offsets = [6, 0], sizes = [2, 128], strides = [1, 1]} : vector<32x128xf32> to vector<2x128xf32>
    %400 = arith.truncf %398 : vector<2x32xf32> to vector<2x32xbf16>
    %cst_75 = arith.constant dense<0.000000e+00> : vector<2x128xf32>
    %401 = tpu.matmul %400, %331, %cst_75 {dimension_numbers = #tpu.dot_dimension_numbers<[1], [0], [0], [1], [0, 0, 1, 1], [], []>} : vector<2x32xbf16>, vector<32x128xbf16>, vector<2x128xf32> -> vector<2x128xf32>
    %402 = arith.addf %399, %401 : vector<2x128xf32>
    %cst_76 = arith.constant 0.000000e+00 : f32
    %403 = vector.broadcast %cst_76 : f32 to vector<2x128xf32>
    %404 = arith.subf %403, %402 : vector<2x128xf32>
    %405 = math.exp %404 : vector<2x128xf32>
    %cst_77 = arith.constant 1.000000e+00 : f32
    %406 = vector.broadcast %cst_77 : f32 to vector<2x128xf32>
    %407 = arith.addf %406, %405 : vector<2x128xf32>
    %408 = tpu.reciprocal %407 {approx = true} : vector<2x128xf32> -> vector<2x128xf32>
    %409 = math.tanh %402 : vector<2x128xf32>
    %410 = vector.extract_strided_slice %408 {offsets = [0, 0], sizes = [2, 32], strides = [1, 1]} : vector<2x128xf32> to vector<2x32xf32>
    %411 = vector.extract_strided_slice %408 {offsets = [0, 32], sizes = [2, 32], strides = [1, 1]} : vector<2x128xf32> to vector<2x32xf32>
    %412 = vector.extract_strided_slice %409 {offsets = [0, 64], sizes = [2, 32], strides = [1, 1]} : vector<2x128xf32> to vector<2x32xf32>
    %413 = vector.extract_strided_slice %408 {offsets = [0, 96], sizes = [2, 32], strides = [1, 1]} : vector<2x128xf32> to vector<2x32xf32>
    %414 = arith.mulf %411, %396 : vector<2x32xf32>
    %415 = arith.mulf %410, %412 : vector<2x32xf32>
    %416 = arith.addf %414, %415 : vector<2x32xf32>
    %417 = math.tanh %416 : vector<2x32xf32>
    %418 = arith.mulf %413, %417 : vector<2x32xf32>
    %419 = vector.extract_strided_slice %336 {offsets = [8, 0], sizes = [2, 128], strides = [1, 1]} : vector<32x128xf32> to vector<2x128xf32>
    %420 = arith.truncf %418 : vector<2x32xf32> to vector<2x32xbf16>
    %cst_78 = arith.constant dense<0.000000e+00> : vector<2x128xf32>
    %421 = tpu.matmul %420, %331, %cst_78 {dimension_numbers = #tpu.dot_dimension_numbers<[1], [0], [0], [1], [0, 0, 1, 1], [], []>} : vector<2x32xbf16>, vector<32x128xbf16>, vector<2x128xf32> -> vector<2x128xf32>
    %422 = arith.addf %419, %421 : vector<2x128xf32>
    %cst_79 = arith.constant 0.000000e+00 : f32
    %423 = vector.broadcast %cst_79 : f32 to vector<2x128xf32>
    %424 = arith.subf %423, %422 : vector<2x128xf32>
    %425 = math.exp %424 : vector<2x128xf32>
    %cst_80 = arith.constant 1.000000e+00 : f32
    %426 = vector.broadcast %cst_80 : f32 to vector<2x128xf32>
    %427 = arith.addf %426, %425 : vector<2x128xf32>
    %428 = tpu.reciprocal %427 {approx = true} : vector<2x128xf32> -> vector<2x128xf32>
    %429 = math.tanh %422 : vector<2x128xf32>
    %430 = vector.extract_strided_slice %428 {offsets = [0, 0], sizes = [2, 32], strides = [1, 1]} : vector<2x128xf32> to vector<2x32xf32>
    %431 = vector.extract_strided_slice %428 {offsets = [0, 32], sizes = [2, 32], strides = [1, 1]} : vector<2x128xf32> to vector<2x32xf32>
    %432 = vector.extract_strided_slice %429 {offsets = [0, 64], sizes = [2, 32], strides = [1, 1]} : vector<2x128xf32> to vector<2x32xf32>
    %433 = vector.extract_strided_slice %428 {offsets = [0, 96], sizes = [2, 32], strides = [1, 1]} : vector<2x128xf32> to vector<2x32xf32>
    %434 = arith.mulf %431, %416 : vector<2x32xf32>
    %435 = arith.mulf %430, %432 : vector<2x32xf32>
    %436 = arith.addf %434, %435 : vector<2x32xf32>
    %437 = math.tanh %436 : vector<2x32xf32>
    %438 = arith.mulf %433, %437 : vector<2x32xf32>
    %439 = vector.extract_strided_slice %336 {offsets = [10, 0], sizes = [2, 128], strides = [1, 1]} : vector<32x128xf32> to vector<2x128xf32>
    %440 = arith.truncf %438 : vector<2x32xf32> to vector<2x32xbf16>
    %cst_81 = arith.constant dense<0.000000e+00> : vector<2x128xf32>
    %441 = tpu.matmul %440, %331, %cst_81 {dimension_numbers = #tpu.dot_dimension_numbers<[1], [0], [0], [1], [0, 0, 1, 1], [], []>} : vector<2x32xbf16>, vector<32x128xbf16>, vector<2x128xf32> -> vector<2x128xf32>
    %442 = arith.addf %439, %441 : vector<2x128xf32>
    %cst_82 = arith.constant 0.000000e+00 : f32
    %443 = vector.broadcast %cst_82 : f32 to vector<2x128xf32>
    %444 = arith.subf %443, %442 : vector<2x128xf32>
    %445 = math.exp %444 : vector<2x128xf32>
    %cst_83 = arith.constant 1.000000e+00 : f32
    %446 = vector.broadcast %cst_83 : f32 to vector<2x128xf32>
    %447 = arith.addf %446, %445 : vector<2x128xf32>
    %448 = tpu.reciprocal %447 {approx = true} : vector<2x128xf32> -> vector<2x128xf32>
    %449 = math.tanh %442 : vector<2x128xf32>
    %450 = vector.extract_strided_slice %448 {offsets = [0, 0], sizes = [2, 32], strides = [1, 1]} : vector<2x128xf32> to vector<2x32xf32>
    %451 = vector.extract_strided_slice %448 {offsets = [0, 32], sizes = [2, 32], strides = [1, 1]} : vector<2x128xf32> to vector<2x32xf32>
    %452 = vector.extract_strided_slice %449 {offsets = [0, 64], sizes = [2, 32], strides = [1, 1]} : vector<2x128xf32> to vector<2x32xf32>
    %453 = vector.extract_strided_slice %448 {offsets = [0, 96], sizes = [2, 32], strides = [1, 1]} : vector<2x128xf32> to vector<2x32xf32>
    %454 = arith.mulf %451, %436 : vector<2x32xf32>
    %455 = arith.mulf %450, %452 : vector<2x32xf32>
    %456 = arith.addf %454, %455 : vector<2x32xf32>
    %457 = math.tanh %456 : vector<2x32xf32>
    %458 = arith.mulf %453, %457 : vector<2x32xf32>
    %459 = vector.extract_strided_slice %336 {offsets = [12, 0], sizes = [2, 128], strides = [1, 1]} : vector<32x128xf32> to vector<2x128xf32>
    %460 = arith.truncf %458 : vector<2x32xf32> to vector<2x32xbf16>
    %cst_84 = arith.constant dense<0.000000e+00> : vector<2x128xf32>
    %461 = tpu.matmul %460, %331, %cst_84 {dimension_numbers = #tpu.dot_dimension_numbers<[1], [0], [0], [1], [0, 0, 1, 1], [], []>} : vector<2x32xbf16>, vector<32x128xbf16>, vector<2x128xf32> -> vector<2x128xf32>
    %462 = arith.addf %459, %461 : vector<2x128xf32>
    %cst_85 = arith.constant 0.000000e+00 : f32
    %463 = vector.broadcast %cst_85 : f32 to vector<2x128xf32>
    %464 = arith.subf %463, %462 : vector<2x128xf32>
    %465 = math.exp %464 : vector<2x128xf32>
    %cst_86 = arith.constant 1.000000e+00 : f32
    %466 = vector.broadcast %cst_86 : f32 to vector<2x128xf32>
    %467 = arith.addf %466, %465 : vector<2x128xf32>
    %468 = tpu.reciprocal %467 {approx = true} : vector<2x128xf32> -> vector<2x128xf32>
    %469 = math.tanh %462 : vector<2x128xf32>
    %470 = vector.extract_strided_slice %468 {offsets = [0, 0], sizes = [2, 32], strides = [1, 1]} : vector<2x128xf32> to vector<2x32xf32>
    %471 = vector.extract_strided_slice %468 {offsets = [0, 32], sizes = [2, 32], strides = [1, 1]} : vector<2x128xf32> to vector<2x32xf32>
    %472 = vector.extract_strided_slice %469 {offsets = [0, 64], sizes = [2, 32], strides = [1, 1]} : vector<2x128xf32> to vector<2x32xf32>
    %473 = vector.extract_strided_slice %468 {offsets = [0, 96], sizes = [2, 32], strides = [1, 1]} : vector<2x128xf32> to vector<2x32xf32>
    %474 = arith.mulf %471, %456 : vector<2x32xf32>
    %475 = arith.mulf %470, %472 : vector<2x32xf32>
    %476 = arith.addf %474, %475 : vector<2x32xf32>
    %477 = math.tanh %476 : vector<2x32xf32>
    %478 = arith.mulf %473, %477 : vector<2x32xf32>
    %479 = vector.extract_strided_slice %336 {offsets = [14, 0], sizes = [2, 128], strides = [1, 1]} : vector<32x128xf32> to vector<2x128xf32>
    %480 = arith.truncf %478 : vector<2x32xf32> to vector<2x32xbf16>
    %cst_87 = arith.constant dense<0.000000e+00> : vector<2x128xf32>
    %481 = tpu.matmul %480, %331, %cst_87 {dimension_numbers = #tpu.dot_dimension_numbers<[1], [0], [0], [1], [0, 0, 1, 1], [], []>} : vector<2x32xbf16>, vector<32x128xbf16>, vector<2x128xf32> -> vector<2x128xf32>
    %482 = arith.addf %479, %481 : vector<2x128xf32>
    %cst_88 = arith.constant 0.000000e+00 : f32
    %483 = vector.broadcast %cst_88 : f32 to vector<2x128xf32>
    %484 = arith.subf %483, %482 : vector<2x128xf32>
    %485 = math.exp %484 : vector<2x128xf32>
    %cst_89 = arith.constant 1.000000e+00 : f32
    %486 = vector.broadcast %cst_89 : f32 to vector<2x128xf32>
    %487 = arith.addf %486, %485 : vector<2x128xf32>
    %488 = tpu.reciprocal %487 {approx = true} : vector<2x128xf32> -> vector<2x128xf32>
    %489 = math.tanh %482 : vector<2x128xf32>
    %490 = vector.extract_strided_slice %488 {offsets = [0, 0], sizes = [2, 32], strides = [1, 1]} : vector<2x128xf32> to vector<2x32xf32>
    %491 = vector.extract_strided_slice %488 {offsets = [0, 32], sizes = [2, 32], strides = [1, 1]} : vector<2x128xf32> to vector<2x32xf32>
    %492 = vector.extract_strided_slice %489 {offsets = [0, 64], sizes = [2, 32], strides = [1, 1]} : vector<2x128xf32> to vector<2x32xf32>
    %493 = vector.extract_strided_slice %488 {offsets = [0, 96], sizes = [2, 32], strides = [1, 1]} : vector<2x128xf32> to vector<2x32xf32>
    %494 = arith.mulf %491, %476 : vector<2x32xf32>
    %495 = arith.mulf %490, %492 : vector<2x32xf32>
    %496 = arith.addf %494, %495 : vector<2x32xf32>
    %497 = math.tanh %496 : vector<2x32xf32>
    %498 = arith.mulf %493, %497 : vector<2x32xf32>
    %499 = vector.extract_strided_slice %336 {offsets = [16, 0], sizes = [2, 128], strides = [1, 1]} : vector<32x128xf32> to vector<2x128xf32>
    %500 = arith.truncf %498 : vector<2x32xf32> to vector<2x32xbf16>
    %cst_90 = arith.constant dense<0.000000e+00> : vector<2x128xf32>
    %501 = tpu.matmul %500, %331, %cst_90 {dimension_numbers = #tpu.dot_dimension_numbers<[1], [0], [0], [1], [0, 0, 1, 1], [], []>} : vector<2x32xbf16>, vector<32x128xbf16>, vector<2x128xf32> -> vector<2x128xf32>
    %502 = arith.addf %499, %501 : vector<2x128xf32>
    %cst_91 = arith.constant 0.000000e+00 : f32
    %503 = vector.broadcast %cst_91 : f32 to vector<2x128xf32>
    %504 = arith.subf %503, %502 : vector<2x128xf32>
    %505 = math.exp %504 : vector<2x128xf32>
    %cst_92 = arith.constant 1.000000e+00 : f32
    %506 = vector.broadcast %cst_92 : f32 to vector<2x128xf32>
    %507 = arith.addf %506, %505 : vector<2x128xf32>
    %508 = tpu.reciprocal %507 {approx = true} : vector<2x128xf32> -> vector<2x128xf32>
    %509 = math.tanh %502 : vector<2x128xf32>
    %510 = vector.extract_strided_slice %508 {offsets = [0, 0], sizes = [2, 32], strides = [1, 1]} : vector<2x128xf32> to vector<2x32xf32>
    %511 = vector.extract_strided_slice %508 {offsets = [0, 32], sizes = [2, 32], strides = [1, 1]} : vector<2x128xf32> to vector<2x32xf32>
    %512 = vector.extract_strided_slice %509 {offsets = [0, 64], sizes = [2, 32], strides = [1, 1]} : vector<2x128xf32> to vector<2x32xf32>
    %513 = vector.extract_strided_slice %508 {offsets = [0, 96], sizes = [2, 32], strides = [1, 1]} : vector<2x128xf32> to vector<2x32xf32>
    %514 = arith.mulf %511, %496 : vector<2x32xf32>
    %515 = arith.mulf %510, %512 : vector<2x32xf32>
    %516 = arith.addf %514, %515 : vector<2x32xf32>
    %517 = math.tanh %516 : vector<2x32xf32>
    %518 = arith.mulf %513, %517 : vector<2x32xf32>
    %519 = vector.extract_strided_slice %336 {offsets = [18, 0], sizes = [2, 128], strides = [1, 1]} : vector<32x128xf32> to vector<2x128xf32>
    %520 = arith.truncf %518 : vector<2x32xf32> to vector<2x32xbf16>
    %cst_93 = arith.constant dense<0.000000e+00> : vector<2x128xf32>
    %521 = tpu.matmul %520, %331, %cst_93 {dimension_numbers = #tpu.dot_dimension_numbers<[1], [0], [0], [1], [0, 0, 1, 1], [], []>} : vector<2x32xbf16>, vector<32x128xbf16>, vector<2x128xf32> -> vector<2x128xf32>
    %522 = arith.addf %519, %521 : vector<2x128xf32>
    %cst_94 = arith.constant 0.000000e+00 : f32
    %523 = vector.broadcast %cst_94 : f32 to vector<2x128xf32>
    %524 = arith.subf %523, %522 : vector<2x128xf32>
    %525 = math.exp %524 : vector<2x128xf32>
    %cst_95 = arith.constant 1.000000e+00 : f32
    %526 = vector.broadcast %cst_95 : f32 to vector<2x128xf32>
    %527 = arith.addf %526, %525 : vector<2x128xf32>
    %528 = tpu.reciprocal %527 {approx = true} : vector<2x128xf32> -> vector<2x128xf32>
    %529 = math.tanh %522 : vector<2x128xf32>
    %530 = vector.extract_strided_slice %528 {offsets = [0, 0], sizes = [2, 32], strides = [1, 1]} : vector<2x128xf32> to vector<2x32xf32>
    %531 = vector.extract_strided_slice %528 {offsets = [0, 32], sizes = [2, 32], strides = [1, 1]} : vector<2x128xf32> to vector<2x32xf32>
    %532 = vector.extract_strided_slice %529 {offsets = [0, 64], sizes = [2, 32], strides = [1, 1]} : vector<2x128xf32> to vector<2x32xf32>
    %533 = vector.extract_strided_slice %528 {offsets = [0, 96], sizes = [2, 32], strides = [1, 1]} : vector<2x128xf32> to vector<2x32xf32>
    %534 = arith.mulf %531, %516 : vector<2x32xf32>
    %535 = arith.mulf %530, %532 : vector<2x32xf32>
    %536 = arith.addf %534, %535 : vector<2x32xf32>
    %537 = math.tanh %536 : vector<2x32xf32>
    %538 = arith.mulf %533, %537 : vector<2x32xf32>
    %539 = vector.extract_strided_slice %336 {offsets = [20, 0], sizes = [2, 128], strides = [1, 1]} : vector<32x128xf32> to vector<2x128xf32>
    %540 = arith.truncf %538 : vector<2x32xf32> to vector<2x32xbf16>
    %cst_96 = arith.constant dense<0.000000e+00> : vector<2x128xf32>
    %541 = tpu.matmul %540, %331, %cst_96 {dimension_numbers = #tpu.dot_dimension_numbers<[1], [0], [0], [1], [0, 0, 1, 1], [], []>} : vector<2x32xbf16>, vector<32x128xbf16>, vector<2x128xf32> -> vector<2x128xf32>
    %542 = arith.addf %539, %541 : vector<2x128xf32>
    %cst_97 = arith.constant 0.000000e+00 : f32
    %543 = vector.broadcast %cst_97 : f32 to vector<2x128xf32>
    %544 = arith.subf %543, %542 : vector<2x128xf32>
    %545 = math.exp %544 : vector<2x128xf32>
    %cst_98 = arith.constant 1.000000e+00 : f32
    %546 = vector.broadcast %cst_98 : f32 to vector<2x128xf32>
    %547 = arith.addf %546, %545 : vector<2x128xf32>
    %548 = tpu.reciprocal %547 {approx = true} : vector<2x128xf32> -> vector<2x128xf32>
    %549 = math.tanh %542 : vector<2x128xf32>
    %550 = vector.extract_strided_slice %548 {offsets = [0, 0], sizes = [2, 32], strides = [1, 1]} : vector<2x128xf32> to vector<2x32xf32>
    %551 = vector.extract_strided_slice %548 {offsets = [0, 32], sizes = [2, 32], strides = [1, 1]} : vector<2x128xf32> to vector<2x32xf32>
    %552 = vector.extract_strided_slice %549 {offsets = [0, 64], sizes = [2, 32], strides = [1, 1]} : vector<2x128xf32> to vector<2x32xf32>
    %553 = vector.extract_strided_slice %548 {offsets = [0, 96], sizes = [2, 32], strides = [1, 1]} : vector<2x128xf32> to vector<2x32xf32>
    %554 = arith.mulf %551, %536 : vector<2x32xf32>
    %555 = arith.mulf %550, %552 : vector<2x32xf32>
    %556 = arith.addf %554, %555 : vector<2x32xf32>
    %557 = math.tanh %556 : vector<2x32xf32>
    %558 = arith.mulf %553, %557 : vector<2x32xf32>
    %559 = vector.extract_strided_slice %336 {offsets = [22, 0], sizes = [2, 128], strides = [1, 1]} : vector<32x128xf32> to vector<2x128xf32>
    %560 = arith.truncf %558 : vector<2x32xf32> to vector<2x32xbf16>
    %cst_99 = arith.constant dense<0.000000e+00> : vector<2x128xf32>
    %561 = tpu.matmul %560, %331, %cst_99 {dimension_numbers = #tpu.dot_dimension_numbers<[1], [0], [0], [1], [0, 0, 1, 1], [], []>} : vector<2x32xbf16>, vector<32x128xbf16>, vector<2x128xf32> -> vector<2x128xf32>
    %562 = arith.addf %559, %561 : vector<2x128xf32>
    %cst_100 = arith.constant 0.000000e+00 : f32
    %563 = vector.broadcast %cst_100 : f32 to vector<2x128xf32>
    %564 = arith.subf %563, %562 : vector<2x128xf32>
    %565 = math.exp %564 : vector<2x128xf32>
    %cst_101 = arith.constant 1.000000e+00 : f32
    %566 = vector.broadcast %cst_101 : f32 to vector<2x128xf32>
    %567 = arith.addf %566, %565 : vector<2x128xf32>
    %568 = tpu.reciprocal %567 {approx = true} : vector<2x128xf32> -> vector<2x128xf32>
    %569 = math.tanh %562 : vector<2x128xf32>
    %570 = vector.extract_strided_slice %568 {offsets = [0, 0], sizes = [2, 32], strides = [1, 1]} : vector<2x128xf32> to vector<2x32xf32>
    %571 = vector.extract_strided_slice %568 {offsets = [0, 32], sizes = [2, 32], strides = [1, 1]} : vector<2x128xf32> to vector<2x32xf32>
    %572 = vector.extract_strided_slice %569 {offsets = [0, 64], sizes = [2, 32], strides = [1, 1]} : vector<2x128xf32> to vector<2x32xf32>
    %573 = vector.extract_strided_slice %568 {offsets = [0, 96], sizes = [2, 32], strides = [1, 1]} : vector<2x128xf32> to vector<2x32xf32>
    %574 = arith.mulf %571, %556 : vector<2x32xf32>
    %575 = arith.mulf %570, %572 : vector<2x32xf32>
    %576 = arith.addf %574, %575 : vector<2x32xf32>
    %577 = math.tanh %576 : vector<2x32xf32>
    %578 = arith.mulf %573, %577 : vector<2x32xf32>
    %579 = vector.extract_strided_slice %336 {offsets = [24, 0], sizes = [2, 128], strides = [1, 1]} : vector<32x128xf32> to vector<2x128xf32>
    %580 = arith.truncf %578 : vector<2x32xf32> to vector<2x32xbf16>
    %cst_102 = arith.constant dense<0.000000e+00> : vector<2x128xf32>
    %581 = tpu.matmul %580, %331, %cst_102 {dimension_numbers = #tpu.dot_dimension_numbers<[1], [0], [0], [1], [0, 0, 1, 1], [], []>} : vector<2x32xbf16>, vector<32x128xbf16>, vector<2x128xf32> -> vector<2x128xf32>
    %582 = arith.addf %579, %581 : vector<2x128xf32>
    %cst_103 = arith.constant 0.000000e+00 : f32
    %583 = vector.broadcast %cst_103 : f32 to vector<2x128xf32>
    %584 = arith.subf %583, %582 : vector<2x128xf32>
    %585 = math.exp %584 : vector<2x128xf32>
    %cst_104 = arith.constant 1.000000e+00 : f32
    %586 = vector.broadcast %cst_104 : f32 to vector<2x128xf32>
    %587 = arith.addf %586, %585 : vector<2x128xf32>
    %588 = tpu.reciprocal %587 {approx = true} : vector<2x128xf32> -> vector<2x128xf32>
    %589 = math.tanh %582 : vector<2x128xf32>
    %590 = vector.extract_strided_slice %588 {offsets = [0, 0], sizes = [2, 32], strides = [1, 1]} : vector<2x128xf32> to vector<2x32xf32>
    %591 = vector.extract_strided_slice %588 {offsets = [0, 32], sizes = [2, 32], strides = [1, 1]} : vector<2x128xf32> to vector<2x32xf32>
    %592 = vector.extract_strided_slice %589 {offsets = [0, 64], sizes = [2, 32], strides = [1, 1]} : vector<2x128xf32> to vector<2x32xf32>
    %593 = vector.extract_strided_slice %588 {offsets = [0, 96], sizes = [2, 32], strides = [1, 1]} : vector<2x128xf32> to vector<2x32xf32>
    %594 = arith.mulf %591, %576 : vector<2x32xf32>
    %595 = arith.mulf %590, %592 : vector<2x32xf32>
    %596 = arith.addf %594, %595 : vector<2x32xf32>
    %597 = math.tanh %596 : vector<2x32xf32>
    %598 = arith.mulf %593, %597 : vector<2x32xf32>
    %599 = vector.extract_strided_slice %336 {offsets = [26, 0], sizes = [2, 128], strides = [1, 1]} : vector<32x128xf32> to vector<2x128xf32>
    %600 = arith.truncf %598 : vector<2x32xf32> to vector<2x32xbf16>
    %cst_105 = arith.constant dense<0.000000e+00> : vector<2x128xf32>
    %601 = tpu.matmul %600, %331, %cst_105 {dimension_numbers = #tpu.dot_dimension_numbers<[1], [0], [0], [1], [0, 0, 1, 1], [], []>} : vector<2x32xbf16>, vector<32x128xbf16>, vector<2x128xf32> -> vector<2x128xf32>
    %602 = arith.addf %599, %601 : vector<2x128xf32>
    %cst_106 = arith.constant 0.000000e+00 : f32
    %603 = vector.broadcast %cst_106 : f32 to vector<2x128xf32>
    %604 = arith.subf %603, %602 : vector<2x128xf32>
    %605 = math.exp %604 : vector<2x128xf32>
    %cst_107 = arith.constant 1.000000e+00 : f32
    %606 = vector.broadcast %cst_107 : f32 to vector<2x128xf32>
    %607 = arith.addf %606, %605 : vector<2x128xf32>
    %608 = tpu.reciprocal %607 {approx = true} : vector<2x128xf32> -> vector<2x128xf32>
    %609 = math.tanh %602 : vector<2x128xf32>
    %610 = vector.extract_strided_slice %608 {offsets = [0, 0], sizes = [2, 32], strides = [1, 1]} : vector<2x128xf32> to vector<2x32xf32>
    %611 = vector.extract_strided_slice %608 {offsets = [0, 32], sizes = [2, 32], strides = [1, 1]} : vector<2x128xf32> to vector<2x32xf32>
    %612 = vector.extract_strided_slice %609 {offsets = [0, 64], sizes = [2, 32], strides = [1, 1]} : vector<2x128xf32> to vector<2x32xf32>
    %613 = vector.extract_strided_slice %608 {offsets = [0, 96], sizes = [2, 32], strides = [1, 1]} : vector<2x128xf32> to vector<2x32xf32>
    %614 = arith.mulf %611, %596 : vector<2x32xf32>
    %615 = arith.mulf %610, %612 : vector<2x32xf32>
    %616 = arith.addf %614, %615 : vector<2x32xf32>
    %617 = math.tanh %616 : vector<2x32xf32>
    %618 = arith.mulf %613, %617 : vector<2x32xf32>
    %619 = vector.extract_strided_slice %336 {offsets = [28, 0], sizes = [2, 128], strides = [1, 1]} : vector<32x128xf32> to vector<2x128xf32>
    %620 = arith.truncf %618 : vector<2x32xf32> to vector<2x32xbf16>
    %cst_108 = arith.constant dense<0.000000e+00> : vector<2x128xf32>
    %621 = tpu.matmul %620, %331, %cst_108 {dimension_numbers = #tpu.dot_dimension_numbers<[1], [0], [0], [1], [0, 0, 1, 1], [], []>} : vector<2x32xbf16>, vector<32x128xbf16>, vector<2x128xf32> -> vector<2x128xf32>
    %622 = arith.addf %619, %621 : vector<2x128xf32>
    %cst_109 = arith.constant 0.000000e+00 : f32
    %623 = vector.broadcast %cst_109 : f32 to vector<2x128xf32>
    %624 = arith.subf %623, %622 : vector<2x128xf32>
    %625 = math.exp %624 : vector<2x128xf32>
    %cst_110 = arith.constant 1.000000e+00 : f32
    %626 = vector.broadcast %cst_110 : f32 to vector<2x128xf32>
    %627 = arith.addf %626, %625 : vector<2x128xf32>
    %628 = tpu.reciprocal %627 {approx = true} : vector<2x128xf32> -> vector<2x128xf32>
    %629 = math.tanh %622 : vector<2x128xf32>
    %630 = vector.extract_strided_slice %628 {offsets = [0, 0], sizes = [2, 32], strides = [1, 1]} : vector<2x128xf32> to vector<2x32xf32>
    %631 = vector.extract_strided_slice %628 {offsets = [0, 32], sizes = [2, 32], strides = [1, 1]} : vector<2x128xf32> to vector<2x32xf32>
    %632 = vector.extract_strided_slice %629 {offsets = [0, 64], sizes = [2, 32], strides = [1, 1]} : vector<2x128xf32> to vector<2x32xf32>
    %633 = vector.extract_strided_slice %628 {offsets = [0, 96], sizes = [2, 32], strides = [1, 1]} : vector<2x128xf32> to vector<2x32xf32>
    %634 = arith.mulf %631, %616 : vector<2x32xf32>
    %635 = arith.mulf %630, %632 : vector<2x32xf32>
    %636 = arith.addf %634, %635 : vector<2x32xf32>
    %637 = math.tanh %636 : vector<2x32xf32>
    %638 = arith.mulf %633, %637 : vector<2x32xf32>
    %639 = vector.extract_strided_slice %336 {offsets = [30, 0], sizes = [2, 128], strides = [1, 1]} : vector<32x128xf32> to vector<2x128xf32>
    %640 = arith.truncf %638 : vector<2x32xf32> to vector<2x32xbf16>
    %cst_111 = arith.constant dense<0.000000e+00> : vector<2x128xf32>
    %641 = tpu.matmul %640, %331, %cst_111 {dimension_numbers = #tpu.dot_dimension_numbers<[1], [0], [0], [1], [0, 0, 1, 1], [], []>} : vector<2x32xbf16>, vector<32x128xbf16>, vector<2x128xf32> -> vector<2x128xf32>
    %642 = arith.addf %639, %641 : vector<2x128xf32>
    %cst_112 = arith.constant 0.000000e+00 : f32
    %643 = vector.broadcast %cst_112 : f32 to vector<2x128xf32>
    %644 = arith.subf %643, %642 : vector<2x128xf32>
    %645 = math.exp %644 : vector<2x128xf32>
    %cst_113 = arith.constant 1.000000e+00 : f32
    %646 = vector.broadcast %cst_113 : f32 to vector<2x128xf32>
    %647 = arith.addf %646, %645 : vector<2x128xf32>
    %648 = tpu.reciprocal %647 {approx = true} : vector<2x128xf32> -> vector<2x128xf32>
    %649 = math.tanh %642 : vector<2x128xf32>
    %650 = vector.extract_strided_slice %648 {offsets = [0, 0], sizes = [2, 32], strides = [1, 1]} : vector<2x128xf32> to vector<2x32xf32>
    %651 = vector.extract_strided_slice %648 {offsets = [0, 32], sizes = [2, 32], strides = [1, 1]} : vector<2x128xf32> to vector<2x32xf32>
    %652 = vector.extract_strided_slice %649 {offsets = [0, 64], sizes = [2, 32], strides = [1, 1]} : vector<2x128xf32> to vector<2x32xf32>
    %653 = vector.extract_strided_slice %648 {offsets = [0, 96], sizes = [2, 32], strides = [1, 1]} : vector<2x128xf32> to vector<2x32xf32>
    %654 = arith.mulf %651, %636 : vector<2x32xf32>
    %655 = arith.mulf %650, %652 : vector<2x32xf32>
    %656 = arith.addf %654, %655 : vector<2x32xf32>
    %657 = math.tanh %656 : vector<2x32xf32>
    %658 = arith.mulf %653, %657 : vector<2x32xf32>
    %c0_114 = arith.constant 0 : index
    %c0_115 = arith.constant 0 : index
    %659 = vector.load %arg9[%c0_114, %c0_115] : memref<4x9xbf16, #tpu.memory_space<vmem>>, vector<4x9xbf16>
    %c0_116 = arith.constant 0 : index
    %c0_117 = arith.constant 0 : index
    %660 = vector.load %arg8[%c0_116, %c0_117] : memref<9x512xbf16, #tpu.memory_space<vmem>>, vector<9x512xbf16>
    %cst_118 = arith.constant dense<0.000000e+00> : vector<4x512xf32>
    %661 = tpu.matmul %659, %660, %cst_118 {dimension_numbers = #tpu.dot_dimension_numbers<[1], [0], [0], [1], [0, 0, 1, 1], [], []>} : vector<4x9xbf16>, vector<9x512xbf16>, vector<4x512xf32> -> vector<4x512xf32>
    %c0_119 = arith.constant 0 : index
    %c0_120 = arith.constant 0 : index
    %662 = vector.load %arg10[%c0_119, %c0_120] : memref<4x1xf32, #tpu.memory_space<vmem>>, vector<4x1xf32>
    %663 = vector.broadcast %662 : vector<4x1xf32> to vector<4x512xf32>
    %664 = arith.addf %661, %663 : vector<4x512xf32>
    %cst_121 = arith.constant 0.000000e+00 : f32
    %665 = vector.broadcast %cst_121 : f32 to vector<4x512xf32>
    %666 = arith.maximumf %664, %665 : vector<4x512xf32>
    %667 = arith.truncf %658 : vector<2x32xf32> to vector<2x32xbf16>
    %c0_122 = arith.constant 0 : index
    %c0_123 = arith.constant 0 : index
    %668 = vector.load %arg11[%c0_122, %c0_123] : memref<32x128xbf16, #tpu.memory_space<vmem>>, vector<32x128xbf16>
    %cst_124 = arith.constant dense<0.000000e+00> : vector<2x128xf32>
    %669 = tpu.matmul %667, %668, %cst_124 {dimension_numbers = #tpu.dot_dimension_numbers<[1], [0], [0], [1], [0, 0, 1, 1], [], []>} : vector<2x32xbf16>, vector<32x128xbf16>, vector<2x128xf32> -> vector<2x128xf32>
    %c0_125 = arith.constant 0 : index
    %c0_126 = arith.constant 0 : index
    %670 = vector.load %arg13[%c0_125, %c0_126] : memref<1x128xf32, #tpu.memory_space<vmem>>, vector<1x128xf32>
    %671 = vector.broadcast %670 : vector<1x128xf32> to vector<2x128xf32>
    %672 = arith.addf %669, %671 : vector<2x128xf32>
    %673 = vector.extract_strided_slice %666 {offsets = [0, 0], sizes = [4, 64], strides = [1, 1]} : vector<4x512xf32> to vector<4x64xf32>
    %674 = vector.extract_strided_slice %666 {offsets = [0, 64], sizes = [4, 64], strides = [1, 1]} : vector<4x512xf32> to vector<4x64xf32>
    %675 = arith.maximumf %673, %674 : vector<4x64xf32>
    %676 = vector.extract_strided_slice %666 {offsets = [0, 128], sizes = [4, 64], strides = [1, 1]} : vector<4x512xf32> to vector<4x64xf32>
    %677 = arith.maximumf %675, %676 : vector<4x64xf32>
    %678 = vector.extract_strided_slice %666 {offsets = [0, 192], sizes = [4, 64], strides = [1, 1]} : vector<4x512xf32> to vector<4x64xf32>
    %679 = arith.maximumf %677, %678 : vector<4x64xf32>
    %cst_127 = arith.constant 0.000000e+00 : f32
    %680 = vector.broadcast %cst_127 : f32 to vector<1x128xf32>
    %681 = vector.extract_strided_slice %679 {offsets = [0, 0], sizes = [1, 64], strides = [1, 1]} : vector<4x64xf32> to vector<1x64xf32>
    %682 = arith.truncf %681 : vector<1x64xf32> to vector<1x64xbf16>
    %c0_128 = arith.constant 0 : index
    %c0_129 = arith.constant 0 : index
    %683 = vector.load %arg12[%c0_128, %c0_129] : memref<256x128xbf16, #tpu.memory_space<vmem>>, vector<64x128xbf16>
    %cst_130 = arith.constant dense<0.000000e+00> : vector<1x128xf32>
    %684 = tpu.matmul %682, %683, %cst_130 {dimension_numbers = #tpu.dot_dimension_numbers<[1], [0], [0], [1], [0, 0, 1, 1], [], []>} : vector<1x64xbf16>, vector<64x128xbf16>, vector<1x128xf32> -> vector<1x128xf32>
    %685 = arith.addf %680, %684 : vector<1x128xf32>
    %686 = vector.extract_strided_slice %679 {offsets = [1, 0], sizes = [1, 64], strides = [1, 1]} : vector<4x64xf32> to vector<1x64xf32>
    %687 = arith.truncf %686 : vector<1x64xf32> to vector<1x64xbf16>
    %c64 = arith.constant 64 : index
    %c0_131 = arith.constant 0 : index
    %688 = vector.load %arg12[%c64, %c0_131] : memref<256x128xbf16, #tpu.memory_space<vmem>>, vector<64x128xbf16>
    %cst_132 = arith.constant dense<0.000000e+00> : vector<1x128xf32>
    %689 = tpu.matmul %687, %688, %cst_132 {dimension_numbers = #tpu.dot_dimension_numbers<[1], [0], [0], [1], [0, 0, 1, 1], [], []>} : vector<1x64xbf16>, vector<64x128xbf16>, vector<1x128xf32> -> vector<1x128xf32>
    %690 = arith.addf %685, %689 : vector<1x128xf32>
    %691 = vector.extract_strided_slice %679 {offsets = [2, 0], sizes = [1, 64], strides = [1, 1]} : vector<4x64xf32> to vector<1x64xf32>
    %692 = arith.truncf %691 : vector<1x64xf32> to vector<1x64xbf16>
    %c128 = arith.constant 128 : index
    %c0_133 = arith.constant 0 : index
    %693 = vector.load %arg12[%c128, %c0_133] : memref<256x128xbf16, #tpu.memory_space<vmem>>, vector<64x128xbf16>
    %cst_134 = arith.constant dense<0.000000e+00> : vector<1x128xf32>
    %694 = tpu.matmul %692, %693, %cst_134 {dimension_numbers = #tpu.dot_dimension_numbers<[1], [0], [0], [1], [0, 0, 1, 1], [], []>} : vector<1x64xbf16>, vector<64x128xbf16>, vector<1x128xf32> -> vector<1x128xf32>
    %695 = arith.addf %690, %694 : vector<1x128xf32>
    %696 = vector.extract_strided_slice %679 {offsets = [3, 0], sizes = [1, 64], strides = [1, 1]} : vector<4x64xf32> to vector<1x64xf32>
    %697 = arith.truncf %696 : vector<1x64xf32> to vector<1x64xbf16>
    %c192 = arith.constant 192 : index
    %c0_135 = arith.constant 0 : index
    %698 = vector.load %arg12[%c192, %c0_135] : memref<256x128xbf16, #tpu.memory_space<vmem>>, vector<64x128xbf16>
    %cst_136 = arith.constant dense<0.000000e+00> : vector<1x128xf32>
    %699 = tpu.matmul %697, %698, %cst_136 {dimension_numbers = #tpu.dot_dimension_numbers<[1], [0], [0], [1], [0, 0, 1, 1], [], []>} : vector<1x64xbf16>, vector<64x128xbf16>, vector<1x128xf32> -> vector<1x128xf32>
    %700 = arith.addf %695, %699 : vector<1x128xf32>
    %701 = vector.extract_strided_slice %666 {offsets = [0, 256], sizes = [4, 64], strides = [1, 1]} : vector<4x512xf32> to vector<4x64xf32>
    %702 = vector.extract_strided_slice %666 {offsets = [0, 320], sizes = [4, 64], strides = [1, 1]} : vector<4x512xf32> to vector<4x64xf32>
    %703 = arith.maximumf %701, %702 : vector<4x64xf32>
    %704 = vector.extract_strided_slice %666 {offsets = [0, 384], sizes = [4, 64], strides = [1, 1]} : vector<4x512xf32> to vector<4x64xf32>
    %705 = arith.maximumf %703, %704 : vector<4x64xf32>
    %706 = vector.extract_strided_slice %666 {offsets = [0, 448], sizes = [4, 64], strides = [1, 1]} : vector<4x512xf32> to vector<4x64xf32>
    %707 = arith.maximumf %705, %706 : vector<4x64xf32>
    %cst_137 = arith.constant 0.000000e+00 : f32
    %708 = vector.broadcast %cst_137 : f32 to vector<1x128xf32>
    %709 = vector.extract_strided_slice %707 {offsets = [0, 0], sizes = [1, 64], strides = [1, 1]} : vector<4x64xf32> to vector<1x64xf32>
    %710 = arith.truncf %709 : vector<1x64xf32> to vector<1x64xbf16>
    %c0_138 = arith.constant 0 : index
    %c0_139 = arith.constant 0 : index
    %711 = vector.load %arg12[%c0_138, %c0_139] : memref<256x128xbf16, #tpu.memory_space<vmem>>, vector<64x128xbf16>
    %cst_140 = arith.constant dense<0.000000e+00> : vector<1x128xf32>
    %712 = tpu.matmul %710, %711, %cst_140 {dimension_numbers = #tpu.dot_dimension_numbers<[1], [0], [0], [1], [0, 0, 1, 1], [], []>} : vector<1x64xbf16>, vector<64x128xbf16>, vector<1x128xf32> -> vector<1x128xf32>
    %713 = arith.addf %708, %712 : vector<1x128xf32>
    %714 = vector.extract_strided_slice %707 {offsets = [1, 0], sizes = [1, 64], strides = [1, 1]} : vector<4x64xf32> to vector<1x64xf32>
    %715 = arith.truncf %714 : vector<1x64xf32> to vector<1x64xbf16>
    %c64_141 = arith.constant 64 : index
    %c0_142 = arith.constant 0 : index
    %716 = vector.load %arg12[%c64_141, %c0_142] : memref<256x128xbf16, #tpu.memory_space<vmem>>, vector<64x128xbf16>
    %cst_143 = arith.constant dense<0.000000e+00> : vector<1x128xf32>
    %717 = tpu.matmul %715, %716, %cst_143 {dimension_numbers = #tpu.dot_dimension_numbers<[1], [0], [0], [1], [0, 0, 1, 1], [], []>} : vector<1x64xbf16>, vector<64x128xbf16>, vector<1x128xf32> -> vector<1x128xf32>
    %718 = arith.addf %713, %717 : vector<1x128xf32>
    %719 = vector.extract_strided_slice %707 {offsets = [2, 0], sizes = [1, 64], strides = [1, 1]} : vector<4x64xf32> to vector<1x64xf32>
    %720 = arith.truncf %719 : vector<1x64xf32> to vector<1x64xbf16>
    %c128_144 = arith.constant 128 : index
    %c0_145 = arith.constant 0 : index
    %721 = vector.load %arg12[%c128_144, %c0_145] : memref<256x128xbf16, #tpu.memory_space<vmem>>, vector<64x128xbf16>
    %cst_146 = arith.constant dense<0.000000e+00> : vector<1x128xf32>
    %722 = tpu.matmul %720, %721, %cst_146 {dimension_numbers = #tpu.dot_dimension_numbers<[1], [0], [0], [1], [0, 0, 1, 1], [], []>} : vector<1x64xbf16>, vector<64x128xbf16>, vector<1x128xf32> -> vector<1x128xf32>
    %723 = arith.addf %718, %722 : vector<1x128xf32>
    %724 = vector.extract_strided_slice %707 {offsets = [3, 0], sizes = [1, 64], strides = [1, 1]} : vector<4x64xf32> to vector<1x64xf32>
    %725 = arith.truncf %724 : vector<1x64xf32> to vector<1x64xbf16>
    %c192_147 = arith.constant 192 : index
    %c0_148 = arith.constant 0 : index
    %726 = vector.load %arg12[%c192_147, %c0_148] : memref<256x128xbf16, #tpu.memory_space<vmem>>, vector<64x128xbf16>
    %cst_149 = arith.constant dense<0.000000e+00> : vector<1x128xf32>
    %727 = tpu.matmul %725, %726, %cst_149 {dimension_numbers = #tpu.dot_dimension_numbers<[1], [0], [0], [1], [0, 0, 1, 1], [], []>} : vector<1x64xbf16>, vector<64x128xbf16>, vector<1x128xf32> -> vector<1x128xf32>
    %728 = arith.addf %723, %727 : vector<1x128xf32>
    %729 = tpu.concatenate %700, %728 in 0 : vector<1x128xf32>, vector<1x128xf32> -> vector<2x128xf32>
    %730 = arith.addf %672, %729 : vector<2x128xf32>
    %cst_150 = arith.constant 0.000000e+00 : f32
    %731 = vector.broadcast %cst_150 : f32 to vector<2x128xf32>
    %732 = arith.maximumf %730, %731 : vector<2x128xf32>
    %733 = arith.truncf %732 : vector<2x128xf32> to vector<2x128xbf16>
    %c0_151 = arith.constant 0 : index
    %c0_152 = arith.constant 0 : index
    %734 = vector.load %arg14[%c0_151, %c0_152] : memref<128x128xbf16, #tpu.memory_space<vmem>>, vector<128x128xbf16>
    %cst_153 = arith.constant dense<0.000000e+00> : vector<2x128xf32>
    %735 = tpu.matmul %733, %734, %cst_153 {dimension_numbers = #tpu.dot_dimension_numbers<[1], [0], [0], [1], [0, 0, 1, 1], [], []>} : vector<2x128xbf16>, vector<128x128xbf16>, vector<2x128xf32> -> vector<2x128xf32>
    %c0_154 = arith.constant 0 : index
    %c0_155 = arith.constant 0 : index
    %736 = vector.load %arg15[%c0_154, %c0_155] : memref<1x128xf32, #tpu.memory_space<vmem>>, vector<1x128xf32>
    %737 = vector.broadcast %736 : vector<1x128xf32> to vector<2x128xf32>
    %738 = arith.addf %735, %737 : vector<2x128xf32>
    %c0_156 = arith.constant 0 : index
    %c0_157 = arith.constant 0 : index
    %739 = vector.load %arg16[%c0_156, %c0_157] : memref<2x128xf32, #tpu.memory_space<vmem>>, vector<2x128xf32>
    tpu.vector_store %arg16[%c0_156, %c0_157], %738 {strides = array<i32>} : memref<2x128xf32, #tpu.memory_space<vmem>>, vector<2x128xf32>,
    return
  }
  func.func @transform_0(%arg0: i32) -> (i32, i32) {
    %c0_i32 = arith.constant 0 : i32
    %c0_i32_0 = arith.constant 0 : i32
    %c0_i32_1 = arith.constant 0 : i32
    return %c0_i32, %c0_i32_0 : i32, i32
  }
  func.func @transform_1(%arg0: i32) -> (i32, i32) {
    %c0_i32 = arith.constant 0 : i32
    %c0_i32_0 = arith.constant 0 : i32
    %c0_i32_1 = arith.constant 0 : i32
    return %c0_i32, %c0_i32_0 : i32, i32
  }
  func.func @transform_2(%arg0: i32) -> (i32, i32) {
    %c0_i32 = arith.constant 0 : i32
    %c0_i32_0 = arith.constant 0 : i32
    %c0_i32_1 = arith.constant 0 : i32
    return %c0_i32, %c0_i32_0 : i32, i32
  }
  func.func @transform_3(%arg0: i32) -> (i32, i32) {
    %c0_i32 = arith.constant 0 : i32
    %c0_i32_0 = arith.constant 0 : i32
    %c0_i32_1 = arith.constant 0 : i32
    return %c0_i32, %c0_i32_0 : i32, i32
  }
  func.func @transform_4(%arg0: i32) -> (i32, i32) {
    %c0_i32 = arith.constant 0 : i32
    %c0_i32_0 = arith.constant 0 : i32
    %c0_i32_1 = arith.constant 0 : i32
    return %c0_i32, %c0_i32_0 : i32, i32
  }
  func.func @transform_5(%arg0: i32) -> (i32, i32) {
    %c0_i32 = arith.constant 0 : i32
    %c0_i32_0 = arith.constant 0 : i32
    %c0_i32_1 = arith.constant 0 : i32
    return %c0_i32, %c0_i32_0 : i32, i32
  }
  func.func @transform_6(%arg0: i32) -> (i32, i32) {
    %c0_i32 = arith.constant 0 : i32
    %c0_i32_0 = arith.constant 0 : i32
    %c0_i32_1 = arith.constant 0 : i32
    return %c0_i32, %c0_i32_0 : i32, i32
  }
  func.func @transform_7(%arg0: i32) -> (i32, i32) {
    %c0_i32 = arith.constant 0 : i32
    %c0_i32_0 = arith.constant 0 : i32
    %c0_i32_1 = arith.constant 0 : i32
    return %c0_i32, %c0_i32_0 : i32, i32
  }
  func.func @transform_8(%arg0: i32) -> (i32, i32) {
    %c0_i32 = arith.constant 0 : i32
    %c0_i32_0 = arith.constant 0 : i32
    %c0_i32_1 = arith.constant 0 : i32
    return %c0_i32, %c0_i32_0 : i32, i32
  }
  func.func @transform_9(%arg0: i32) -> (i32, i32) {
    %c0_i32 = arith.constant 0 : i32
    %c0_i32_0 = arith.constant 0 : i32
    %c0_i32_1 = arith.constant 0 : i32
    return %c0_i32, %c0_i32_0 : i32, i32
  }
  func.func @transform_10(%arg0: i32) -> (i32, i32) {
    %c0_i32 = arith.constant 0 : i32
    %c0_i32_0 = arith.constant 0 : i32
    %c0_i32_1 = arith.constant 0 : i32
    return %c0_i32, %c0_i32_0 : i32, i32
  }
  func.func @transform_11(%arg0: i32) -> (i32, i32) {
    %c0_i32 = arith.constant 0 : i32
    %c0_i32_0 = arith.constant 0 : i32
    %c0_i32_1 = arith.constant 0 : i32
    return %c0_i32, %c0_i32_0 : i32, i32
  }
  func.func @transform_12(%arg0: i32) -> (i32, i32) {
    %c0_i32 = arith.constant 0 : i32
    %c0_i32_0 = arith.constant 0 : i32
    %c0_i32_1 = arith.constant 0 : i32
    return %c0_i32, %c0_i32_0 : i32, i32
  }
  func.func @transform_13(%arg0: i32) -> (i32, i32) {
    %c0_i32 = arith.constant 0 : i32
    %c0_i32_0 = arith.constant 0 : i32
    %c0_i32_1 = arith.constant 0 : i32
    return %c0_i32, %c0_i32_0 : i32, i32
  }
  func.func @transform_14(%arg0: i32) -> (i32, i32) {
    %c0_i32 = arith.constant 0 : i32
    %c0_i32_0 = arith.constant 0 : i32
    %c0_i32_1 = arith.constant 0 : i32
    return %c0_i32, %c0_i32_0 : i32, i32
  }
  func.func @transform_15(%arg0: i32) -> (i32, i32) {
    %c0_i32 = arith.constant 0 : i32
    %c0_i32_0 = arith.constant 0 : i32
    %c0_i32_1 = arith.constant 0 : i32
    return %c0_i32, %c0_i32_0 : i32, i32
  }
}

</mosaic_0001>

<bundles_post_ra>
// kernel: _lambda_.1
= control target key start
LH: loop header
LB: loop body
LE: loop exit
PB: predicated region body
PF: predicated region fallthrough
CT: control target
= control target key end

     0   :  { %v4555_v1 = vmov 0.0   ;;  %vm85_vm0 = vcmask 130048   ;;  %vm4556_vm1 = vmmov 0   ;;  %v4557_v6 = vmov 0   ;;  %s5360_s0 = inlined_call_operand.vmem [shape: bf16[32,16], index: 0, kind: input, shape index: {}]   ;;  %s5361_s1 = inlined_call_operand.vmem [shape: bf16[16,128], index: 1, kind: input, shape index: {}]   ;;  %s5362_s2 = inlined_call_operand.vmem [shape: bf16[32,128], index: 2, kind: input, shape index: {}]   ;;  %s5363_s3 = inlined_call_operand.vmem [shape: f32[1,128], index: 3, kind: input, shape index: {}]   ;;  %s5364_s4 = inlined_call_operand.vmem [shape: bf16[32,128], index: 4, kind: input, shape index: {}]   ;;  %s5365_s5 = inlined_call_operand.vmem [shape: bf16[32,128], index: 5, kind: input, shape index: {}]   ;;  %s5366_s6 = inlined_call_operand.vmem [shape: f32[1,128], index: 6, kind: input, shape index: {}]   ;;  %s5367_s7 = inlined_call_operand.vmem [shape: bf16[9,512], index: 7, kind: input, shape index: {}]   ;;  %s5368_s8 = inlined_call_operand.vmem [shape: bf16[4,9], index: 8, kind: input, shape index: {}]   ;;  %s5369_s9 = inlined_call_operand.vmem [shape: f32[4,1], index: 9, kind: input, shape index: {}]   ;;  %s5370_s10 = inlined_call_operand.vmem [shape: bf16[32,128], index: 10, kind: input, shape index: {}]   ;;  %s5371_s11 = inlined_call_operand.vmem [shape: bf16[256,128], index: 11, kind: input, shape index: {}]   ;;  %s5372_s12 = inlined_call_operand.vmem [shape: f32[1,128], index: 12, kind: input, shape index: {}]   ;;  %s5373_s13 = inlined_call_operand.vmem [shape: bf16[128,128], index: 13, kind: input, shape index: {}]   ;;  %s5374_s14 = inlined_call_operand.vmem [shape: f32[1,128], index: 14, kind: input, shape index: {}]   ;;  %s5375_s15 = inlined_call_operand.hbm [shape: f32[2,128], index: 15, kind: output, shape index: {}]  }
   0x1   :  { %v4230_v0 = vld [vmem:[%s5361_s1] sm:$0xff]   ;;  %3813 = vmatprep.subr.bf16.mxu1 %v4555_v1  ;;  %v4233_v4 = vld [vmem:[%s5360_s0 + $0x8] sm:$0xff]   ;;  %3817 = vmatprep.mubr.msk.bf16.mxu1 %vm4556_vm1, %v4555_v1 }
   0x2   :  { %v4649_v2 = vld [vmem:[%s5362_s2] sm:$0xff]   ;;  %3807 = vmatprep.subr.bf16.mxu0 %v4230_v0  ;;  %v4662_v5 = vld [vmem:[%s5362_s2 + $0x8] sm:$0xff]   ;;  %4229 = vset.pattern.permute.xlu0 %v4557_v6 }
   0x3   :  { %v4232_v3 = vld [vmem:[%s5360_s0] sm:$0xff]   ;;  %3814 = vmatpush3.bf16.msra.mxu1 %v4649_v2  ;;  %3808 = vmatpush3.bf16.msra.mxu0 %v4230_v0 }
   0x4   :  { %3809 = vmatprep.mubr.msk.bf16.mxu0 %vm85_vm0, %v4232_v3  ;;  %3815 = vmatprep.subr.bf16.mxu1 %v4555_v1 }
   0x5   :  { %3821 = vmatprep.subr.bf16.mxu0 %v4555_v1 }
   0x6   :  { %3810 = vmatmul.mubr.msk.bf16.vlgmr.msra.gmra.mrb[0].mxu0 %vm85_vm0, %v4233_v4 }
   0x7   :  { %3816 = vmatpush3.bf16.msra.mxu1 %v4662_v5  ;;  %3822 = vmatpush3.bf16.msra.mxu0 %v4649_v2 }
   0x8   :  { %3823 = vmatprep.subr.bf16.mxu0 %v4555_v1  ;;  %3825 = vmatprep.mubr.msk.bf16.mxu0 %vm4556_vm1, %v4555_v1 }
   0x9   :  { %3829 = vmatprep.subr.bf16.mxu1 %v4555_v1 }
   0xa   :  { %3818 = vmatmul.mubr.bf16.vlgmr.msra.gmra.mrb[0].mxu1 %v4557_v6 }
   0xb   :  { %3824 = vmatpush3.bf16.msra.mxu0 %v4662_v5  ;;  %3830 = vmatpush3.bf16.msra.mxu1 %v4649_v2 }
   0xc   :  { %3831 = vmatprep.subr.bf16.mxu1 %v4555_v1  ;;  %3833 = vmatprep.mubr.msk.bf16.mxu1 %vm4556_vm1, %v4555_v1 }
   0xd   :  { %3837 = vmatprep.subr.bf16.mxu0 %v4555_v1 }
   0xf   :  { %3832 = vmatpush3.bf16.msra.mxu1 %v4662_v5 }
  0x10   :  { %3845 = vmatprep.subr.bf16.mxu1 %v4555_v1 }
  0x11   :  { %20 = vsyncpa [#allocation3], 0  ;;  %v3564_v7 = vld [vmem:[%s5363_s3] ss:$0 sm:$0xff]  ;;  %s4558_s3 = smov 64   ;;  %s4559_s28 = smov 32  }
  0x12   :  { %vm153_vm2 = vcmask 261120   ;;  %vm1378_vm3 = vcmask 1041408   ;;  %vm1380_vm4 = vcmask 1043456   ;;  %vm1382_vm5 = vcmask 1045504  }
  0x13   :  { %vm2747_vm6 = vcmask 1044480   ;;  %vm2743_vm7 = vcmask 72704   ;;  %vm2974_vm8 = vcmask 523264   ;;  %vm3433_vm9 = vcmask 1040384  }
  0xd9   :  { %v3811_v8 = vpop.f32.mrb[0].mxu0 }
  0xda   :  { %v4686_v9 = vadd.f32 %v3811_v8, %v3564_v7  ;;  %v126_v10 = vpop.f32.mrb[1].mxu0 }
  0xdb   :  { %v4688_v11 = vadd.f32 %v3564_v7, %v126_v10  ;;  %v3812_v12 = vpop.f32.mrb[2].mxu0 }
  0xdc   :  { %v4690_v13 = vadd.f32 %v3812_v12, %v3564_v7  ;;  %v129_v14 = vpop.f32.mrb[3].mxu0 }
  0xdd   :  { %v4692_v15 = vadd.f32 %v3564_v7, %v129_v14  ;;  %v191_v16 = vpop.f32.mrb[0].mxu1 }
  0xde   :  { %v197_v17 = vadd.f32 %v191_v16, %v4688_v11  ;;  %v3819_v18 = vpop.f32.mrb[1].mxu1 }
  0xdf   :  { %v194_v19 = vpop.f32.mrb[2].mxu1 }
  0xe0   :  { %4271 = vtanh.f32 %v197_v17  ;;  %v3820_v20 = vpop.f32.mrb[3].mxu1  ;;  %v198_v22 = vsub.f32 0.0, %v197_v17 }
  0xe2   :  { %v199_v23 = vmul.f32 1.442695, %v198_v22 }
  0xe4   :  { %4273 = vpow2.f32 %v199_v23 }
  0xea   :  { %v4272_v21 = vpop.eup %4271 }
  0xeb   :  { %206 = vrot.lane.b32.xlu0 %v4272_v21, %s4558_s3 }
  0xee   :  { %v4274_v24 = vpop.eup %4273 }
  0xef   :  { %v201_v25 = vadd.f32 1.0, %v4274_v24 }
  0xf1   :  { %4275 = vrcp.f32 %v201_v25 }
  0xfb   :  { %v4276_v26 = vpop.eup %4275 }
  0xfc   :  { %v204_v29 = vmul.f32 0.0, %v4276_v26 }
 0x15d   :  { %v207_v27 = vpop.permute.xlu0 %206 }
 0x15e   :  { %v209_v28 = vmul.f32 %v4276_v26, %v207_v27 }
 0x160   :  { %211 = vrot.lane.b32.xlu0 %v209_v28, %s4559_s28 }
 0x1d2   :  { %v212_v30 = vpop.permute.xlu0 %211 }
 0x1d3   :  { %v214_v31 = vadd.f32 %v212_v30, %v204_v29 }
 0x1d5   :  { %4277 = vtanh.f32 %v214_v31  ;;  %v279_v51 = vrot.slane %v214_v31, 6 }
 0x1df   :  { %v4278_v32 = vpop.eup %4277 }
 0x1e0   :  { %217 = vrot.lane.b32.xlu1 %v4278_v32, %s4558_s3 }
 0x252   :  { %v218_v33 = vpop.permute.xlu1 %217 }
 0x253   :  { %v4698_v34 = vmul.f32 %v4276_v26, %v218_v33 }
 0x255   :  { %v221_v35 = vpack.c.bf16 %v4698_v34, %v4698_v34 }
 0x257   :  { %223 = vrot.lane.b32.xlu1 %v221_v35, %s4559_s28 }
 0x2c9   :  { %v224_v36 = vpop.permute.xlu1 %223 }
 0x2ca   :  { %3826 = vmatmul.mubr.msk.bf16.vlgmr.msra.gmra.mrb[4].mxu0 %vm153_vm2, %v224_v36 }
 0x2cb   :  { %3838 = vmatpush3.bf16.msra.mxu0 %v4649_v2  ;;  %3841 = vmatprep.mubr.msk.bf16.mxu0 %vm4556_vm1, %v4555_v1 }
 0x2cc   :  { %3839 = vmatprep.subr.bf16.mxu0 %v4555_v1 }
 0x2cf   :  { %3840 = vmatpush3.bf16.msra.mxu0 %v4662_v5 }
 0x2d0   :  { %3853 = vmatprep.subr.bf16.mxu0 %v4555_v1 }
 0x39d   :  { %v262_v37 = vpop.f32.mrb[4].mxu0 }
 0x39e   :  { %v269_v38 = vrot.slane %v262_v37, 6  ;;  %v3827_v39 = vpop.f32.mrb[5].mxu0 }
 0x39f   :  { %v265_v40 = vpop.f32.mrb[6].mxu0 }
 0x3a0   :  { %v271_v41 = vadd.f32 %v269_v38, %v4688_v11  ;;  %v3828_v42 = vpop.f32.mrb[7].mxu0 }
 0x3a2   :  { %4279 = vtanh.f32 %v271_v41  ;;  %v272_v44 = vsub.f32 0.0, %v271_v41 }
 0x3a4   :  { %v273_v45 = vmul.f32 1.442695, %v272_v44 }
 0x3a6   :  { %4281 = vpow2.f32 %v273_v45 }
 0x3ac   :  { %v4280_v43 = vpop.eup %4279 }
 0x3ad   :  { %283 = vrot.lane.b32.xlu0 %v4280_v43, %s4558_s3 }
 0x3b0   :  { %v4282_v46 = vpop.eup %4281 }
 0x3b1   :  { %v275_v47 = vadd.f32 1.0, %v4282_v46 }
 0x3b3   :  { %4283 = vrcp.f32 %v275_v47 }
 0x3bd   :  { %v4284_v48 = vpop.eup %4283 }
 0x3be   :  { %v281_v52 = vmul.f32 %v4284_v48, %v279_v51 }
 0x41f   :  { %v284_v49 = vpop.permute.xlu0 %283 }
 0x420   :  { %v286_v50 = vmul.f32 %v4284_v48, %v284_v49 }
 0x422   :  { %288 = vrot.lane.b32.xlu1 %v286_v50, %s4559_s28 }
 0x494   :  { %v289_v53 = vpop.permute.xlu1 %288 }
 0x495   :  { %v291_v54 = vadd.f32 %v289_v53, %v281_v52 }
 0x497   :  { %4285 = vtanh.f32 %v291_v54  ;;  %v357_v19 = vrot.slane %v291_v54, 6 }
 0x4a1   :  { %v4286_v55 = vpop.eup %4285 }
 0x4a2   :  { %294 = vrot.lane.b32.xlu0 %v4286_v55, %s4558_s3 }
 0x514   :  { %v295_v56 = vpop.permute.xlu0 %294 }
 0x515   :  { %v297_v57 = vmul.f32 %v4284_v48, %v295_v56 }
 0x517   :  { %v298_v58 = vpack.c.bf16 %v297_v57, %v297_v57  ;;  %v1379_v26 = vsel %vm1378_vm3, %v4698_v34, %v297_v57 }
 0x519   :  { %v300_v59 = vrot.slane %v298_v58, 1 }
 0x51b   :  { %301 = vrot.lane.b32.xlu1 %v300_v59, %s4559_s28 }
 0x58d   :  { %v302_v60 = vpop.permute.xlu1 %301 }
 0x58e   :  { %3834 = vmatmul.mubr.msk.bf16.vlgmr.msra.gmra.mrb[4].mxu1 %vm153_vm2, %v302_v60 }
 0x58f   :  { %3846 = vmatpush3.bf16.msra.mxu1 %v4649_v2  ;;  %3849 = vmatprep.mubr.msk.bf16.mxu1 %vm4556_vm1, %v4555_v1 }
 0x590   :  { %3847 = vmatprep.subr.bf16.mxu1 %v4555_v1 }
 0x593   :  { %3848 = vmatpush3.bf16.msra.mxu1 %v4662_v5 }
 0x594   :  { %3861 = vmatprep.subr.bf16.mxu1 %v4555_v1 }
 0x661   :  { %v340_v61 = vpop.f32.mrb[4].mxu1 }
 0x662   :  { %v347_v62 = vrot.slane %v340_v61, 4  ;;  %v3835_v63 = vpop.f32.mrb[5].mxu1 }
 0x663   :  { %v343_v0 = vpop.f32.mrb[6].mxu1 }
 0x664   :  { %v349_v3 = vadd.f32 %v347_v62, %v4688_v11  ;;  %v3836_v4 = vpop.f32.mrb[7].mxu1 }
 0x666   :  { %4287 = vtanh.f32 %v349_v3  ;;  %v350_v8 = vsub.f32 0.0, %v349_v3 }
 0x668   :  { %v351_v10 = vmul.f32 1.442695, %v350_v8 }
 0x66a   :  { %4289 = vpow2.f32 %v351_v10 }
 0x670   :  { %v4288_v7 = vpop.eup %4287 }
 0x671   :  { %361 = vrot.lane.b32.xlu0 %v4288_v7, %s4558_s3 }
 0x674   :  { %v4290_v12 = vpop.eup %4289 }
 0x675   :  { %v353_v14 = vadd.f32 1.0, %v4290_v12 }
 0x677   :  { %4291 = vrcp.f32 %v353_v14 }
 0x681   :  { %v4292_v16 = vpop.eup %4291 }
 0x682   :  { %v359_v20 = vmul.f32 %v4292_v16, %v357_v19 }
 0x6e3   :  { %v362_v17 = vpop.permute.xlu0 %361 }
 0x6e4   :  { %v364_v18 = vmul.f32 %v4292_v16, %v362_v17 }
 0x6e6   :  { %366 = vrot.lane.b32.xlu1 %v364_v18, %s4559_s28 }
 0x758   :  { %v367_v21 = vpop.permute.xlu1 %366 }
 0x759   :  { %v369_v22 = vadd.f32 %v367_v21, %v359_v20 }
 0x75b   :  { %4293 = vtanh.f32 %v369_v22  ;;  %v435_v45 = vrot.slane %v369_v22, 6 }
 0x765   :  { %v4294_v23 = vpop.eup %4293 }
 0x766   :  { %372 = vrot.lane.b32.xlu0 %v4294_v23, %s4558_s3 }
 0x7d8   :  { %v373_v24 = vpop.permute.xlu0 %372 }
 0x7d9   :  { %v375_v25 = vmul.f32 %v4292_v16, %v373_v24 }
 0x7db   :  { %v376_v27 = vpack.c.bf16 %v375_v25, %v375_v25  ;;  %v1381_v28 = vsel %vm1380_vm4, %v1379_v26, %v375_v25 }
 0x7dd   :  { %v378_v29 = vrot.slane %v376_v27, 2 }
 0x7df   :  { %379 = vrot.lane.b32.xlu1 %v378_v29, %s4559_s28 }
 0x851   :  { %v380_v30 = vpop.permute.xlu1 %379 }
 0x852   :  { %3842 = vmatmul.mubr.msk.bf16.vlgmr.msra.gmra.mrb[8].mxu0 %vm153_vm2, %v380_v30 }
 0x853   :  { %3854 = vmatpush3.bf16.msra.mxu0 %v4649_v2  ;;  %3857 = vmatprep.mubr.msk.bf16.mxu0 %vm4556_vm1, %v4555_v1 }
 0x854   :  { %3855 = vmatprep.subr.bf16.mxu0 %v4555_v1 }
 0x857   :  { %3856 = vmatpush3.bf16.msra.mxu0 %v4662_v5 }
 0x858   :  { %3869 = vmatprep.subr.bf16.mxu0 %v4555_v1 }
 0x925   :  { %v418_v31 = vpop.f32.mrb[8].mxu0 }
 0x926   :  { %v425_v32 = vrot.slane %v418_v31, 2  ;;  %v3843_v33 = vpop.f32.mrb[9].mxu0 }
 0x927   :  { %v421_v34 = vpop.f32.mrb[10].mxu0 }
 0x928   :  { %v427_v35 = vadd.f32 %v425_v32, %v4688_v11  ;;  %v3844_v36 = vpop.f32.mrb[11].mxu0 }
 0x92a   :  { %4295 = vtanh.f32 %v427_v35  ;;  %v428_v38 = vsub.f32 0.0, %v427_v35 }
 0x92c   :  { %v429_v39 = vmul.f32 1.442695, %v428_v38 }
 0x92e   :  { %4297 = vpow2.f32 %v429_v39 }
 0x934   :  { %v4296_v37 = vpop.eup %4295 }
 0x935   :  { %439 = vrot.lane.b32.xlu0 %v4296_v37, %s4558_s3 }
 0x938   :  { %v4298_v40 = vpop.eup %4297 }
 0x939   :  { %v431_v41 = vadd.f32 1.0, %v4298_v40 }
 0x93b   :  { %4299 = vrcp.f32 %v431_v41 }
 0x945   :  { %v4300_v42 = vpop.eup %4299 }
 0x946   :  { %v437_v46 = vmul.f32 %v4300_v42, %v435_v45 }
 0x9a7   :  { %v440_v43 = vpop.permute.xlu0 %439 }
 0x9a8   :  { %v442_v44 = vmul.f32 %v4300_v42, %v440_v43 }
 0x9aa   :  { %444 = vrot.lane.b32.xlu1 %v442_v44, %s4559_s28 }
 0xa1c   :  { %v445_v47 = vpop.permute.xlu1 %444 }
 0xa1d   :  { %v447_v11 = vadd.f32 %v445_v47, %v437_v46 }
 0xa1f   :  { %4301 = vtanh.f32 %v447_v11  ;;  %v510_v8 = vrot.slane %v447_v11, 6 }
 0xa29   :  { %v4302_v48 = vpop.eup %4301 }
 0xa2a   :  { %450 = vrot.lane.b32.xlu0 %v4302_v48, %s4558_s3 }
 0xa9c   :  { %v451_v49 = vpop.permute.xlu0 %450 }
 0xa9d   :  { %v453_v50 = vmul.f32 %v4300_v42, %v451_v49 }
 0xa9f   :  { %v454_v51 = vpack.c.bf16 %v453_v50, %v453_v50  ;;  %v4742_v52 = vsel %vm1382_vm5, %v1381_v28, %v453_v50 }
 0xaa1   :  { %v456_v53 = vrot.slane %v454_v51, 3 }
 0xaa3   :  { %457 = vrot.lane.b32.xlu1 %v456_v53, %s4559_s28 }
 0xb15   :  { %v458_v54 = vpop.permute.xlu1 %457 }
 0xb16   :  { %3850 = vmatmul.mubr.msk.bf16.vlgmr.msra.gmra.mrb[8].mxu1 %vm153_vm2, %v458_v54 }
 0xb17   :  { %3862 = vmatpush3.bf16.msra.mxu1 %v4649_v2  ;;  %3865 = vmatprep.mubr.msk.bf16.mxu1 %vm4556_vm1, %v4555_v1 }
 0xb18   :  { %3863 = vmatprep.subr.bf16.mxu1 %v4555_v1 }
 0xb1b   :  { %3864 = vmatpush3.bf16.msra.mxu1 %v4662_v5 }
 0xb1c   :  { %3877 = vmatprep.subr.bf16.mxu1 %v4555_v1 }
 0xbe9   :  { %v496_v55 = vpop.f32.mrb[8].mxu1 }
 0xbea   :  { %v502_v56 = vadd.f32 %v496_v55, %v4692_v15  ;;  %v3851_v57 = vpop.f32.mrb[9].mxu1 }
 0xbeb   :  { %v499_v58 = vpop.f32.mrb[10].mxu1 }
 0xbec   :  { %4303 = vtanh.f32 %v502_v56  ;;  %v3852_v59 = vpop.f32.mrb[11].mxu1  ;;  %v503_v61 = vsub.f32 0.0, %v502_v56 }
 0xbee   :  { %v504_v62 = vmul.f32 1.442695, %v503_v61 }
 0xbf0   :  { %4305 = vpow2.f32 %v504_v62 }
 0xbf6   :  { %v4304_v60 = vpop.eup %4303 }
 0xbf7   :  { %514 = vrot.lane.b32.xlu0 %v4304_v60, %s4558_s3 }
 0xbfa   :  { %v4306_v63 = vpop.eup %4305 }
 0xbfb   :  { %v506_v0 = vadd.f32 1.0, %v4306_v63 }
 0xbfd   :  { %4307 = vrcp.f32 %v506_v0 }
 0xc07   :  { %v4308_v3 = vpop.eup %4307 }
 0xc08   :  { %v512_v10 = vmul.f32 %v4308_v3, %v510_v8 }
 0xc69   :  { %v515_v4 = vpop.permute.xlu0 %514 }
 0xc6a   :  { %v517_v7 = vmul.f32 %v4308_v3, %v515_v4 }
 0xc6c   :  { %519 = vrot.lane.b32.xlu1 %v517_v7, %s4559_s28 }
 0xcde   :  { %v520_v12 = vpop.permute.xlu1 %519 }
 0xcdf   :  { %v522_v14 = vadd.f32 %v520_v12, %v512_v10 }
 0xce1   :  { %4309 = vtanh.f32 %v522_v14  ;;  %v587_v35 = vrot.slane %v522_v14, 6 }
 0xceb   :  { %v4310_v16 = vpop.eup %4309 }
 0xcec   :  { %525 = vrot.lane.b32.xlu0 %v4310_v16, %s4558_s3 }
 0xd5e   :  { %v526_v17 = vpop.permute.xlu0 %525 }
 0xd5f   :  { %v4756_v18 = vmul.f32 %v4308_v3, %v526_v17 }
 0xd61   :  { %v529_v19 = vpack.c.bf16 %v4756_v18, %v4756_v18 }
 0xd63   :  { %531 = vrot.lane.b32.xlu1 %v529_v19, %s4559_s28 }
 0xdd5   :  { %v532_v20 = vpop.permute.xlu1 %531 }
 0xdd6   :  { %3858 = vmatmul.mubr.msk.bf16.vlgmr.msra.gmra.mrb[12].mxu0 %vm153_vm2, %v532_v20 }
 0xdd7   :  { %3870 = vmatpush3.bf16.msra.mxu0 %v4649_v2  ;;  %3873 = vmatprep.mubr.msk.bf16.mxu0 %vm4556_vm1, %v4555_v1 }
 0xdd8   :  { %3871 = vmatprep.subr.bf16.mxu0 %v4555_v1 }
 0xddb   :  { %3872 = vmatpush3.bf16.msra.mxu0 %v4662_v5 }
 0xddc   :  { %3885 = vmatprep.subr.bf16.mxu0 %v4555_v1 }
 0xea9   :  { %v570_v21 = vpop.f32.mrb[12].mxu0 }
 0xeaa   :  { %v577_v22 = vrot.slane %v570_v21, 6  ;;  %v3859_v23 = vpop.f32.mrb[13].mxu0 }
 0xeab   :  { %v573_v24 = vpop.f32.mrb[14].mxu0 }
 0xeac   :  { %v579_v25 = vadd.f32 %v577_v22, %v4692_v15  ;;  %v3860_v26 = vpop.f32.mrb[15].mxu0 }
 0xeae   :  { %4311 = vtanh.f32 %v579_v25  ;;  %v580_v28 = vsub.f32 0.0, %v579_v25 }
 0xeb0   :  { %v581_v29 = vmul.f32 1.442695, %v580_v28 }
 0xeb2   :  { %4313 = vpow2.f32 %v581_v29 }
 0xeb8   :  { %v4312_v27 = vpop.eup %4311 }
 0xeb9   :  { %591 = vrot.lane.b32.xlu0 %v4312_v27, %s4558_s3 }
 0xebc   :  { %v4314_v30 = vpop.eup %4313 }
 0xebd   :  { %v583_v31 = vadd.f32 1.0, %v4314_v30 }
 0xebf   :  { %4315 = vrcp.f32 %v583_v31 }
 0xec9   :  { %v4316_v32 = vpop.eup %4315 }
 0xeca   :  { %v589_v36 = vmul.f32 %v4316_v32, %v587_v35 }
 0xf2b   :  { %v592_v33 = vpop.permute.xlu0 %591 }
 0xf2c   :  { %v594_v34 = vmul.f32 %v4316_v32, %v592_v33 }
 0xf2e   :  { %596 = vrot.lane.b32.xlu1 %v594_v34, %s4559_s28 }
 0xfa0   :  { %v597_v37 = vpop.permute.xlu1 %596 }
 0xfa1   :  { %v599_v38 = vadd.f32 %v597_v37, %v589_v36 }
 0xfa3   :  { %4317 = vtanh.f32 %v599_v38  ;;  %v665_v59 = vrot.slane %v599_v38, 6 }
 0xfad   :  { %v4318_v39 = vpop.eup %4317 }
 0xfae   :  { %602 = vrot.lane.b32.xlu0 %v4318_v39, %s4558_s3 }
0x1020   :  { %v603_v40 = vpop.permute.xlu0 %602 }
0x1021   :  { %v605_v41 = vmul.f32 %v4316_v32, %v603_v40 }
0x1023   :  { %v606_v42 = vpack.c.bf16 %v605_v41, %v605_v41  ;;  %v1384_v4 = vsel %vm1378_vm3, %v4756_v18, %v605_v41 }
0x1025   :  { %v608_v43 = vrot.slane %v606_v42, 1 }
0x1027   :  { %609 = vrot.lane.b32.xlu1 %v608_v43, %s4559_s28 }
0x1099   :  { %v610_v44 = vpop.permute.xlu1 %609 }
0x109a   :  { %3866 = vmatmul.mubr.msk.bf16.vlgmr.msra.gmra.mrb[12].mxu1 %vm153_vm2, %v610_v44 }
0x109b   :  { %3878 = vmatpush3.bf16.msra.mxu1 %v4649_v2  ;;  %3881 = vmatprep.mubr.msk.bf16.mxu1 %vm4556_vm1, %v4555_v1 }
0x109c   :  { %3879 = vmatprep.subr.bf16.mxu1 %v4555_v1 }
0x109f   :  { %3880 = vmatpush3.bf16.msra.mxu1 %v4662_v5 }
0x10a0   :  { %3893 = vmatprep.subr.bf16.mxu1 %v4555_v1 }
0x116d   :  { %v648_v45 = vpop.f32.mrb[12].mxu1 }
0x116e   :  { %v655_v46 = vrot.slane %v648_v45, 4  ;;  %v3867_v47 = vpop.f32.mrb[13].mxu1 }
0x116f   :  { %v651_v11 = vpop.f32.mrb[14].mxu1 }
0x1170   :  { %v657_v48 = vadd.f32 %v655_v46, %v4692_v15  ;;  %v3868_v49 = vpop.f32.mrb[15].mxu1 }
0x1172   :  { %4319 = vtanh.f32 %v657_v48  ;;  %v658_v51 = vsub.f32 0.0, %v657_v48 }
0x1174   :  { %v659_v53 = vmul.f32 1.442695, %v658_v51 }
0x1176   :  { %4321 = vpow2.f32 %v659_v53 }
0x117c   :  { %v4320_v50 = vpop.eup %4319 }
0x117d   :  { %669 = vrot.lane.b32.xlu0 %v4320_v50, %s4558_s3 }
0x1180   :  { %v4322_v54 = vpop.eup %4321 }
0x1181   :  { %v661_v55 = vadd.f32 1.0, %v4322_v54 }
0x1183   :  { %4323 = vrcp.f32 %v661_v55 }
0x118d   :  { %v4324_v56 = vpop.eup %4323 }
0x118e   :  { %v667_v60 = vmul.f32 %v4324_v56, %v665_v59 }
0x11ef   :  { %v670_v57 = vpop.permute.xlu0 %669 }
0x11f0   :  { %v672_v58 = vmul.f32 %v4324_v56, %v670_v57 }
0x11f2   :  { %674 = vrot.lane.b32.xlu1 %v672_v58, %s4559_s28 }
0x1264   :  { %v675_v61 = vpop.permute.xlu1 %674 }
0x1265   :  { %v677_v62 = vadd.f32 %v675_v61, %v667_v60 }
0x1267   :  { %4325 = vtanh.f32 %v677_v62  ;;  %v743_v29 = vrot.slane %v677_v62, 6 }
0x1271   :  { %v4326_v63 = vpop.eup %4325 }
0x1272   :  { %680 = vrot.lane.b32.xlu0 %v4326_v63, %s4558_s3 }
0x12e4   :  { %v681_v0 = vpop.permute.xlu0 %680 }
0x12e5   :  { %v683_v3 = vmul.f32 %v4324_v56, %v681_v0 }
0x12e7   :  { %v684_v7 = vpack.c.bf16 %v683_v3, %v683_v3  ;;  %v1385_v8 = vsel %vm1380_vm4, %v1384_v4, %v683_v3 }
0x12e9   :  { %v686_v10 = vrot.slane %v684_v7, 2 }
0x12eb   :  { %687 = vrot.lane.b32.xlu1 %v686_v10, %s4559_s28 }
0x135d   :  { %v688_v12 = vpop.permute.xlu1 %687 }
0x135e   :  { %3874 = vmatmul.mubr.msk.bf16.vlgmr.msra.gmra.mrb[16].mxu0 %vm153_vm2, %v688_v12 }
0x135f   :  { %3886 = vmatpush3.bf16.msra.mxu0 %v4649_v2  ;;  %3889 = vmatprep.mubr.msk.bf16.mxu0 %vm4556_vm1, %v4555_v1 }
0x1360   :  { %3887 = vmatprep.subr.bf16.mxu0 %v4555_v1 }
0x1363   :  { %3888 = vmatpush3.bf16.msra.mxu0 %v4662_v5 }
0x1364   :  { %3901 = vmatprep.subr.bf16.mxu0 %v4555_v1 }
0x1431   :  { %v726_v14 = vpop.f32.mrb[16].mxu0 }
0x1432   :  { %v733_v16 = vrot.slane %v726_v14, 2  ;;  %v3875_v17 = vpop.f32.mrb[17].mxu0 }
0x1433   :  { %v729_v18 = vpop.f32.mrb[18].mxu0 }
0x1434   :  { %v735_v19 = vadd.f32 %v733_v16, %v4692_v15  ;;  %v3876_v20 = vpop.f32.mrb[19].mxu0 }
0x1436   :  { %4327 = vtanh.f32 %v735_v19  ;;  %v736_v22 = vsub.f32 0.0, %v735_v19 }
0x1438   :  { %v737_v23 = vmul.f32 1.442695, %v736_v22 }
0x143a   :  { %4329 = vpow2.f32 %v737_v23 }
0x1440   :  { %v4328_v21 = vpop.eup %4327 }
0x1441   :  { %747 = vrot.lane.b32.xlu0 %v4328_v21, %s4558_s3 }
0x1444   :  { %v4330_v24 = vpop.eup %4329 }
0x1445   :  { %v739_v25 = vadd.f32 1.0, %v4330_v24 }
0x1447   :  { %4331 = vrcp.f32 %v739_v25 }
0x1451   :  { %v4332_v26 = vpop.eup %4331 }
0x1452   :  { %v745_v30 = vmul.f32 %v4332_v26, %v743_v29 }
0x14b3   :  { %v748_v27 = vpop.permute.xlu0 %747 }
0x14b4   :  { %v750_v28 = vmul.f32 %v4332_v26, %v748_v27 }
0x14b6   :  { %752 = vrot.lane.b32.xlu1 %v750_v28, %s4559_s28 }
0x1528   :  { %v753_v31 = vpop.permute.xlu1 %752 }
0x1529   :  { %v755_v15 = vadd.f32 %v753_v31, %v745_v30 }
0x152b   :  { %4333 = vtanh.f32 %v755_v15  ;;  %v818_v53 = vrot.slane %v755_v15, 6 }
0x1535   :  { %v4334_v32 = vpop.eup %4333 }
0x1536   :  { %758 = vrot.lane.b32.xlu0 %v4334_v32, %s4558_s3 }
0x15a8   :  { %v759_v33 = vpop.permute.xlu0 %758 }
0x15a9   :  { %v761_v34 = vmul.f32 %v4332_v26, %v759_v33 }
0x15ab   :  { %v762_v35 = vpack.c.bf16 %v761_v34, %v761_v34  ;;  %v4800_v36 = vsel %vm1382_vm5, %v1385_v8, %v761_v34 }
0x15ac   :  { %v1402_v37 = vpack.c.bf16 %v4800_v36, %v4742_v52  ;;  %v4237_v52 = vld [vmem:[%s5364_s4 + $0x8] sm:$0xff]  }
0x15ad   :  { %v764_v38 = vrot.slane %v762_v35, 3  ;;  %v4935_v36 = vld [vmem:[%s5365_s5 + $0x8] sm:$0xff]  }
0x15af   :  { %765 = vrot.lane.b32.xlu1 %v764_v38, %s4559_s28 }
0x1621   :  { %v766_v39 = vpop.permute.xlu1 %765 }
0x1622   :  { %3882 = vmatmul.mubr.msk.bf16.vlgmr.msra.gmra.mrb[16].mxu1 %vm153_vm2, %v766_v39 }
0x1623   :  { %3894 = vmatpush3.bf16.msra.mxu1 %v4649_v2  ;;  %3897 = vmatprep.mubr.msk.bf16.mxu1 %vm4556_vm1, %v4555_v1 }
0x1624   :  { %3895 = vmatprep.subr.bf16.mxu1 %v4555_v1 }
0x1627   :  { %3896 = vmatpush3.bf16.msra.mxu1 %v4662_v5 }
0x1628   :  { %3909 = vmatprep.subr.bf16.mxu1 %v4555_v1 }
0x16f5   :  { %v804_v40 = vpop.f32.mrb[16].mxu1 }
0x16f6   :  { %v810_v41 = vadd.f32 %v804_v40, %v4686_v9  ;;  %v3883_v42 = vpop.f32.mrb[17].mxu1 }
0x16f7   :  { %v807_v43 = vpop.f32.mrb[18].mxu1 }
0x16f8   :  { %4335 = vtanh.f32 %v810_v41  ;;  %v3884_v44 = vpop.f32.mrb[19].mxu1  ;;  %v811_v46 = vsub.f32 0.0, %v810_v41 }
0x16fa   :  { %v812_v47 = vmul.f32 1.442695, %v811_v46 }
0x16fc   :  { %4337 = vpow2.f32 %v812_v47 }
0x1702   :  { %v4336_v45 = vpop.eup %4335 }
0x1703   :  { %822 = vrot.lane.b32.xlu0 %v4336_v45, %s4558_s3 }
0x1706   :  { %v4338_v11 = vpop.eup %4337 }
0x1707   :  { %v814_v48 = vadd.f32 1.0, %v4338_v11 }
0x1709   :  { %4339 = vrcp.f32 %v814_v48 }
0x1713   :  { %v4340_v49 = vpop.eup %4339 }
0x1714   :  { %v820_v54 = vmul.f32 %v4340_v49, %v818_v53 }
0x1775   :  { %v823_v50 = vpop.permute.xlu0 %822 }
0x1776   :  { %v825_v51 = vmul.f32 %v4340_v49, %v823_v50 }
0x1778   :  { %827 = vrot.lane.b32.xlu1 %v825_v51, %s4559_s28 }
0x17ea   :  { %v828_v55 = vpop.permute.xlu1 %827 }
0x17eb   :  { %v830_v56 = vadd.f32 %v828_v55, %v820_v54  ;;  %v4852_v55 = vld [vmem:[%s5362_s2] sm:$0xff]  }
0x17ed   :  { %4341 = vtanh.f32 %v830_v56  ;;  %v895_v20 = vrot.slane %v830_v56, 6  ;;  %v4861_v56 = vld [vmem:[%s5362_s2 + $0x8] sm:$0xff]  }
0x17f7   :  { %v4342_v57 = vpop.eup %4341 }
0x17f8   :  { %833 = vrot.lane.b32.xlu0 %v4342_v57, %s4558_s3 }
0x186a   :  { %v834_v58 = vpop.permute.xlu0 %833 }
0x186b   :  { %v4816_v59 = vmul.f32 %v4340_v49, %v834_v58 }
0x186d   :  { %v837_v60 = vpack.c.bf16 %v4816_v59, %v4816_v59 }
0x186f   :  { %839 = vrot.lane.b32.xlu1 %v837_v60, %s4559_s28 }
0x18e1   :  { %v840_v61 = vpop.permute.xlu1 %839 }
0x18e2   :  { %3890 = vmatmul.mubr.msk.bf16.vlgmr.msra.gmra.mrb[20].mxu0 %vm153_vm2, %v840_v61 }
0x18e3   :  { %3902 = vmatpush3.bf16.msra.mxu0 %v4649_v2  ;;  %3905 = vmatprep.mubr.msk.bf16.mxu0 %vm4556_vm1, %v4555_v1 }
0x18e4   :  { %3903 = vmatprep.subr.bf16.mxu0 %v4555_v1 }
0x18e7   :  { %3904 = vmatpush3.bf16.msra.mxu0 %v4662_v5 }
0x18e8   :  { %3917 = vmatprep.subr.bf16.mxu0 %v4555_v1 }
0x19b5   :  { %v878_v62 = vpop.f32.mrb[20].mxu0 }
0x19b6   :  { %v885_v63 = vrot.slane %v878_v62, 6  ;;  %v3891_v0 = vpop.f32.mrb[21].mxu0 }
0x19b7   :  { %v881_v3 = vpop.f32.mrb[22].mxu0 }
0x19b8   :  { %v887_v4 = vadd.f32 %v885_v63, %v4686_v9  ;;  %v3892_v7 = vpop.f32.mrb[23].mxu0 }
0x19ba   :  { %4343 = vtanh.f32 %v887_v4  ;;  %v888_v10 = vsub.f32 0.0, %v887_v4 }
0x19bc   :  { %v889_v12 = vmul.f32 1.442695, %v888_v10 }
0x19be   :  { %4345 = vpow2.f32 %v889_v12 }
0x19c4   :  { %v4344_v8 = vpop.eup %4343 }
0x19c5   :  { %899 = vrot.lane.b32.xlu0 %v4344_v8, %s4558_s3 }
0x19c8   :  { %v4346_v14 = vpop.eup %4345 }
0x19c9   :  { %v891_v16 = vadd.f32 1.0, %v4346_v14 }
0x19cb   :  { %4347 = vrcp.f32 %v891_v16 }
0x19d5   :  { %v4348_v17 = vpop.eup %4347 }
0x19d6   :  { %v897_v21 = vmul.f32 %v4348_v17, %v895_v20 }
0x1a37   :  { %v900_v18 = vpop.permute.xlu0 %899 }
0x1a38   :  { %v902_v19 = vmul.f32 %v4348_v17, %v900_v18 }
0x1a3a   :  { %904 = vrot.lane.b32.xlu1 %v902_v19, %s4559_s28 }
0x1aac   :  { %v905_v22 = vpop.permute.xlu1 %904 }
0x1aad   :  { %v907_v23 = vadd.f32 %v905_v22, %v897_v21 }
0x1aaf   :  { %4349 = vtanh.f32 %v907_v23  ;;  %v973_v43 = vrot.slane %v907_v23, 6 }
0x1ab9   :  { %v4350_v24 = vpop.eup %4349 }
0x1aba   :  { %910 = vrot.lane.b32.xlu0 %v4350_v24, %s4558_s3 }
0x1b2c   :  { %v911_v25 = vpop.permute.xlu0 %910 }
0x1b2d   :  { %v913_v26 = vmul.f32 %v4348_v17, %v911_v25 }
0x1b2f   :  { %v914_v27 = vpack.c.bf16 %v913_v26, %v913_v26  ;;  %v1387_v49 = vsel %vm1378_vm3, %v4816_v59, %v913_v26 }
0x1b31   :  { %v916_v28 = vrot.slane %v914_v27, 1 }
0x1b33   :  { %917 = vrot.lane.b32.xlu1 %v916_v28, %s4559_s28 }
0x1ba5   :  { %v918_v29 = vpop.permute.xlu1 %917 }
0x1ba6   :  { %3898 = vmatmul.mubr.msk.bf16.vlgmr.msra.gmra.mrb[20].mxu1 %vm153_vm2, %v918_v29 }
0x1ba7   :  { %3910 = vmatpush3.bf16.msra.mxu1 %v4649_v2  ;;  %3913 = vmatprep.mubr.msk.bf16.mxu1 %vm4556_vm1, %v4555_v1 }
0x1ba8   :  { %3911 = vmatprep.subr.bf16.mxu1 %v4555_v1 }
0x1bab   :  { %3912 = vmatpush3.bf16.msra.mxu1 %v4662_v5 }
0x1bac   :  { %3925 = vmatprep.subr.bf16.mxu1 %v4555_v1 }
0x1c79   :  { %v956_v30 = vpop.f32.mrb[20].mxu1 }
0x1c7a   :  { %v963_v31 = vrot.slane %v956_v30, 4  ;;  %v3899_v15 = vpop.f32.mrb[21].mxu1 }
0x1c7b   :  { %v959_v32 = vpop.f32.mrb[22].mxu1 }
0x1c7c   :  { %v965_v33 = vadd.f32 %v963_v31, %v4686_v9  ;;  %v3900_v34 = vpop.f32.mrb[23].mxu1 }
0x1c7e   :  { %4351 = vtanh.f32 %v965_v33  ;;  %v966_v2 = vsub.f32 0.0, %v965_v33 }
0x1c80   :  { %v967_v38 = vmul.f32 1.442695, %v966_v2 }
0x1c82   :  { %4353 = vpow2.f32 %v967_v38 }
0x1c88   :  { %v4352_v35 = vpop.eup %4351 }
0x1c89   :  { %977 = vrot.lane.b32.xlu0 %v4352_v35, %s4558_s3 }
0x1c8c   :  { %v4354_v39 = vpop.eup %4353 }
0x1c8d   :  { %v969_v40 = vadd.f32 1.0, %v4354_v39 }
0x1c8f   :  { %4355 = vrcp.f32 %v969_v40 }
0x1c99   :  { %v4356_v5 = vpop.eup %4355 }
0x1c9a   :  { %v975_v44 = vmul.f32 %v4356_v5, %v973_v43 }
0x1cfb   :  { %v978_v41 = vpop.permute.xlu0 %977 }
0x1cfc   :  { %v980_v42 = vmul.f32 %v4356_v5, %v978_v41 }
0x1cfe   :  { %982 = vrot.lane.b32.xlu1 %v980_v42, %s4559_s28 }
0x1d70   :  { %v983_v45 = vpop.permute.xlu1 %982 }
0x1d71   :  { %v985_v46 = vadd.f32 %v983_v45, %v975_v44 }
0x1d73   :  { %4357 = vtanh.f32 %v985_v46  ;;  %v1051_v14 = vrot.slane %v985_v46, 6 }
0x1d7d   :  { %v4358_v47 = vpop.eup %4357 }
0x1d7e   :  { %988 = vrot.lane.b32.xlu0 %v4358_v47, %s4558_s3 }
0x1df0   :  { %v989_v11 = vpop.permute.xlu0 %988 }
0x1df1   :  { %v991_v48 = vmul.f32 %v4356_v5, %v989_v11 }
0x1df3   :  { %v992_v50 = vpack.c.bf16 %v991_v48, %v991_v48  ;;  %v1388_v51 = vsel %vm1380_vm4, %v1387_v49, %v991_v48 }
0x1df5   :  { %v994_v53 = vrot.slane %v992_v50, 2 }
0x1df7   :  { %995 = vrot.lane.b32.xlu1 %v994_v53, %s4559_s28 }
0x1e69   :  { %v996_v54 = vpop.permute.xlu1 %995 }
0x1e6a   :  { %3906 = vmatmul.mubr.msk.bf16.vlgmr.msra.gmra.mrb[24].mxu0 %vm153_vm2, %v996_v54 }
0x1e6b   :  { %3918 = vmatpush3.bf16.msra.mxu0 %v4852_v55  ;;  %3921 = vmatprep.mubr.msk.bf16.mxu0 %vm4556_vm1, %v4555_v1 }
0x1e6c   :  { %3919 = vmatprep.subr.bf16.mxu0 %v4555_v1 }
0x1e6f   :  { %3920 = vmatpush3.bf16.msra.mxu0 %v4861_v56 }
0x1e70   :  { %3933 = vmatprep.subr.bf16.mxu0 %v4555_v1 }
0x1f3d   :  { %v1034_v57 = vpop.f32.mrb[24].mxu0 }
0x1f3e   :  { %v1041_v58 = vrot.slane %v1034_v57, 2  ;;  %v3907_v59 = vpop.f32.mrb[25].mxu0 }
0x1f3f   :  { %v1037_v60 = vpop.f32.mrb[26].mxu0 }
0x1f40   :  { %v1043_v61 = vadd.f32 %v1041_v58, %v4686_v9  ;;  %v3908_v62 = vpop.f32.mrb[27].mxu0 }
0x1f42   :  { %4359 = vtanh.f32 %v1043_v61  ;;  %v1044_v0 = vsub.f32 0.0, %v1043_v61 }
0x1f44   :  { %v1045_v3 = vmul.f32 1.442695, %v1044_v0 }
0x1f46   :  { %4361 = vpow2.f32 %v1045_v3 }
0x1f4c   :  { %v4360_v63 = vpop.eup %4359 }
0x1f4d   :  { %1055 = vrot.lane.b32.xlu0 %v4360_v63, %s4558_s3 }
0x1f50   :  { %v4362_v4 = vpop.eup %4361 }
0x1f51   :  { %v1047_v7 = vadd.f32 1.0, %v4362_v4 }
0x1f53   :  { %4363 = vrcp.f32 %v1047_v7 }
0x1f5d   :  { %v4364_v8 = vpop.eup %4363 }
0x1f5e   :  { %v1053_v16 = vmul.f32 %v4364_v8, %v1051_v14 }
0x1fbf   :  { %v1056_v10 = vpop.permute.xlu0 %1055 }
0x1fc0   :  { %v1058_v12 = vmul.f32 %v4364_v8, %v1056_v10 }
0x1fc2   :  { %1060 = vrot.lane.b32.xlu1 %v1058_v12, %s4559_s28 }
0x2034   :  { %v1061_v17 = vpop.permute.xlu1 %1060 }
0x2035   :  { %v1063_v9 = vadd.f32 %v1061_v17, %v1053_v16 }
0x2037   :  { %4365 = vtanh.f32 %v1063_v9  ;;  %v1126_v38 = vrot.slane %v1063_v9, 6 }
0x2041   :  { %v4366_v18 = vpop.eup %4365 }
0x2042   :  { %1066 = vrot.lane.b32.xlu0 %v4366_v18, %s4558_s3 }
0x20b4   :  { %v1067_v19 = vpop.permute.xlu0 %1066 }
0x20b5   :  { %v1069_v20 = vmul.f32 %v4364_v8, %v1067_v19 }
0x20b7   :  { %v1070_v21 = vpack.c.bf16 %v1069_v20, %v1069_v20  ;;  %v4870_v22 = vsel %vm1382_vm5, %v1388_v51, %v1069_v20 }
0x20b9   :  { %v1072_v23 = vrot.slane %v1070_v21, 3 }
0x20bb   :  { %1073 = vrot.lane.b32.xlu1 %v1072_v23, %s4559_s28 }
0x212d   :  { %v1074_v24 = vpop.permute.xlu1 %1073 }
0x212e   :  { %3914 = vmatmul.mubr.msk.bf16.vlgmr.msra.gmra.mrb[24].mxu1 %vm153_vm2, %v1074_v24 }
0x212f   :  { %3926 = vmatpush3.bf16.msra.mxu1 %v4852_v55  ;;  %3929 = vmatprep.mubr.msk.bf16.mxu1 %vm4556_vm1, %v4555_v1 }
0x2130   :  { %3927 = vmatprep.subr.bf16.mxu1 %v4555_v1 }
0x2133   :  { %3928 = vmatpush3.bf16.msra.mxu1 %v4861_v56 }
0x2201   :  { %v1112_v25 = vpop.f32.mrb[24].mxu1 }
0x2202   :  { %v1118_v26 = vadd.f32 %v1112_v25, %v4690_v13  ;;  %v3915_v27 = vpop.f32.mrb[25].mxu1 }
0x2203   :  { %v1115_v28 = vpop.f32.mrb[26].mxu1 }
0x2204   :  { %4367 = vtanh.f32 %v1118_v26  ;;  %v3916_v29 = vpop.f32.mrb[27].mxu1  ;;  %v1119_v31 = vsub.f32 0.0, %v1118_v26 }
0x2206   :  { %v1120_v15 = vmul.f32 1.442695, %v1119_v31 }
0x2208   :  { %4369 = vpow2.f32 %v1120_v15 }
0x220e   :  { %v4368_v30 = vpop.eup %4367 }
0x220f   :  { %1130 = vrot.lane.b32.xlu0 %v4368_v30, %s4558_s3 }
0x2212   :  { %v4370_v32 = vpop.eup %4369 }
0x2213   :  { %v1122_v33 = vadd.f32 1.0, %v4370_v32 }
0x2215   :  { %4371 = vrcp.f32 %v1122_v33 }
0x221f   :  { %v4372_v34 = vpop.eup %4371 }
0x2220   :  { %v1128_v39 = vmul.f32 %v4372_v34, %v1126_v38 }
0x2281   :  { %v1131_v35 = vpop.permute.xlu0 %1130 }
0x2282   :  { %v1133_v2 = vmul.f32 %v4372_v34, %v1131_v35 }
0x2284   :  { %1135 = vrot.lane.b32.xlu1 %v1133_v2, %s4559_s28 }
0x22f6   :  { %v1136_v40 = vpop.permute.xlu1 %1135 }
0x22f7   :  { %v1138_v5 = vadd.f32 %v1136_v40, %v1128_v39 }
0x22f9   :  { %4373 = vtanh.f32 %v1138_v5  ;;  %v1203_v60 = vrot.slane %v1138_v5, 6 }
0x2303   :  { %v4374_v41 = vpop.eup %4373 }
0x2304   :  { %1141 = vrot.lane.b32.xlu0 %v4374_v41, %s4558_s3 }
0x2376   :  { %v1142_v42 = vpop.permute.xlu0 %1141 }
0x2377   :  { %v4883_v43 = vmul.f32 %v4372_v34, %v1142_v42 }
0x2379   :  { %v1145_v44 = vpack.c.bf16 %v4883_v43, %v4883_v43 }
0x237b   :  { %1147 = vrot.lane.b32.xlu1 %v1145_v44, %s4559_s28 }
0x23ed   :  { %v1148_v45 = vpop.permute.xlu1 %1147 }
0x23ee   :  { %3922 = vmatmul.mubr.msk.bf16.vlgmr.msra.gmra.mrb[28].mxu0 %vm153_vm2, %v1148_v45 }
0x23ef   :  { %3934 = vmatpush3.bf16.msra.mxu0 %v4852_v55  ;;  %3937 = vmatprep.mubr.msk.bf16.mxu0 %vm4556_vm1, %v4555_v1 }
0x23f0   :  { %3935 = vmatprep.subr.bf16.mxu0 %v4555_v1 }
0x23f3   :  { %3936 = vmatpush3.bf16.msra.mxu0 %v4861_v56 }
0x23f4   :  { %3949 = vmatprep.subr.bf16.mxu0 %v4555_v1 }
0x24c1   :  { %v1186_v46 = vpop.f32.mrb[28].mxu0 }
0x24c2   :  { %v1193_v47 = vrot.slane %v1186_v46, 6  ;;  %v3923_v11 = vpop.f32.mrb[29].mxu0 }
0x24c3   :  { %v1189_v48 = vpop.f32.mrb[30].mxu0 }
0x24c4   :  { %v1195_v49 = vadd.f32 %v1193_v47, %v4690_v13  ;;  %v3924_v50 = vpop.f32.mrb[31].mxu0 }
0x24c6   :  { %4375 = vtanh.f32 %v1195_v49  ;;  %v1196_v53 = vsub.f32 0.0, %v1195_v49 }
0x24c8   :  { %v1197_v54 = vmul.f32 1.442695, %v1196_v53 }
0x24ca   :  { %4377 = vpow2.f32 %v1197_v54 }
0x24d0   :  { %v4376_v51 = vpop.eup %4375 }
0x24d1   :  { %1207 = vrot.lane.b32.xlu0 %v4376_v51, %s4558_s3 }
0x24d4   :  { %v4378_v55 = vpop.eup %4377 }
0x24d5   :  { %v1199_v57 = vadd.f32 1.0, %v4378_v55 }
0x24d7   :  { %4379 = vrcp.f32 %v1199_v57 }
0x24e1   :  { %v4380_v56 = vpop.eup %4379 }
0x24e2   :  { %v1205_v61 = vmul.f32 %v4380_v56, %v1203_v60 }
0x2543   :  { %v1208_v58 = vpop.permute.xlu0 %1207 }
0x2544   :  { %v1210_v59 = vmul.f32 %v4380_v56, %v1208_v58  ;;  %v4926_v58 = vld [vmem:[%s5365_s5] sm:$0xff]  }
0x2546   :  { %1212 = vrot.lane.b32.xlu1 %v1210_v59, %s4559_s28 }
0x25b8   :  { %v1213_v62 = vpop.permute.xlu1 %1212 }
0x25b9   :  { %v1215_v63 = vadd.f32 %v1213_v62, %v1205_v61 }
0x25bb   :  { %4381 = vtanh.f32 %v1215_v63  ;;  %v1281_v28 = vrot.slane %v1215_v63, 6 }
0x25c5   :  { %v4382_v0 = vpop.eup %4381 }
0x25c6   :  { %1218 = vrot.lane.b32.xlu0 %v4382_v0, %s4558_s3 }
0x2638   :  { %v1219_v3 = vpop.permute.xlu0 %1218 }
0x2639   :  { %v1221_v4 = vmul.f32 %v4380_v56, %v1219_v3  ;;  %v4235_v56 = vld [vmem:[%s5364_s4] sm:$0xff]  }
0x263a   :  { %3941 = vmatprep.subr.bf16.mxu1 %v4235_v56 }
0x263b   :  { %v1222_v7 = vpack.c.bf16 %v1221_v4, %v1221_v4  ;;  %v1390_v34 = vsel %vm1378_vm3, %v4883_v43, %v1221_v4 }
0x263d   :  { %v1224_v8 = vrot.slane %v1222_v7, 1  ;;  %v3587_v7 = vld [vmem:[%s5366_s6] ss:$0 sm:$0xff] }
0x263f   :  { %1225 = vrot.lane.b32.xlu1 %v1224_v8, %s4559_s28 }
0x26b1   :  { %v1226_v10 = vpop.permute.xlu1 %1225 }
0x26b2   :  { %3930 = vmatmul.mubr.msk.bf16.vlgmr.msra.gmra.mrb[28].mxu1 %vm153_vm2, %v1226_v10 }
0x26b3   :  { %3942 = vmatpush3.bf16.msra.mxu1 %v4235_v56 }
0x26b4   :  { %3943 = vmatprep.subr.bf16.mxu1 %v4237_v52 }
0x26b7   :  { %3944 = vmatpush3.bf16.msra.mxu1 %v4237_v52 }
0x26b8   :  { %3957 = vmatprep.subr.bf16.mxu1 %v4555_v1 }
0x2785   :  { %v1264_v12 = vpop.f32.mrb[28].mxu1 }
0x2786   :  { %v1271_v14 = vrot.slane %v1264_v12, 4  ;;  %v3931_v16 = vpop.f32.mrb[29].mxu1 }
0x2787   :  { %v1267_v17 = vpop.f32.mrb[30].mxu1 }
0x2788   :  { %v1273_v9 = vadd.f32 %v1271_v14, %v4690_v13  ;;  %v3932_v18 = vpop.f32.mrb[31].mxu1 }
0x278a   :  { %4383 = vtanh.f32 %v1273_v9  ;;  %v1274_v20 = vsub.f32 0.0, %v1273_v9 }
0x278c   :  { %v1275_v21 = vmul.f32 1.442695, %v1274_v20 }
0x278e   :  { %4385 = vpow2.f32 %v1275_v21 }
0x2794   :  { %v4384_v19 = vpop.eup %4383 }
0x2795   :  { %1285 = vrot.lane.b32.xlu0 %v4384_v19, %s4558_s3 }
0x2798   :  { %v4386_v23 = vpop.eup %4385 }
0x2799   :  { %v1277_v24 = vadd.f32 1.0, %v4386_v23 }
0x279b   :  { %4387 = vrcp.f32 %v1277_v24 }
0x27a5   :  { %v4388_v25 = vpop.eup %4387 }
0x27a6   :  { %v1283_v29 = vmul.f32 %v4388_v25, %v1281_v28 }
0x2807   :  { %v1286_v26 = vpop.permute.xlu0 %1285 }
0x2808   :  { %v1288_v27 = vmul.f32 %v4388_v25, %v1286_v26 }
0x280a   :  { %1290 = vrot.lane.b32.xlu1 %v1288_v27, %s4559_s28 }
0x287c   :  { %v1291_v30 = vpop.permute.xlu1 %1290 }
0x287d   :  { %v1293_v31 = vadd.f32 %v1291_v30, %v1283_v29 }
0x287f   :  { %4389 = vtanh.f32 %v1293_v31 }
0x2889   :  { %v4390_v15 = vpop.eup %4389 }
0x288a   :  { %1296 = vrot.lane.b32.xlu0 %v4390_v15, %s4558_s3 }
0x28fc   :  { %v1297_v32 = vpop.permute.xlu0 %1296 }
0x28fd   :  { %v1299_v33 = vmul.f32 %v4388_v25, %v1297_v32 }
0x28ff   :  { %v1300_v35 = vpack.c.bf16 %v1299_v33, %v1299_v33  ;;  %v1391_v2 = vsel %vm1380_vm4, %v1390_v34, %v1299_v33 }
0x2901   :  { %v1302_v38 = vrot.slane %v1300_v35, 2 }
0x2903   :  { %1303 = vrot.lane.b32.xlu1 %v1302_v38, %s4559_s28 }
0x2975   :  { %v1304_v39 = vpop.permute.xlu1 %1303 }
0x2976   :  { %3938 = vmatmul.mubr.msk.bf16.vlgmr.msra.gmra.mrb[32].mxu0 %vm153_vm2, %v1304_v39 }
0x2977   :  { %3953 = vmatprep.mubr.msk.bf16.mxu0 %vm4556_vm1, %v4555_v1  ;;  %3950 = vmatpush3.bf16.msra.mxu0 %v4926_v58 }
0x2978   :  { %3951 = vmatprep.subr.bf16.mxu0 %v4555_v1 }
0x297b   :  { %3952 = vmatpush3.bf16.msra.mxu0 %v4935_v36 }
0x297c   :  { %3965 = vmatprep.subr.bf16.mxu0 %v4555_v1 }
0x297e   :  { %3954 = vmatmul.mubr.bf16.vlgmr.msra.gmra.mrb[36].mxu0 %v4557_v6 }
0x297f   :  { %3966 = vmatpush3.bf16.msra.mxu0 %v4926_v58  ;;  %3969 = vmatprep.mubr.msk.bf16.mxu0 %vm4556_vm1, %v4555_v1 }
0x2980   :  { %3967 = vmatprep.subr.bf16.mxu0 %v4555_v1 }
0x2983   :  { %3968 = vmatpush3.bf16.msra.mxu0 %v4935_v36 }
0x2984   :  { %3981 = vmatprep.subr.bf16.mxu0 %v4555_v1 }
0x2a49   :  { %v1342_v40 = vpop.f32.mrb[32].mxu0 }
0x2a4a   :  { %v1349_v5 = vrot.slane %v1342_v40, 2  ;;  %v3939_v41 = vpop.f32.mrb[33].mxu0 }
0x2a4b   :  { %v1345_v42 = vpop.f32.mrb[34].mxu0 }
0x2a4c   :  { %v1351_v44 = vadd.f32 %v1349_v5, %v4690_v13  ;;  %v3940_v45 = vpop.f32.mrb[35].mxu0  ;;  %v1359_v13 = vrot.slane %v1293_v31, 6 }
0x2a4e   :  { %4391 = vtanh.f32 %v1351_v44  ;;  %v1352_v46 = vsub.f32 0.0, %v1351_v44 }
0x2a50   :  { %v1353_v47 = vmul.f32 1.442695, %v1352_v46 }
0x2a51   :  { %v1529_v0 = vpop.f32.mrb[36].mxu0 }
0x2a52   :  { %4393 = vpow2.f32 %v1353_v47  ;;  %v3955_v3 = vpop.f32.mrb[37].mxu0 }
0x2a53   :  { %v1532_v4 = vpop.f32.mrb[38].mxu0 }
0x2a58   :  { %v4392_v43 = vpop.eup %4391 }
0x2a59   :  { %1363 = vrot.lane.b32.xlu0 %v4392_v43, %s4558_s3 }
0x2a5c   :  { %v4394_v11 = vpop.eup %4393 }
0x2a5d   :  { %v1355_v48 = vadd.f32 1.0, %v4394_v11 }
0x2a5f   :  { %4395 = vrcp.f32 %v1355_v48 }
0x2a69   :  { %v4396_v49 = vpop.eup %4395 }
0x2a6a   :  { %v1361_v53 = vmul.f32 %v4396_v49, %v1359_v13 }
0x2acb   :  { %v1364_v50 = vpop.permute.xlu0 %1363 }
0x2acc   :  { %v1366_v51 = vmul.f32 %v4396_v49, %v1364_v50 }
0x2ace   :  { %1368 = vrot.lane.b32.xlu1 %v1366_v51, %s4559_s28 }
0x2ad2   :  { %1412 = vrot.lane.b32.xlu1 %v1402_v37, %s4559_s28 }
0x2b40   :  { %v1369_v54 = vpop.permute.xlu1 %1368 }
0x2b41   :  { %v1371_v55 = vadd.f32 %v1369_v54, %v1361_v53 }
0x2b43   :  { %4397 = vtanh.f32 %v1371_v55 }
0x2b44   :  { %v1413_v57 = vpop.permute.xlu1 %1412 }
0x2b45   :  { %3945 = vmatprep.mubr.msk.bf16.mxu1 %vm153_vm2, %v1413_v57 }
0x2b4d   :  { %v4398_v37 = vpop.eup %4397 }
0x2b4e   :  { %1374 = vrot.lane.b32.xlu0 %v4398_v37, %s4558_s3 }
0x2bc0   :  { %v1375_v59 = vpop.permute.xlu0 %1374 }
0x2bc1   :  { %v1377_v60 = vmul.f32 %v4396_v49, %v1375_v59 }
0x2bc3   :  { %v1392_v61 = vsel %vm1382_vm5, %v1391_v2, %v1377_v60 }
0x2bc4   :  { %v1403_v62 = vpack.c.bf16 %v1392_v61, %v4870_v22  ;;  %v3956_v22 = vpop.f32.mrb[39].mxu0 }
0x2bc6   :  { %1414 = vrot.lane.b32.xlu0 %v1403_v62, %s4559_s28 }
0x2c38   :  { %v1415_v63 = vpop.permute.xlu0 %1414 }
0x2c39   :  { %3946 = vmatmul.mubr.msk.bf16.vlgmr.msra.gmra.mrb[32].mxu1 %vm153_vm2, %v1415_v63 }
0x2c3a   :  { %3958 = vmatpush3.bf16.msra.mxu1 %v4926_v58  ;;  %3961 = vmatprep.mubr.msk.bf16.mxu1 %vm4556_vm1, %v4555_v1 }
0x2c3b   :  { %3959 = vmatprep.subr.bf16.mxu1 %v4555_v1 }
0x2c3e   :  { %3960 = vmatpush3.bf16.msra.mxu1 %v4935_v36 }
0x2c3f   :  { %3973 = vmatprep.subr.bf16.mxu1 %v4555_v1 }
0x2d0c   :  { %v3947_v8 = vpop.f32.mrb[32].mxu1 }
0x2d0d   :  { %v4962_v10 = vadd.f32 %v3947_v8, %v3587_v7  ;;  %v1468_v12 = vpop.f32.mrb[33].mxu1 }
0x2d0e   :  { %v4964_v14 = vadd.f32 %v3587_v7, %v1468_v12  ;;  %v3948_v16 = vpop.f32.mrb[34].mxu1 }
0x2d0f   :  { %v4966_v17 = vadd.f32 %v3948_v16, %v3587_v7  ;;  %v1471_v9 = vpop.f32.mrb[35].mxu1 }
0x2d10   :  { %v1535_v18 = vadd.f32 %v1529_v0, %v4964_v14  ;;  %v4969_v19 = vadd.f32 %v3587_v7, %v1471_v9 }
0x2d12   :  { %4399 = vtanh.f32 %v1535_v18  ;;  %v1536_v21 = vsub.f32 0.0, %v1535_v18 }
0x2d14   :  { %v1537_v23 = vmul.f32 1.442695, %v1536_v21 }
0x2d16   :  { %4401 = vpow2.f32 %v1537_v23 }
0x2d1c   :  { %v4400_v20 = vpop.eup %4399 }
0x2d1d   :  { %1544 = vrot.lane.b32.xlu1 %v4400_v20, %s4558_s3 }
0x2d20   :  { %v4402_v24 = vpop.eup %4401 }
0x2d21   :  { %v1539_v25 = vadd.f32 1.0, %v4402_v24 }
0x2d23   :  { %4403 = vrcp.f32 %v1539_v25 }
0x2d2d   :  { %v4404_v26 = vpop.eup %4403 }
0x2d2e   :  { %v1542_v29 = vmul.f32 0.0, %v4404_v26 }
0x2d8f   :  { %v1545_v27 = vpop.permute.xlu1 %1544 }
0x2d90   :  { %v1547_v28 = vmul.f32 %v4404_v26, %v1545_v27 }
0x2d92   :  { %1549 = vrot.lane.b32.xlu0 %v1547_v28, %s4559_s28 }
0x2e04   :  { %v1550_v30 = vpop.permute.xlu0 %1549 }
0x2e05   :  { %v1552_v31 = vadd.f32 %v1550_v30, %v1542_v29 }
0x2e07   :  { %4405 = vtanh.f32 %v1552_v31  ;;  %v1617_v49 = vrot.slane %v1552_v31, 6 }
0x2e11   :  { %v4406_v15 = vpop.eup %4405 }
0x2e12   :  { %1555 = vrot.lane.b32.xlu1 %v4406_v15, %s4558_s3 }
0x2e84   :  { %v1556_v32 = vpop.permute.xlu1 %1555 }
0x2e85   :  { %v1558_v33 = vmul.f32 %v4404_v26, %v1556_v32 }
0x2e87   :  { %v1559_v34 = vpack.c.bf16 %v1558_v33, %v1558_v33 }
0x2e89   :  { %1561 = vrot.lane.b32.xlu0 %v1559_v34, %s4559_s28 }
0x2efb   :  { %v1562_v35 = vpop.permute.xlu0 %1561 }
0x2efc   :  { %3962 = vmatmul.mubr.msk.bf16.vlgmr.msra.gmra.mrb[36].mxu1 %vm153_vm2, %v1562_v35 }
0x2efd   :  { %3974 = vmatpush3.bf16.msra.mxu1 %v4926_v58  ;;  %3977 = vmatprep.mubr.msk.bf16.mxu1 %vm4556_vm1, %v4555_v1 }
0x2efe   :  { %3975 = vmatprep.subr.bf16.mxu1 %v4555_v1 }
0x2f01   :  { %3976 = vmatpush3.bf16.msra.mxu1 %v4935_v36 }
0x2f02   :  { %3989 = vmatprep.subr.bf16.mxu1 %v4555_v1 }
0x2fcf   :  { %v1600_v2 = vpop.f32.mrb[36].mxu1 }
0x2fd0   :  { %v1607_v38 = vrot.slane %v1600_v2, 6  ;;  %v3963_v39 = vpop.f32.mrb[37].mxu1 }
0x2fd1   :  { %v1603_v40 = vpop.f32.mrb[38].mxu1 }
0x2fd2   :  { %v1609_v5 = vadd.f32 %v1607_v38, %v4964_v14  ;;  %v3964_v41 = vpop.f32.mrb[39].mxu1 }
0x2fd4   :  { %4407 = vtanh.f32 %v1609_v5  ;;  %v1610_v44 = vsub.f32 0.0, %v1609_v5 }
0x2fd6   :  { %v1611_v45 = vmul.f32 1.442695, %v1610_v44 }
0x2fd8   :  { %4409 = vpow2.f32 %v1611_v45 }
0x2fde   :  { %v4408_v42 = vpop.eup %4407 }
0x2fdf   :  { %1621 = vrot.lane.b32.xlu1 %v4408_v42, %s4558_s3 }
0x2fe2   :  { %v4410_v43 = vpop.eup %4409 }
0x2fe3   :  { %v1613_v46 = vadd.f32 1.0, %v4410_v43 }
0x2fe5   :  { %4411 = vrcp.f32 %v1613_v46 }
0x2fef   :  { %v4412_v47 = vpop.eup %4411 }
0x2ff0   :  { %v1619_v50 = vmul.f32 %v4412_v47, %v1617_v49 }
0x3051   :  { %v1622_v11 = vpop.permute.xlu1 %1621 }
0x3052   :  { %v1624_v48 = vmul.f32 %v4412_v47, %v1622_v11 }
0x3054   :  { %1626 = vrot.lane.b32.xlu0 %v1624_v48, %s4559_s28 }
0x30c6   :  { %v1627_v51 = vpop.permute.xlu0 %1626 }
0x30c7   :  { %v1629_v13 = vadd.f32 %v1627_v51, %v1619_v50 }
0x30c9   :  { %4413 = vtanh.f32 %v1629_v13  ;;  %v1695_v9 = vrot.slane %v1629_v13, 6 }
0x30d3   :  { %v4414_v53 = vpop.eup %4413 }
0x30d4   :  { %1632 = vrot.lane.b32.xlu1 %v4414_v53, %s4558_s3 }
0x3146   :  { %v1633_v54 = vpop.permute.xlu1 %1632 }
0x3147   :  { %v1635_v55 = vmul.f32 %v4412_v47, %v1633_v54 }
0x3149   :  { %v1636_v57 = vpack.c.bf16 %v1635_v55, %v1635_v55 }
0x314b   :  { %v1638_v56 = vrot.slane %v1636_v57, 1 }
0x314d   :  { %1639 = vrot.lane.b32.xlu0 %v1638_v56, %s4559_s28 }
0x31bf   :  { %v1640_v52 = vpop.permute.xlu0 %1639 }
0x31c0   :  { %3970 = vmatmul.mubr.msk.bf16.vlgmr.msra.gmra.mrb[40].mxu0 %vm153_vm2, %v1640_v52 }
0x31c1   :  { %3982 = vmatpush3.bf16.msra.mxu0 %v4926_v58  ;;  %3985 = vmatprep.mubr.msk.bf16.mxu0 %vm4556_vm1, %v4555_v1 }
0x31c2   :  { %3983 = vmatprep.subr.bf16.mxu0 %v4555_v1 }
0x31c5   :  { %3984 = vmatpush3.bf16.msra.mxu0 %v4935_v36 }
0x31c6   :  { %3997 = vmatprep.subr.bf16.mxu0 %v4555_v1 }
0x3293   :  { %v1678_v37 = vpop.f32.mrb[40].mxu0 }
0x3294   :  { %v1685_v59 = vrot.slane %v1678_v37, 4  ;;  %v3971_v60 = vpop.f32.mrb[41].mxu0 }
0x3295   :  { %v1681_v61 = vpop.f32.mrb[42].mxu0 }
0x3296   :  { %v1687_v62 = vadd.f32 %v1685_v59, %v4964_v14  ;;  %v3972_v63 = vpop.f32.mrb[43].mxu0 }
0x3298   :  { %4415 = vtanh.f32 %v1687_v62  ;;  %v1688_v3 = vsub.f32 0.0, %v1687_v62 }
0x329a   :  { %v1689_v4 = vmul.f32 1.442695, %v1688_v3 }
0x329c   :  { %4417 = vpow2.f32 %v1689_v4 }
0x32a2   :  { %v4416_v0 = vpop.eup %4415 }
0x32a3   :  { %1699 = vrot.lane.b32.xlu1 %v4416_v0, %s4558_s3 }
0x32a6   :  { %v4418_v22 = vpop.eup %4417 }
0x32a7   :  { %v1691_v7 = vadd.f32 1.0, %v4418_v22 }
0x32a9   :  { %4419 = vrcp.f32 %v1691_v7 }
0x32b3   :  { %v4420_v8 = vpop.eup %4419 }
0x32b4   :  { %v1697_v18 = vmul.f32 %v4420_v8, %v1695_v9 }
0x3315   :  { %v1700_v12 = vpop.permute.xlu1 %1699 }
0x3316   :  { %v1702_v16 = vmul.f32 %v4420_v8, %v1700_v12 }
0x3318   :  { %1704 = vrot.lane.b32.xlu0 %v1702_v16, %s4559_s28 }
0x338a   :  { %v1705_v20 = vpop.permute.xlu0 %1704 }
0x338b   :  { %v1707_v21 = vadd.f32 %v1705_v20, %v1697_v18 }
0x338d   :  { %4421 = vtanh.f32 %v1707_v21  ;;  %v1773_v42 = vrot.slane %v1707_v21, 6 }
0x3397   :  { %v4422_v23 = vpop.eup %4421 }
0x3398   :  { %1710 = vrot.lane.b32.xlu1 %v4422_v23, %s4558_s3 }
0x340a   :  { %v1711_v24 = vpop.permute.xlu1 %1710 }
0x340b   :  { %v1713_v25 = vmul.f32 %v4420_v8, %v1711_v24 }
0x340d   :  { %v1714_v26 = vpack.c.bf16 %v1713_v25, %v1713_v25 }
0x340f   :  { %v1716_v27 = vrot.slane %v1714_v26, 2 }
0x3411   :  { %1717 = vrot.lane.b32.xlu0 %v1716_v27, %s4559_s28 }
0x3483   :  { %v1718_v28 = vpop.permute.xlu0 %1717 }
0x3484   :  { %3978 = vmatmul.mubr.msk.bf16.vlgmr.msra.gmra.mrb[40].mxu1 %vm153_vm2, %v1718_v28 }
0x3485   :  { %3990 = vmatpush3.bf16.msra.mxu1 %v4926_v58  ;;  %3993 = vmatprep.mubr.msk.bf16.mxu1 %vm4556_vm1, %v4555_v1 }
0x3486   :  { %3991 = vmatprep.subr.bf16.mxu1 %v4555_v1 }
0x3489   :  { %3992 = vmatpush3.bf16.msra.mxu1 %v4935_v36 }
0x348a   :  { %4005 = vmatprep.subr.bf16.mxu1 %v4555_v1 }
0x3557   :  { %v1756_v29 = vpop.f32.mrb[40].mxu1 }
0x3558   :  { %v1763_v30 = vrot.slane %v1756_v29, 2  ;;  %v3979_v31 = vpop.f32.mrb[41].mxu1 }
0x3559   :  { %v1759_v15 = vpop.f32.mrb[42].mxu1 }
0x355a   :  { %v1765_v32 = vadd.f32 %v1763_v30, %v4964_v14  ;;  %v3980_v33 = vpop.f32.mrb[43].mxu1 }
0x355c   :  { %4423 = vtanh.f32 %v1765_v32  ;;  %v1766_v35 = vsub.f32 0.0, %v1765_v32 }
0x355e   :  { %v1767_v2 = vmul.f32 1.442695, %v1766_v35 }
0x3560   :  { %4425 = vpow2.f32 %v1767_v2 }
0x3566   :  { %v4424_v34 = vpop.eup %4423 }
0x3567   :  { %1777 = vrot.lane.b32.xlu1 %v4424_v34, %s4558_s3 }
0x356a   :  { %v4426_v38 = vpop.eup %4425 }
0x356b   :  { %v1769_v39 = vadd.f32 1.0, %v4426_v38 }
0x356d   :  { %4427 = vrcp.f32 %v1769_v39 }
0x3577   :  { %v4428_v40 = vpop.eup %4427 }
0x3578   :  { %v1775_v44 = vmul.f32 %v4428_v40, %v1773_v42 }
0x35d9   :  { %v1778_v5 = vpop.permute.xlu1 %1777 }
0x35da   :  { %v1780_v41 = vmul.f32 %v4428_v40, %v1778_v5 }
0x35dc   :  { %1782 = vrot.lane.b32.xlu0 %v1780_v41, %s4559_s28 }
0x364e   :  { %v1783_v45 = vpop.permute.xlu0 %1782 }
0x364f   :  { %v1785_v14 = vadd.f32 %v1783_v45, %v1775_v44 }
0x3651   :  { %4429 = vtanh.f32 %v1785_v14  ;;  %v1848_v62 = vrot.slane %v1785_v14, 6 }
0x365b   :  { %v4430_v43 = vpop.eup %4429 }
0x365c   :  { %1788 = vrot.lane.b32.xlu1 %v4430_v43, %s4558_s3 }
0x36ce   :  { %v1789_v46 = vpop.permute.xlu1 %1788 }
0x36cf   :  { %v1791_v47 = vmul.f32 %v4428_v40, %v1789_v46 }
0x36d1   :  { %v1792_v11 = vpack.c.bf16 %v1791_v47, %v1791_v47 }
0x36d3   :  { %v1794_v48 = vrot.slane %v1792_v11, 3 }
0x36d5   :  { %1795 = vrot.lane.b32.xlu0 %v1794_v48, %s4559_s28 }
0x3747   :  { %v1796_v49 = vpop.permute.xlu0 %1795 }
0x3748   :  { %3986 = vmatmul.mubr.msk.bf16.vlgmr.msra.gmra.mrb[44].mxu0 %vm153_vm2, %v1796_v49 }
0x3749   :  { %3998 = vmatpush3.bf16.msra.mxu0 %v4926_v58  ;;  %4001 = vmatprep.mubr.msk.bf16.mxu0 %vm4556_vm1, %v4555_v1 }
0x374a   :  { %3999 = vmatprep.subr.bf16.mxu0 %v4555_v1 }
0x374d   :  { %4000 = vmatpush3.bf16.msra.mxu0 %v4935_v36 }
0x374e   :  { %4013 = vmatprep.subr.bf16.mxu0 %v4555_v1 }
0x381b   :  { %v1834_v50 = vpop.f32.mrb[44].mxu0 }
0x381c   :  { %v1840_v51 = vadd.f32 %v1834_v50, %v4969_v19  ;;  %v3987_v13 = vpop.f32.mrb[45].mxu0 }
0x381d   :  { %v1837_v53 = vpop.f32.mrb[46].mxu0 }
0x381e   :  { %4431 = vtanh.f32 %v1840_v51  ;;  %v3988_v54 = vpop.f32.mrb[47].mxu0  ;;  %v1841_v57 = vsub.f32 0.0, %v1840_v51 }
0x3820   :  { %v1842_v56 = vmul.f32 1.442695, %v1841_v57 }
0x3822   :  { %4433 = vpow2.f32 %v1842_v56 }
0x3828   :  { %v4432_v55 = vpop.eup %4431 }
0x3829   :  { %1852 = vrot.lane.b32.xlu1 %v4432_v55, %s4558_s3 }
0x382c   :  { %v4434_v52 = vpop.eup %4433 }
0x382d   :  { %v1844_v37 = vadd.f32 1.0, %v4434_v52 }
0x382f   :  { %4435 = vrcp.f32 %v1844_v37 }
0x3839   :  { %v4436_v59 = vpop.eup %4435 }
0x383a   :  { %v1850_v63 = vmul.f32 %v4436_v59, %v1848_v62 }
0x389b   :  { %v1853_v60 = vpop.permute.xlu1 %1852 }
0x389c   :  { %v1855_v61 = vmul.f32 %v4436_v59, %v1853_v60 }
0x389e   :  { %1857 = vrot.lane.b32.xlu0 %v1855_v61, %s4559_s28 }
0x3910   :  { %v1858_v0 = vpop.permute.xlu0 %1857 }
0x3911   :  { %v1860_v3 = vadd.f32 %v1858_v0, %v1850_v63 }
0x3913   :  { %4437 = vtanh.f32 %v1860_v3  ;;  %v1925_v15 = vrot.slane %v1860_v3, 6 }
0x391d   :  { %v4438_v4 = vpop.eup %4437 }
0x391e   :  { %1863 = vrot.lane.b32.xlu1 %v4438_v4, %s4558_s3 }
0x3990   :  { %v1864_v22 = vpop.permute.xlu1 %1863 }
0x3991   :  { %v1866_v7 = vmul.f32 %v4436_v59, %v1864_v22 }
0x3993   :  { %v1867_v8 = vpack.c.bf16 %v1866_v7, %v1866_v7 }
0x3995   :  { %1869 = vrot.lane.b32.xlu0 %v1867_v8, %s4559_s28 }
0x3a07   :  { %v1870_v12 = vpop.permute.xlu0 %1869 }
0x3a08   :  { %3994 = vmatmul.mubr.msk.bf16.vlgmr.msra.gmra.mrb[44].mxu1 %vm153_vm2, %v1870_v12 }
0x3a09   :  { %4006 = vmatpush3.bf16.msra.mxu1 %v4926_v58  ;;  %4009 = vmatprep.mubr.msk.bf16.mxu1 %vm4556_vm1, %v4555_v1 }
0x3a0a   :  { %4007 = vmatprep.subr.bf16.mxu1 %v4555_v1 }
0x3a0d   :  { %4008 = vmatpush3.bf16.msra.mxu1 %v4935_v36 }
0x3a0e   :  { %4021 = vmatprep.subr.bf16.mxu1 %v4555_v1 }
0x3adb   :  { %v1908_v16 = vpop.f32.mrb[44].mxu1 }
0x3adc   :  { %v1915_v9 = vrot.slane %v1908_v16, 6  ;;  %v3995_v18 = vpop.f32.mrb[45].mxu1 }
0x3add   :  { %v1911_v20 = vpop.f32.mrb[46].mxu1 }
0x3ade   :  { %v1917_v21 = vadd.f32 %v1915_v9, %v4969_v19  ;;  %v3996_v23 = vpop.f32.mrb[47].mxu1 }
0x3ae0   :  { %4439 = vtanh.f32 %v1917_v21  ;;  %v1918_v25 = vsub.f32 0.0, %v1917_v21 }
0x3ae2   :  { %v1919_v26 = vmul.f32 1.442695, %v1918_v25 }
0x3ae4   :  { %4441 = vpow2.f32 %v1919_v26 }
0x3aea   :  { %v4440_v24 = vpop.eup %4439 }
0x3aeb   :  { %1929 = vrot.lane.b32.xlu1 %v4440_v24, %s4558_s3 }
0x3aee   :  { %v4442_v27 = vpop.eup %4441 }
0x3aef   :  { %v1921_v28 = vadd.f32 1.0, %v4442_v27 }
0x3af1   :  { %4443 = vrcp.f32 %v1921_v28 }
0x3afb   :  { %v4444_v29 = vpop.eup %4443 }
0x3afc   :  { %v1927_v32 = vmul.f32 %v4444_v29, %v1925_v15 }
0x3b5d   :  { %v1930_v30 = vpop.permute.xlu1 %1929 }
0x3b5e   :  { %v1932_v31 = vmul.f32 %v4444_v29, %v1930_v30 }
0x3b60   :  { %1934 = vrot.lane.b32.xlu0 %v1932_v31, %s4559_s28 }
0x3bd2   :  { %v1935_v33 = vpop.permute.xlu0 %1934 }
0x3bd3   :  { %v1937_v34 = vadd.f32 %v1935_v33, %v1927_v32 }
0x3bd5   :  { %4445 = vtanh.f32 %v1937_v34  ;;  %v2003_v53 = vrot.slane %v1937_v34, 6 }
0x3bdf   :  { %v4446_v35 = vpop.eup %4445 }
0x3be0   :  { %1940 = vrot.lane.b32.xlu1 %v4446_v35, %s4558_s3 }
0x3c52   :  { %v1941_v2 = vpop.permute.xlu1 %1940 }
0x3c53   :  { %v1943_v38 = vmul.f32 %v4444_v29, %v1941_v2 }
0x3c55   :  { %v1944_v39 = vpack.c.bf16 %v1943_v38, %v1943_v38 }
0x3c57   :  { %v1946_v40 = vrot.slane %v1944_v39, 1 }
0x3c59   :  { %1947 = vrot.lane.b32.xlu0 %v1946_v40, %s4559_s28 }
0x3ccb   :  { %v1948_v5 = vpop.permute.xlu0 %1947 }
0x3ccc   :  { %4002 = vmatmul.mubr.msk.bf16.vlgmr.msra.gmra.mrb[48].mxu0 %vm153_vm2, %v1948_v5 }
0x3ccd   :  { %4014 = vmatpush3.bf16.msra.mxu0 %v4926_v58  ;;  %4017 = vmatprep.mubr.msk.bf16.mxu0 %vm4556_vm1, %v4555_v1 }
0x3cce   :  { %4015 = vmatprep.subr.bf16.mxu0 %v4555_v1 }
0x3cd1   :  { %4016 = vmatpush3.bf16.msra.mxu0 %v4935_v36 }
0x3cd2   :  { %4029 = vmatprep.subr.bf16.mxu0 %v4555_v1 }
0x3d9f   :  { %v1986_v41 = vpop.f32.mrb[48].mxu0 }
0x3da0   :  { %v1993_v42 = vrot.slane %v1986_v41, 4  ;;  %v4003_v44 = vpop.f32.mrb[49].mxu0 }
0x3da1   :  { %v1989_v45 = vpop.f32.mrb[50].mxu0 }
0x3da2   :  { %v1995_v14 = vadd.f32 %v1993_v42, %v4969_v19  ;;  %v4004_v43 = vpop.f32.mrb[51].mxu0 }
0x3da4   :  { %4447 = vtanh.f32 %v1995_v14  ;;  %v1996_v47 = vsub.f32 0.0, %v1995_v14 }
0x3da6   :  { %v1997_v11 = vmul.f32 1.442695, %v1996_v47 }
0x3da8   :  { %4449 = vpow2.f32 %v1997_v11 }
0x3dae   :  { %v4448_v46 = vpop.eup %4447 }
0x3daf   :  { %2007 = vrot.lane.b32.xlu1 %v4448_v46, %s4558_s3 }
0x3db2   :  { %v4450_v48 = vpop.eup %4449 }
0x3db3   :  { %v1999_v49 = vadd.f32 1.0, %v4450_v48 }
0x3db5   :  { %4451 = vrcp.f32 %v1999_v49 }
0x3dbf   :  { %v4452_v50 = vpop.eup %4451 }
0x3dc0   :  { %v2005_v54 = vmul.f32 %v4452_v50, %v2003_v53 }
0x3e21   :  { %v2008_v51 = vpop.permute.xlu1 %2007 }
0x3e22   :  { %v2010_v13 = vmul.f32 %v4452_v50, %v2008_v51 }
0x3e24   :  { %2012 = vrot.lane.b32.xlu0 %v2010_v13, %s4559_s28 }
0x3e96   :  { %v2013_v55 = vpop.permute.xlu0 %2012 }
0x3e97   :  { %v2015_v57 = vadd.f32 %v2013_v55, %v2005_v54 }
0x3e99   :  { %4453 = vtanh.f32 %v2015_v57  ;;  %v2081_v23 = vrot.slane %v2015_v57, 6 }
0x3ea3   :  { %v4454_v56 = vpop.eup %4453 }
0x3ea4   :  { %2018 = vrot.lane.b32.xlu1 %v4454_v56, %s4558_s3 }
0x3f16   :  { %v2019_v52 = vpop.permute.xlu1 %2018 }
0x3f17   :  { %v2021_v37 = vmul.f32 %v4452_v50, %v2019_v52 }
0x3f19   :  { %v2022_v59 = vpack.c.bf16 %v2021_v37, %v2021_v37 }
0x3f1b   :  { %v2024_v60 = vrot.slane %v2022_v59, 2 }
0x3f1d   :  { %2025 = vrot.lane.b32.xlu0 %v2024_v60, %s4559_s28 }
0x3f8f   :  { %v2026_v61 = vpop.permute.xlu0 %2025 }
0x3f90   :  { %4010 = vmatmul.mubr.msk.bf16.vlgmr.msra.gmra.mrb[48].mxu1 %vm153_vm2, %v2026_v61 }
0x3f91   :  { %4022 = vmatpush3.bf16.msra.mxu1 %v4926_v58  ;;  %4025 = vmatprep.mubr.msk.bf16.mxu1 %vm4556_vm1, %v4555_v1 }
0x3f92   :  { %4023 = vmatprep.subr.bf16.mxu1 %v4555_v1 }
0x3f95   :  { %4024 = vmatpush3.bf16.msra.mxu1 %v4935_v36 }
0x3f96   :  { %4037 = vmatprep.subr.bf16.mxu1 %v4555_v1 }
0x4063   :  { %v2064_v62 = vpop.f32.mrb[48].mxu1 }
0x4064   :  { %v2071_v63 = vrot.slane %v2064_v62, 2  ;;  %v4011_v0 = vpop.f32.mrb[49].mxu1 }
0x4065   :  { %v2067_v3 = vpop.f32.mrb[50].mxu1 }
0x4066   :  { %v2073_v4 = vadd.f32 %v2071_v63, %v4969_v19  ;;  %v4012_v22 = vpop.f32.mrb[51].mxu1 }
0x4068   :  { %4455 = vtanh.f32 %v2073_v4  ;;  %v2074_v8 = vsub.f32 0.0, %v2073_v4 }
0x406a   :  { %v2075_v12 = vmul.f32 1.442695, %v2074_v8 }
0x406c   :  { %4457 = vpow2.f32 %v2075_v12 }
0x4072   :  { %v4456_v7 = vpop.eup %4455 }
0x4073   :  { %2085 = vrot.lane.b32.xlu1 %v4456_v7, %s4558_s3 }
0x4076   :  { %v4458_v16 = vpop.eup %4457 }
0x4077   :  { %v2077_v9 = vadd.f32 1.0, %v4458_v16 }
0x4079   :  { %4459 = vrcp.f32 %v2077_v9 }
0x4083   :  { %v4460_v18 = vpop.eup %4459 }
0x4084   :  { %v2083_v24 = vmul.f32 %v4460_v18, %v2081_v23 }
0x40e5   :  { %v2086_v20 = vpop.permute.xlu1 %2085 }
0x40e6   :  { %v2088_v21 = vmul.f32 %v4460_v18, %v2086_v20 }
0x40e8   :  { %2090 = vrot.lane.b32.xlu0 %v2088_v21, %s4559_s28 }
0x415a   :  { %v2091_v25 = vpop.permute.xlu0 %2090 }
0x415b   :  { %v2093_v19 = vadd.f32 %v2091_v25, %v2083_v24 }
0x415d   :  { %4461 = vtanh.f32 %v2093_v19  ;;  %v2156_v45 = vrot.slane %v2093_v19, 6 }
0x4167   :  { %v4462_v26 = vpop.eup %4461 }
0x4168   :  { %2096 = vrot.lane.b32.xlu1 %v4462_v26, %s4558_s3 }
0x41da   :  { %v2097_v27 = vpop.permute.xlu1 %2096 }
0x41db   :  { %v2099_v28 = vmul.f32 %v4460_v18, %v2097_v27 }
0x41dd   :  { %v2100_v29 = vpack.c.bf16 %v2099_v28, %v2099_v28 }
0x41df   :  { %v2102_v30 = vrot.slane %v2100_v29, 3 }
0x41e1   :  { %2103 = vrot.lane.b32.xlu0 %v2102_v30, %s4559_s28 }
0x4253   :  { %v2104_v31 = vpop.permute.xlu0 %2103 }
0x4254   :  { %4018 = vmatmul.mubr.msk.bf16.vlgmr.msra.gmra.mrb[52].mxu0 %vm153_vm2, %v2104_v31 }
0x4255   :  { %4030 = vmatpush3.bf16.msra.mxu0 %v4926_v58  ;;  %4033 = vmatprep.mubr.msk.bf16.mxu0 %vm4556_vm1, %v4555_v1 }
0x4256   :  { %4031 = vmatprep.subr.bf16.mxu0 %v4555_v1 }
0x4259   :  { %4032 = vmatpush3.bf16.msra.mxu0 %v4935_v36 }
0x425a   :  { %4045 = vmatprep.subr.bf16.mxu0 %v4555_v1 }
0x4327   :  { %v2142_v15 = vpop.f32.mrb[52].mxu0 }
0x4328   :  { %v2148_v32 = vadd.f32 %v2142_v15, %v4962_v10  ;;  %v4019_v33 = vpop.f32.mrb[53].mxu0 }
0x4329   :  { %v2145_v34 = vpop.f32.mrb[54].mxu0 }
0x432a   :  { %4463 = vtanh.f32 %v2148_v32  ;;  %v4020_v35 = vpop.f32.mrb[55].mxu0  ;;  %v2149_v38 = vsub.f32 0.0, %v2148_v32 }
0x432c   :  { %v2150_v39 = vmul.f32 1.442695, %v2149_v38 }
0x432e   :  { %4465 = vpow2.f32 %v2150_v39 }
0x4334   :  { %v4464_v2 = vpop.eup %4463 }
0x4335   :  { %2160 = vrot.lane.b32.xlu1 %v4464_v2, %s4558_s3 }
0x4338   :  { %v4466_v40 = vpop.eup %4465 }
0x4339   :  { %v2152_v5 = vadd.f32 1.0, %v4466_v40 }
0x433b   :  { %4467 = vrcp.f32 %v2152_v5 }
0x4345   :  { %v4468_v41 = vpop.eup %4467 }
0x4346   :  { %v2158_v14 = vmul.f32 %v4468_v41, %v2156_v45 }
0x43a7   :  { %v2161_v42 = vpop.permute.xlu1 %2160 }
0x43a8   :  { %v2163_v44 = vmul.f32 %v4468_v41, %v2161_v42 }
0x43aa   :  { %2165 = vrot.lane.b32.xlu0 %v2163_v44, %s4559_s28 }
0x441c   :  { %v2166_v43 = vpop.permute.xlu0 %2165 }
0x441d   :  { %v2168_v46 = vadd.f32 %v2166_v43, %v2158_v14 }
0x441f   :  { %4469 = vtanh.f32 %v2168_v46  ;;  %v2233_v0 = vrot.slane %v2168_v46, 6 }
0x4429   :  { %v4470_v47 = vpop.eup %4469 }
0x442a   :  { %2171 = vrot.lane.b32.xlu1 %v4470_v47, %s4558_s3 }
0x449c   :  { %v2172_v11 = vpop.permute.xlu1 %2171 }
0x449d   :  { %v2174_v48 = vmul.f32 %v4468_v41, %v2172_v11 }
0x449f   :  { %v2175_v49 = vpack.c.bf16 %v2174_v48, %v2174_v48 }
0x44a1   :  { %2177 = vrot.lane.b32.xlu0 %v2175_v49, %s4559_s28 }
0x4513   :  { %v2178_v50 = vpop.permute.xlu0 %2177 }
0x4514   :  { %4026 = vmatmul.mubr.msk.bf16.vlgmr.msra.gmra.mrb[52].mxu1 %vm153_vm2, %v2178_v50 }
0x4515   :  { %4038 = vmatpush3.bf16.msra.mxu1 %v4926_v58  ;;  %4041 = vmatprep.mubr.msk.bf16.mxu1 %vm4556_vm1, %v4555_v1 }
0x4516   :  { %4039 = vmatprep.subr.bf16.mxu1 %v4555_v1 }
0x4519   :  { %4040 = vmatpush3.bf16.msra.mxu1 %v4935_v36 }
0x451a   :  { %4053 = vmatprep.subr.bf16.mxu1 %v4555_v1 }
0x45e7   :  { %v2216_v51 = vpop.f32.mrb[52].mxu1 }
0x45e8   :  { %v2223_v13 = vrot.slane %v2216_v51, 6  ;;  %v4027_v53 = vpop.f32.mrb[53].mxu1 }
0x45e9   :  { %v2219_v54 = vpop.f32.mrb[54].mxu1 }
0x45ea   :  { %v2225_v55 = vadd.f32 %v2223_v13, %v4962_v10  ;;  %v4028_v57 = vpop.f32.mrb[55].mxu1 }
0x45ec   :  { %4471 = vtanh.f32 %v2225_v55  ;;  %v2226_v52 = vsub.f32 0.0, %v2225_v55 }
0x45ee   :  { %v2227_v37 = vmul.f32 1.442695, %v2226_v52 }
0x45f0   :  { %4473 = vpow2.f32 %v2227_v37 }
0x45f6   :  { %v4472_v56 = vpop.eup %4471 }
0x45f7   :  { %2237 = vrot.lane.b32.xlu1 %v4472_v56, %s4558_s3 }
0x45fa   :  { %v4474_v59 = vpop.eup %4473 }
0x45fb   :  { %v2229_v60 = vadd.f32 1.0, %v4474_v59 }
0x45fd   :  { %4475 = vrcp.f32 %v2229_v60 }
0x4607   :  { %v4476_v61 = vpop.eup %4475 }
0x4608   :  { %v2235_v3 = vmul.f32 %v4476_v61, %v2233_v0 }
0x4669   :  { %v2238_v62 = vpop.permute.xlu1 %2237 }
0x466a   :  { %v2240_v63 = vmul.f32 %v4476_v61, %v2238_v62 }
0x466c   :  { %2242 = vrot.lane.b32.xlu0 %v2240_v63, %s4559_s28 }
0x46de   :  { %v2243_v4 = vpop.permute.xlu0 %2242 }
0x46df   :  { %v2245_v22 = vadd.f32 %v2243_v4, %v2235_v3 }
0x46e1   :  { %4477 = vtanh.f32 %v2245_v22  ;;  %v2311_v33 = vrot.slane %v2245_v22, 6 }
0x46eb   :  { %v4478_v7 = vpop.eup %4477 }
0x46ec   :  { %2248 = vrot.lane.b32.xlu1 %v4478_v7, %s4558_s3 }
0x475e   :  { %v2249_v8 = vpop.permute.xlu1 %2248 }
0x475f   :  { %v2251_v12 = vmul.f32 %v4476_v61, %v2249_v8 }
0x4761   :  { %v2252_v16 = vpack.c.bf16 %v2251_v12, %v2251_v12 }
0x4763   :  { %v2254_v9 = vrot.slane %v2252_v16, 1 }
0x4765   :  { %2255 = vrot.lane.b32.xlu0 %v2254_v9, %s4559_s28 }
0x47d7   :  { %v2256_v18 = vpop.permute.xlu0 %2255 }
0x47d8   :  { %4034 = vmatmul.mubr.msk.bf16.vlgmr.msra.gmra.mrb[56].mxu0 %vm153_vm2, %v2256_v18 }
0x47d9   :  { %4046 = vmatpush3.bf16.msra.mxu0 %v4926_v58  ;;  %4049 = vmatprep.mubr.msk.bf16.mxu0 %vm4556_vm1, %v4555_v1 }
0x47da   :  { %4047 = vmatprep.subr.bf16.mxu0 %v4555_v1 }
0x47dd   :  { %4048 = vmatpush3.bf16.msra.mxu0 %v4935_v36 }
0x47de   :  { %4061 = vmatprep.subr.bf16.mxu0 %v4555_v1 }
0x48ab   :  { %v2294_v20 = vpop.f32.mrb[56].mxu0 }
0x48ac   :  { %v2301_v21 = vrot.slane %v2294_v20, 4  ;;  %v4035_v23 = vpop.f32.mrb[57].mxu0 }
0x48ad   :  { %v2297_v24 = vpop.f32.mrb[58].mxu0 }
0x48ae   :  { %v2303_v25 = vadd.f32 %v2301_v21, %v4962_v10  ;;  %v4036_v19 = vpop.f32.mrb[59].mxu0 }
0x48b0   :  { %4479 = vtanh.f32 %v2303_v25  ;;  %v2304_v27 = vsub.f32 0.0, %v2303_v25 }
0x48b2   :  { %v2305_v28 = vmul.f32 1.442695, %v2304_v27 }
0x48b4   :  { %4481 = vpow2.f32 %v2305_v28 }
0x48ba   :  { %v4480_v26 = vpop.eup %4479 }
0x48bb   :  { %2315 = vrot.lane.b32.xlu1 %v4480_v26, %s4558_s3 }
0x48be   :  { %v4482_v29 = vpop.eup %4481 }
0x48bf   :  { %v2307_v30 = vadd.f32 1.0, %v4482_v29  ;;  %v4529_v29 = vld [vmem:[%s5365_s5] sm:$0xff]  }
0x48c1   :  { %4483 = vrcp.f32 %v2307_v30  ;;  %v4530_v30 = vld [vmem:[%s5365_s5 + $0x8] sm:$0xff]  }
0x48cb   :  { %v4484_v31 = vpop.eup %4483 }
0x48cc   :  { %v2313_v34 = vmul.f32 %v4484_v31, %v2311_v33 }
0x492d   :  { %v2316_v15 = vpop.permute.xlu1 %2315 }
0x492e   :  { %v2318_v32 = vmul.f32 %v4484_v31, %v2316_v15 }
0x4930   :  { %2320 = vrot.lane.b32.xlu0 %v2318_v32, %s4559_s28 }
0x49a2   :  { %v2321_v35 = vpop.permute.xlu0 %2320 }
0x49a3   :  { %v2323_v2 = vadd.f32 %v2321_v35, %v2313_v34 }
0x49a5   :  { %4485 = vtanh.f32 %v2323_v2  ;;  %v2389_v55 = vrot.slane %v2323_v2, 6 }
0x49af   :  { %v4486_v38 = vpop.eup %4485 }
0x49b0   :  { %2326 = vrot.lane.b32.xlu1 %v4486_v38, %s4558_s3 }
0x4a22   :  { %v2327_v39 = vpop.permute.xlu1 %2326 }
0x4a23   :  { %v2329_v40 = vmul.f32 %v4484_v31, %v2327_v39 }
0x4a25   :  { %v2330_v5 = vpack.c.bf16 %v2329_v40, %v2329_v40 }
0x4a27   :  { %v2332_v41 = vrot.slane %v2330_v5, 2 }
0x4a29   :  { %2333 = vrot.lane.b32.xlu0 %v2332_v41, %s4559_s28 }
0x4a9b   :  { %v2334_v42 = vpop.permute.xlu0 %2333 }
0x4a9c   :  { %4042 = vmatmul.mubr.msk.bf16.vlgmr.msra.gmra.mrb[56].mxu1 %vm153_vm2, %v2334_v42 }
0x4a9d   :  { %4054 = vmatpush3.bf16.msra.mxu1 %v4926_v58  ;;  %4057 = vmatprep.mubr.msk.bf16.mxu1 %vm4556_vm1, %v4555_v1 }
0x4a9e   :  { %4055 = vmatprep.subr.bf16.mxu1 %v4555_v1 }
0x4aa1   :  { %4056 = vmatpush3.bf16.msra.mxu1 %v4935_v36 }
0x4aa2   :  { %4069 = vmatprep.subr.bf16.mxu1 %v4555_v1 }
0x4b6f   :  { %v2372_v44 = vpop.f32.mrb[56].mxu1 }
0x4b70   :  { %v2379_v45 = vrot.slane %v2372_v44, 2  ;;  %v4043_v14 = vpop.f32.mrb[57].mxu1 }
0x4b71   :  { %v2375_v43 = vpop.f32.mrb[58].mxu1 }
0x4b72   :  { %v2381_v46 = vadd.f32 %v2379_v45, %v4962_v10  ;;  %v4044_v47 = vpop.f32.mrb[59].mxu1 }
0x4b74   :  { %4487 = vtanh.f32 %v2381_v46  ;;  %v2382_v48 = vsub.f32 0.0, %v2381_v46 }
0x4b76   :  { %v2383_v49 = vmul.f32 1.442695, %v2382_v48 }
0x4b78   :  { %4489 = vpow2.f32 %v2383_v49 }
0x4b7e   :  { %v4488_v11 = vpop.eup %4487 }
0x4b7f   :  { %2393 = vrot.lane.b32.xlu1 %v4488_v11, %s4558_s3 }
0x4b82   :  { %v4490_v50 = vpop.eup %4489 }
0x4b83   :  { %v2385_v51 = vadd.f32 1.0, %v4490_v50 }
0x4b85   :  { %4491 = vrcp.f32 %v2385_v51 }
0x4b8f   :  { %v4492_v13 = vpop.eup %4491 }
0x4b90   :  { %v2391_v57 = vmul.f32 %v4492_v13, %v2389_v55 }
0x4bf1   :  { %v2394_v53 = vpop.permute.xlu1 %2393 }
0x4bf2   :  { %v2396_v54 = vmul.f32 %v4492_v13, %v2394_v53 }
0x4bf4   :  { %2398 = vrot.lane.b32.xlu0 %v2396_v54, %s4559_s28 }
0x4c66   :  { %v2399_v56 = vpop.permute.xlu0 %2398 }
0x4c67   :  { %v2401_v10 = vadd.f32 %v2399_v56, %v2391_v57 }
0x4c69   :  { %4493 = vtanh.f32 %v2401_v10 }
0x4c73   :  { %v4494_v52 = vpop.eup %4493 }
0x4c74   :  { %2404 = vrot.lane.b32.xlu1 %v4494_v52, %s4558_s3 }
0x4ce6   :  { %v2405_v37 = vpop.permute.xlu1 %2404 }
0x4ce7   :  { %v2407_v59 = vmul.f32 %v4492_v13, %v2405_v37 }
0x4ce9   :  { %v2408_v60 = vpack.c.bf16 %v2407_v59, %v2407_v59 }
0x4ceb   :  { %v2410_v61 = vrot.slane %v2408_v60, 3 }
0x4ced   :  { %2411 = vrot.lane.b32.xlu0 %v2410_v61, %s4559_s28 }
0x4d5f   :  { %v2412_v62 = vpop.permute.xlu0 %2411 }
0x4d60   :  { %4050 = vmatmul.mubr.msk.bf16.vlgmr.msra.gmra.mrb[60].mxu0 %vm153_vm2, %v2412_v62 }
0x4d61   :  { %4062 = vmatpush3.bf16.msra.mxu0 %v4926_v58  ;;  %4065 = vmatprep.mubr.msk.bf16.mxu0 %vm4556_vm1, %v4555_v1 }
0x4d62   :  { %4063 = vmatprep.subr.bf16.mxu0 %v4555_v1 }
0x4d65   :  { %4064 = vmatpush3.bf16.msra.mxu0 %v4935_v36  ;;  %v2464_v36 = vrot.slane %v2401_v10, 6 }
0x4e33   :  { %v2450_v63 = vpop.f32.mrb[60].mxu0 }
0x4e34   :  { %v2456_v0 = vadd.f32 %v2450_v63, %v4966_v17  ;;  %v4051_v3 = vpop.f32.mrb[61].mxu0 }
0x4e35   :  { %v2453_v4 = vpop.f32.mrb[62].mxu0 }
0x4e36   :  { %4495 = vtanh.f32 %v2456_v0  ;;  %v4052_v22 = vpop.f32.mrb[63].mxu0  ;;  %v2457_v8 = vsub.f32 0.0, %v2456_v0 }
0x4e38   :  { %v2458_v12 = vmul.f32 1.442695, %v2457_v8 }
0x4e3a   :  { %4497 = vpow2.f32 %v2458_v12 }
0x4e40   :  { %v4496_v7 = vpop.eup %4495 }
0x4e41   :  { %2468 = vrot.lane.b32.xlu1 %v4496_v7, %s4558_s3 }
0x4e44   :  { %v4498_v58 = vpop.eup %4497 }
0x4e45   :  { %v2460_v16 = vadd.f32 1.0, %v4498_v58 }
0x4e47   :  { %4499 = vrcp.f32 %v2460_v16 }
0x4e51   :  { %v4500_v9 = vpop.eup %4499 }
0x4e52   :  { %v2466_v21 = vmul.f32 %v4500_v9, %v2464_v36 }
0x4eb3   :  { %v2469_v18 = vpop.permute.xlu1 %2468 }
0x4eb4   :  { %v2471_v20 = vmul.f32 %v4500_v9, %v2469_v18 }
0x4eb6   :  { %2473 = vrot.lane.b32.xlu0 %v2471_v20, %s4559_s28 }
0x4f28   :  { %v2474_v23 = vpop.permute.xlu0 %2473 }
0x4f29   :  { %v2476_v24 = vadd.f32 %v2474_v23, %v2466_v21 }
0x4f2b   :  { %4501 = vtanh.f32 %v2476_v24  ;;  %v2541_v45 = vrot.slane %v2476_v24, 6 }
0x4f35   :  { %v4502_v25 = vpop.eup %4501 }
0x4f36   :  { %2479 = vrot.lane.b32.xlu1 %v4502_v25, %s4558_s3  ;;  %v4239_v25 = vld [vmem:[%s5367_s7] ss:$16 sps:$4 sm:$0x1f]  }
0x4fa8   :  { %v2480_v19 = vpop.permute.xlu1 %2479 }
0x4fa9   :  { %v2482_v26 = vmul.f32 %v4500_v9, %v2480_v19  ;;  %v4241_v19 = vld [vmem:[%s5367_s7 + $0x4] ss:$16 sps:$4 sm:$0x1f]  }
0x4fab   :  { %v2483_v27 = vpack.c.bf16 %v2482_v26, %v2482_v26  ;;  %v4560_v26 = vmov 65535  }
0x4fad   :  { %2485 = vrot.lane.b32.xlu0 %v2483_v27, %s4559_s28 }
0x501f   :  { %v2486_v28 = vpop.permute.xlu0 %2485 }
0x5020   :  { %4058 = vmatmul.mubr.msk.bf16.vlgmr.msra.gmra.mrb[60].mxu1 %vm153_vm2, %v2486_v28 }
0x5021   :  { %4070 = vmatpush3.bf16.msra.mxu1 %v4529_v29  ;;  %4073 = vmatprep.mubr.msk.bf16.mxu1 %vm4556_vm1, %v4555_v1 }
0x5022   :  { %4071 = vmatprep.subr.bf16.mxu1 %v4555_v1 }
0x5025   :  { %4072 = vmatpush3.bf16.msra.mxu1 %v4530_v30  ;;  %v4244_v30 = vld [vmem:[%s5367_s7 + $0xc] ss:$16 sps:$4 sm:$0x1f]  }
0x50f3   :  { %v2524_v31 = vpop.f32.mrb[60].mxu1 }
0x50f4   :  { %v2531_v15 = vrot.slane %v2524_v31, 6  ;;  %v4059_v32 = vpop.f32.mrb[61].mxu1 }
0x50f5   :  { %v2527_v33 = vpop.f32.mrb[62].mxu1  ;;  %v2716_v32 = vld [vmem:[%s5368_s8] sm:$0x3] }
0x50f6   :  { %v2533_v34 = vadd.f32 %v2531_v15, %v4966_v17  ;;  %v4060_v35 = vpop.f32.mrb[63].mxu1 }
0x50f8   :  { %4503 = vtanh.f32 %v2533_v34  ;;  %v2534_v38 = vsub.f32 0.0, %v2533_v34 }
0x50fa   :  { %v2535_v39 = vmul.f32 1.442695, %v2534_v38 }
0x50fc   :  { %4505 = vpow2.f32 %v2535_v39 }
0x5102   :  { %v4504_v2 = vpop.eup %4503 }
0x5103   :  { %2545 = vrot.lane.b32.xlu1 %v4504_v2, %s4558_s3 }
0x5106   :  { %v4506_v40 = vpop.eup %4505 }
0x5107   :  { %v2537_v5 = vadd.f32 1.0, %v4506_v40 }
0x5109   :  { %4507 = vrcp.f32 %v2537_v5 }
0x5113   :  { %v4508_v41 = vpop.eup %4507 }
0x5114   :  { %v2543_v14 = vmul.f32 %v4508_v41, %v2541_v45 }
0x5175   :  { %v2546_v42 = vpop.permute.xlu1 %2545 }
0x5176   :  { %v2548_v44 = vmul.f32 %v4508_v41, %v2546_v42 }
0x5178   :  { %2550 = vrot.lane.b32.xlu0 %v2548_v44, %s4559_s28 }
0x51ea   :  { %v2551_v43 = vpop.permute.xlu0 %2550 }
0x51eb   :  { %v2553_v46 = vadd.f32 %v2551_v43, %v2543_v14 }
0x51ed   :  { %4509 = vtanh.f32 %v2553_v46  ;;  %v2619_v0 = vrot.slane %v2553_v46, 6 }
0x51f7   :  { %v4510_v47 = vpop.eup %4509 }
0x51f8   :  { %2556 = vrot.lane.b32.xlu1 %v4510_v47, %s4558_s3 }
0x526a   :  { %v2557_v11 = vpop.permute.xlu1 %2556 }
0x526b   :  { %v2559_v48 = vmul.f32 %v4508_v41, %v2557_v11  ;;  %v2721_v41 = vld [vmem:[%s5369_s9] sm:$0xf]  ;;  %s4561_s9 = smov [#allocation2]  }
0x526c   :  { %s3556_s23 = sshll.u32 %s4561_s9, 4  ;;  %s3557_s23 = int_to_ptr.vmem [resolvable:$true] %s3556_s23 }
0x526d   :  { %v2560_v49 = vpack.c.bf16 %v2559_v48, %v2559_v48  ;;  %p4536_p1 = scmp.lt.s32.totalorder %s3557_s23, %s3557_s23 }
0x526f   :  { %v2562_v50 = vrot.slane %v2560_v49, 1 }
0x5271   :  { %2563 = vrot.lane.b32.xlu0 %v2562_v50, %s4559_s28 }
0x52e3   :  { %v2564_v51 = vpop.permute.xlu0 %2563 }
0x52e4   :  { %4066 = vmatmul.mubr.msk.bf16.vlgmr.msra.gmra.mrb[64].mxu0 %vm153_vm2, %v2564_v51 }
0x52e5   :  { %2794 = vmatprep.mubr.bf16.mxu0 %v4557_v6 }
0x53b7   :  { %v2602_v13 = vpop.f32.mrb[64].mxu0 }
0x53b8   :  { %v2609_v53 = vrot.slane %v2602_v13, 4  ;;  %v4067_v54 = vpop.f32.mrb[65].mxu0 }
0x53b9   :  { %v2605_v55 = vpop.f32.mrb[66].mxu0  ;;  %v5177_v54 = vld [vmem:[%s5371_s11] sm:$0xff]  }
0x53ba   :  { %v2611_v57 = vadd.f32 %v2609_v53, %v4966_v17  ;;  %v4068_v56 = vpop.f32.mrb[67].mxu0  ;;  %v4245_v53 = vld [vmem:[%s5370_s10] sm:$0xff]  }
0x53bc   :  { %4511 = vtanh.f32 %v2611_v57  ;;  %v2612_v52 = vsub.f32 0.0, %v2611_v57  ;;  %v4246_v57 = vld [vmem:[%s5370_s10 + $0x8] sm:$0xff]  }
0x53be   :  { %v2613_v37 = vmul.f32 1.442695, %v2612_v52 }
0x53c0   :  { %4513 = vpow2.f32 %v2613_v37 }
0x53c6   :  { %v4512_v10 = vpop.eup %4511 }
0x53c7   :  { %2623 = vrot.lane.b32.xlu1 %v4512_v10, %s4558_s3 }
0x53ca   :  { %v4514_v59 = vpop.eup %4513 }
0x53cb   :  { %v2615_v60 = vadd.f32 1.0, %v4514_v59  ;;  %v5194_v59 = vld [vmem:[%s5371_s11 + $0x8] sm:$0xff]  }
0x53cd   :  { %4515 = vrcp.f32 %v2615_v60  ;;  %v5201_v60 = vld [vmem:[%s5371_s11 + $0x10] sm:$0xff]  }
0x53d7   :  { %v4516_v61 = vpop.eup %4515 }
0x53d8   :  { %v2621_v3 = vmul.f32 %v4516_v61, %v2619_v0 }
0x5439   :  { %v2624_v62 = vpop.permute.xlu1 %2623 }
0x543a   :  { %v2626_v63 = vmul.f32 %v4516_v61, %v2624_v62 }
0x543c   :  { %2628 = vrot.lane.b32.xlu0 %v2626_v63, %s4559_s28  ;;  %v5208_v63 = vld [vmem:[%s5371_s11 + $0x18] sm:$0xff]  }
0x54ae   :  { %v2629_v4 = vpop.permute.xlu0 %2628 }
0x54af   :  { %v2631_v22 = vadd.f32 %v2629_v4, %v2621_v3 }
0x54b1   :  { %4517 = vtanh.f32 %v2631_v22  ;;  %v2697_v42 = vrot.slane %v2631_v22, 6 }
0x54bb   :  { %v4518_v7 = vpop.eup %4517 }
0x54bc   :  { %2634 = vrot.lane.b32.xlu1 %v4518_v7, %s4558_s3 }
0x552e   :  { %v2635_v8 = vpop.permute.xlu1 %2634 }
0x552f   :  { %v2637_v12 = vmul.f32 %v4516_v61, %v2635_v8 }
0x5531   :  { %v2638_v58 = vpack.c.bf16 %v2637_v12, %v2637_v12  ;;  %v4248_v12 = vld [vmem:[%s5371_s11 + $0x20] sm:$0xff]  }
0x5533   :  { %v2640_v16 = vrot.slane %v2638_v58, 2 }
0x5535   :  { %2641 = vrot.lane.b32.xlu0 %v2640_v16, %s4559_s28  ;;  %v4250_v16 = vld [vmem:[%s5371_s11 + $0x28] sm:$0xff]  }
0x55a7   :  { %v2642_v9 = vpop.permute.xlu0 %2641 }
0x55a8   :  { %4074 = vmatmul.mubr.msk.bf16.vlgmr.msra.gmra.mrb[64].mxu1 %vm153_vm2, %v2642_v9 }
0x55a9   :  { %2835 = vmatprep.mubr.bf16.mxu1 %v4557_v6  ;;  %v2748_v6 = vsel %vm1380_vm4, 4294967295, %v4560_v26 }
0x55aa   :  { %v2749_v27 = vsel %vm2747_vm6, %v2748_v6, 0 }
0x55ab   :  { %v2754_v28 = vand.u32 %v4241_v19, %v2749_v27  ;;  %v2751_v29 = vand.u32 %v4239_v25, %v2749_v27  ;;  %v2760_v31 = vand.u32 %v4244_v30, %v2749_v27  ;;  %v5235_v25 = vld [vmem:[%s5371_s11 + $0x40] sm:$0xff]  }
0x55ad   :  { %2762 = vmatprep.subr.bf16.mxu0 %v2754_v28  ;;  %2803 = vmatprep.subr.bf16.mxu1 %v2760_v31  ;;  %v4258_v31 = vld [vmem:[%s5371_s11 + $0x58] sm:$0xff]  }
0x55ae   :  { %2763 = vmatpush1.bf16.msra.mxu0 %v2751_v29  ;;  %v4257_v29 = vld [vmem:[%s5371_s11 + $0x50] sm:$0xff]  }
0x55af   :  { %4077 = vmatprep.subr.bf16.mxu0 %v4555_v1 }
0x55b1   :  { %3613 = vmatmul.mubr.msk.bf16.vlgmr.msra.gmra.mrb[68].mxu0 %vm2743_vm7, %v2716_v32 }
0x55b2   :  { %4081 = vmatprep.mubr.msk.bf16.mxu0 %vm4556_vm1, %v4555_v1  ;;  %4078 = vmatpush3.bf16.msra.mxu0 %v4245_v53 }
0x55b3   :  { %4079 = vmatprep.subr.bf16.mxu0 %v4555_v1 }
0x55b6   :  { %4080 = vmatpush3.bf16.msra.mxu0 %v4246_v57 }
0x55b7   :  { %4085 = vmatprep.subr.bf16.mxu0 %v4555_v1 }
0x567b   :  { %v2680_v18 = vpop.f32.mrb[64].mxu1 }
0x567c   :  { %v2687_v20 = vrot.slane %v2680_v18, 2  ;;  %v4075_v36 = vpop.f32.mrb[65].mxu1 }
0x567d   :  { %v2683_v21 = vpop.f32.mrb[66].mxu1 }
0x567e   :  { %v2689_v23 = vadd.f32 %v2687_v20, %v4966_v17  ;;  %v4076_v24 = vpop.f32.mrb[67].mxu1  ;;  %v4242_v17 = vld [vmem:[%s5367_s7 + $0x8] ss:$16 sps:$4 sm:$0x1f]   ;;  %v4252_v20 = vld [vmem:[%s5371_s11 + $0x30] sm:$0xff]  }
0x567f   :  { %v2757_v15 = vand.u32 %v4242_v17, %v2749_v27  ;;  %v4254_v24 = vld [vmem:[%s5371_s11 + $0x38] sm:$0xff]   ;;  %v4256_v27 = vld [vmem:[%s5371_s11 + $0x48] sm:$0xff]  }
0x5680   :  { %4519 = vtanh.f32 %v2689_v23  ;;  %v2690_v34 = vsub.f32 0.0, %v2689_v23 }
0x5681   :  { %2804 = vmatpush1.bf16.msra.mxu1 %v2757_v15 }
0x5682   :  { %4097 = vmatprep.subr.bf16.mxu1 %v4555_v1  ;;  %v2691_v35 = vmul.f32 1.442695, %v2690_v34 }
0x5684   :  { %3614 = vmatmul.mubr.msk.bf16.vlgmr.msra.gmra.mrb[68].mxu1 %vm2743_vm7, %v2716_v32  ;;  %4521 = vpow2.f32 %v2691_v35  ;;  %v2796_v43 = vpop.f32.mrb[68].mxu0  ;;  %v4259_v32 = vld [vmem:[%s5371_s11 + $0x60] sm:$0xff]   ;;  %v4260_v35 = vld [vmem:[%s5371_s11 + $0x68] sm:$0xff]  }
0x5685   :  { %4105 = vmatprep.mubr.msk.bf16.mxu1 %vm4556_vm1, %v4555_v1  ;;  %v2798_v46 = vpop.f32.mrb[69].mxu0  ;;  %4098 = vmatpush3.bf16.msra.mxu1 %v5177_v54 }
0x5686   :  { %v2800_v47 = vpop.f32.mrb[70].mxu0  ;;  %4099 = vmatprep.subr.bf16.mxu1 %v4555_v1 }
0x5687   :  { %v2801_v11 = vpop.f32.mrb[71].mxu0  ;;  %v4269_v47 = vld [vmem:[%s5373_s13 + $0x30] sm:$0xff]  }
0x5688   :  { %v4270_v11 = vld [vmem:[%s5373_s13 + $0x38] sm:$0xff]  }
0x5689   :  { %4100 = vmatpush3.bf16.msra.mxu1 %v5194_v59 }
0x568a   :  { %v4520_v33 = vpop.eup %4519  ;;  %4101 = vmatprep.subr.bf16.mxu1 %v4555_v1 }
0x568b   :  { %2701 = vrot.lane.b32.xlu1 %v4520_v33, %s4558_s3 }
0x568d   :  { %4102 = vmatpush3.bf16.msra.mxu1 %v5201_v60 }
0x568e   :  { %v4522_v2 = vpop.eup %4521  ;;  %4103 = vmatprep.subr.bf16.mxu1 %v4555_v1 }
0x568f   :  { %v2693_v38 = vadd.f32 1.0, %v4522_v2 }
0x5691   :  { %4523 = vrcp.f32 %v2693_v38  ;;  %4104 = vmatpush3.bf16.msra.mxu1 %v5208_v63  ;;  %v4261_v38 = vld [vmem:[%s5371_s11 + $0x70] sm:$0xff]  }
0x5692   :  { %4109 = vmatprep.subr.bf16.mxu1 %v4555_v1 }
0x569b   :  { %v4524_v39 = vpop.eup %4523 }
0x569c   :  { %v2699_v44 = vmul.f32 %v4524_v39, %v2697_v42  ;;  %v4263_v42 = vld [vmem:[%s5373_s13] sm:$0xff]  }
0x56fd   :  { %v2702_v40 = vpop.permute.xlu1 %2701 }
0x56fe   :  { %v2704_v5 = vmul.f32 %v4524_v39, %v2702_v40 }
0x5700   :  { %2706 = vrot.lane.b32.xlu0 %v2704_v5, %s4559_s28 }
0x5704   :  { %2724 = vperm.xlu0 %4229, %v2721_v41  }
0x5757   :  { %v2837_v48 = vpop.f32.mrb[68].mxu1 }
0x5758   :  { %v2839_v49 = vpop.f32.mrb[69].mxu1 }
0x5759   :  { %v2841_v50 = vpop.f32.mrb[70].mxu1 }
0x575a   :  { %v2842_v51 = vpop.f32.mrb[71].mxu1 }
0x5772   :  { %v2707_v45 = vpop.permute.xlu0 %2706 }
0x5773   :  { %v2709_v14 = vadd.f32 %v2707_v45, %v2699_v44  ;;  %v4264_v44 = vld [vmem:[%s5373_s13 + $0x8] sm:$0xff]   ;;  %v4265_v45 = vld [vmem:[%s5373_s13 + $0x10] sm:$0xff]  }
0x5775   :  { %4525 = vtanh.f32 %v2709_v14  ;;  %v4266_v14 = vld [vmem:[%s5373_s13 + $0x18] sm:$0xff]  }
0x577f   :  { %v4526_v13 = vpop.eup %4525 }
0x5780   :  { %2712 = vrot.lane.b32.xlu1 %v4526_v13, %s4558_s3 }
0x5783   :  { %v2725_v55 = vpop.permute.xlu0 %2724 }
0x5784   :  { %v2799_v56 = vadd.f32 %v2798_v46, %v2725_v55  ;;  %v5183_v10 = vadd.f32 %v2839_v49, %v2725_v55  ;;  %v2797_v3 = vadd.f32 %v2796_v43, %v2725_v55  ;;  %v2838_v7 = vadd.f32 %v2837_v48, %v2725_v55  ;;  %v4267_v43 = vld [vmem:[%s5373_s13 + $0x20] sm:$0xff]   ;;  %v4268_v46 = vld [vmem:[%s5373_s13 + $0x28] sm:$0xff]  }
0x5786   :  { %v2845_v52 = vmax.f32 %v2799_v56, 0.0  ;;  %v2847_v37 = vmax.f32 %v5183_v10, 0.0  ;;  %v2844_v22 = vmax.f32 %v2797_v3, 0.0  ;;  %v2846_v8 = vmax.f32 %v2838_v7, 0.0 }
0x5788   :  { %2926 = vrot.lane.b32.xlu0 %v2845_v52, %s4558_s3 }
0x578c   :  { %3246 = vrot.lane.b32.xlu0 %v2847_v37, %s4558_s3 }
0x57f2   :  { %v2713_v61 = vpop.permute.xlu1 %2712 }
0x57f3   :  { %v2715_v62 = vmul.f32 %v4524_v39, %v2713_v61  ;;  %v4262_v39 = vld [vmem:[%s5371_s11 + $0x78] sm:$0xff]  }
0x57f5   :  { %v2848_v0 = vpack.c.bf16 %v2715_v62, %v2715_v62 }
0x57f7   :  { %v2861_v4 = vrot.slane %v2848_v0, 3 }
0x57f9   :  { %2862 = vrot.lane.b32.xlu1 %v2861_v4, %s4559_s28 }
0x57fa   :  { %v2927_v21 = vpop.permute.xlu0 %2926 }
0x57fd   :  { %2920 = vrot.lane.b32.xlu1 %v2844_v22, %s4558_s3 }
0x57fe   :  { %v3247_v30 = vpop.permute.xlu0 %3246 }
0x5801   :  { %3240 = vrot.lane.b32.xlu1 %v2846_v8, %s4558_s3 }
0x586b   :  { %v2863_v58 = vpop.permute.xlu1 %2862 }
0x586c   :  { %4082 = vmatmul.mubr.msk.bf16.vlgmr.msra.gmra.mrb[72].mxu0 %vm153_vm2, %v2863_v58 }
0x586d   :  { %4086 = vmatpush3.bf16.msra.mxu0 %v4248_v12  ;;  %4093 = vmatprep.mubr.msk.bf16.mxu0 %vm4556_vm1, %v4555_v1 }
0x586e   :  { %4087 = vmatprep.subr.bf16.mxu0 %v4555_v1 }
0x586f   :  { %v2921_v9 = vpop.permute.xlu1 %2920 }
0x5870   :  { %v2923_v18 = vmax.f32 %v2844_v22, %v2921_v9 }
0x5871   :  { %4088 = vmatpush3.bf16.msra.mxu0 %v4250_v16 }
0x5872   :  { %v2924_v36 = vmax.f32 %v2923_v18, %v2845_v52  ;;  %4089 = vmatprep.subr.bf16.mxu0 %v4555_v1 }
0x5873   :  { %v3241_v26 = vpop.permute.xlu1 %3240 }
0x5874   :  { %v2929_v23 = vmax.f32 %v2924_v36, %v2927_v21  ;;  %v3243_v28 = vmax.f32 %v2846_v8, %v3241_v26  ;;  %v3643_v8 = vld [vmem:[%s5374_s14] ss:$0 sm:$0xff] }
0x5875   :  { %4090 = vmatpush3.bf16.msra.mxu0 %v4252_v20 }
0x5876   :  { %v2930_v19 = vpack.c.bf16 %v2929_v23, %v2929_v23  ;;  %4091 = vmatprep.subr.bf16.mxu0 %v4555_v1  ;;  %v3244_v17 = vmax.f32 %v3243_v28, %v2847_v37 }
0x5878   :  { %v2948_v6 = vshrl.u32 %v2930_v19, 16  ;;  %4106 = vmatmul.mubr.msk.bf16.vlgmr.msra.gmra.mrb[72].mxu1 %vm2974_vm8, %v2930_v19  ;;  %v3249_v15 = vmax.f32 %v3244_v17, %v3247_v30  ;;  %v3093_v33 = vrot.slane %v2930_v19, 1 }
0x5879   :  { %4092 = vmatpush3.bf16.msra.mxu0 %v4254_v24  ;;  %4110 = vmatpush3.bf16.msra.mxu1 %v5235_v25 }
0x587a   :  { %4111 = vmatprep.subr.bf16.mxu1 %v4555_v1  ;;  %4133 = vmatprep.subr.bf16.mxu0 %v4555_v1  ;;  %v3250_v34 = vpack.c.bf16 %v3249_v15, %v3249_v15  ;;  %v3170_v40 = vrot.slane %v2948_v6, 1 }
0x587b   :  { %4117 = vmatprep.mubr.msk.bf16.mxu1 %vm4556_vm1, %v4555_v1 }
0x587c   :  { %4094 = vmatmul.mubr.msk.bf16.vlgmr.msra.gmra.mrb[76].mxu0 %vm2974_vm8, %v2948_v6  ;;  %v3252_v2 = vshrl.u32 %v3250_v34, 16  ;;  %v3340_v5 = vrot.slane %v3250_v34, 1 }
0x587d   :  { %4112 = vmatpush3.bf16.msra.mxu1 %v4256_v27  ;;  %4134 = vmatpush3.bf16.msra.mxu0 %v4248_v12 }
0x587e   :  { %4113 = vmatprep.subr.bf16.mxu1 %v4555_v1  ;;  %4135 = vmatprep.subr.bf16.mxu0 %v4555_v1  ;;  %v3385_v41 = vrot.slane %v3252_v2, 1 }
0x587f   :  { %4141 = vmatprep.mubr.msk.bf16.mxu0 %vm4556_vm1, %v4555_v1 }
0x5881   :  { %4114 = vmatpush3.bf16.msra.mxu1 %v4257_v29  ;;  %4136 = vmatpush3.bf16.msra.mxu0 %v4250_v16 }
0x5882   :  { %4115 = vmatprep.subr.bf16.mxu1 %v4555_v1  ;;  %4137 = vmatprep.subr.bf16.mxu0 %v4555_v1 }
0x5885   :  { %4116 = vmatpush3.bf16.msra.mxu1 %v4258_v31  ;;  %4138 = vmatpush3.bf16.msra.mxu0 %v4252_v20 }
0x5886   :  { %4121 = vmatprep.subr.bf16.mxu1 %v4555_v1  ;;  %4139 = vmatprep.subr.bf16.mxu0 %v4555_v1 }
0x5888   :  { %4118 = vmatmul.mubr.msk.bf16.vlgmr.msra.gmra.mrb[72].mxu1 %vm2974_vm8, %v3093_v33 }
0x5889   :  { %4122 = vmatpush3.bf16.msra.mxu1 %v4259_v32  ;;  %4140 = vmatpush3.bf16.msra.mxu0 %v4254_v24 }
0x588a   :  { %4123 = vmatprep.subr.bf16.mxu1 %v4555_v1  ;;  %4145 = vmatprep.subr.bf16.mxu0 %v4555_v1 }
0x588b   :  { %4129 = vmatprep.mubr.msk.bf16.mxu1 %vm4556_vm1, %v4555_v1 }
0x588c   :  { %4142 = vmatmul.mubr.msk.bf16.vlgmr.msra.gmra.mrb[80].mxu0 %vm2974_vm8, %v3252_v2 }
0x588d   :  { %4124 = vmatpush3.bf16.msra.mxu1 %v4260_v35  ;;  %4146 = vmatpush3.bf16.msra.mxu0 %v5177_v54 }
0x588e   :  { %4125 = vmatprep.subr.bf16.mxu1 %v4555_v1  ;;  %4147 = vmatprep.subr.bf16.mxu0 %v4555_v1 }
0x588f   :  { %4153 = vmatprep.mubr.msk.bf16.mxu0 %vm4556_vm1, %v4555_v1 }
0x5891   :  { %4126 = vmatpush3.bf16.msra.mxu1 %v4261_v38  ;;  %4148 = vmatpush3.bf16.msra.mxu0 %v5194_v59 }
0x5892   :  { %4127 = vmatprep.subr.bf16.mxu1 %v4555_v1  ;;  %4149 = vmatprep.subr.bf16.mxu0 %v4555_v1 }
0x5895   :  { %4128 = vmatpush3.bf16.msra.mxu1 %v4262_v39  ;;  %4150 = vmatpush3.bf16.msra.mxu0 %v5201_v60 }
0x5896   :  { %4151 = vmatprep.subr.bf16.mxu0 %v4555_v1  ;;  %4181 = vmatprep.subr.bf16.mxu1 %v4555_v1 }
0x5898   :  { %4130 = vmatmul.mubr.msk.bf16.vlgmr.msra.gmra.mrb[72].mxu1 %vm2974_vm8, %v3170_v40 }
0x5899   :  { %4152 = vmatpush3.bf16.msra.mxu0 %v5208_v63  ;;  %4197 = vmatprep.mubr.msk.bf16.mxu1 %vm4556_vm1, %v4555_v1 }
0x589a   :  { %4157 = vmatprep.subr.bf16.mxu0 %v4555_v1  ;;  %4182 = vmatpush3.bf16.msra.mxu1 %v4263_v42 }
0x589b   :  { %4183 = vmatprep.subr.bf16.mxu1 %v4555_v1 }
0x589c   :  { %4154 = vmatmul.mubr.msk.bf16.vlgmr.msra.gmra.mrb[80].mxu0 %vm2974_vm8, %v3250_v34 }
0x589d   :  { %4158 = vmatpush3.bf16.msra.mxu0 %v5235_v25  ;;  %4165 = vmatprep.mubr.msk.bf16.mxu0 %vm4556_vm1, %v4555_v1 }
0x589e   :  { %4159 = vmatprep.subr.bf16.mxu0 %v4555_v1  ;;  %4184 = vmatpush3.bf16.msra.mxu1 %v4264_v44 }
0x589f   :  { %4185 = vmatprep.subr.bf16.mxu1 %v4555_v1 }
0x58a1   :  { %4160 = vmatpush3.bf16.msra.mxu0 %v4256_v27 }
0x58a2   :  { %4161 = vmatprep.subr.bf16.mxu0 %v4555_v1  ;;  %4186 = vmatpush3.bf16.msra.mxu1 %v4265_v45 }
0x58a3   :  { %4187 = vmatprep.subr.bf16.mxu1 %v4555_v1 }
0x58a5   :  { %4162 = vmatpush3.bf16.msra.mxu0 %v4257_v29 }
0x58a6   :  { %4163 = vmatprep.subr.bf16.mxu0 %v4555_v1  ;;  %4188 = vmatpush3.bf16.msra.mxu1 %v4266_v14 }
0x58a7   :  { %4189 = vmatprep.subr.bf16.mxu1 %v4555_v1 }
0x58a9   :  { %4164 = vmatpush3.bf16.msra.mxu0 %v4258_v31 }
0x58aa   :  { %4169 = vmatprep.subr.bf16.mxu0 %v4555_v1  ;;  %4190 = vmatpush3.bf16.msra.mxu1 %v4267_v43 }
0x58ab   :  { %4191 = vmatprep.subr.bf16.mxu1 %v4555_v1 }
0x58ac   :  { %4166 = vmatmul.mubr.msk.bf16.vlgmr.msra.gmra.mrb[80].mxu0 %vm2974_vm8, %v3340_v5 }
0x58ad   :  { %4170 = vmatpush3.bf16.msra.mxu0 %v4259_v32  ;;  %4177 = vmatprep.mubr.msk.bf16.mxu0 %vm4556_vm1, %v4555_v1 }
0x58ae   :  { %4171 = vmatprep.subr.bf16.mxu0 %v4555_v1  ;;  %4192 = vmatpush3.bf16.msra.mxu1 %v4268_v46 }
0x58af   :  { %4193 = vmatprep.subr.bf16.mxu1 %v4555_v1 }
0x58b1   :  { %4172 = vmatpush3.bf16.msra.mxu0 %v4260_v35 }
0x58b2   :  { %4173 = vmatprep.subr.bf16.mxu0 %v4555_v1  ;;  %4194 = vmatpush3.bf16.msra.mxu1 %v4269_v47 }
0x58b3   :  { %4195 = vmatprep.subr.bf16.mxu1 %v4555_v1 }
0x58b5   :  { %4174 = vmatpush3.bf16.msra.mxu0 %v4261_v38 }
0x58b6   :  { %4175 = vmatprep.subr.bf16.mxu0 %v4555_v1  ;;  %4196 = vmatpush3.bf16.msra.mxu1 %v4270_v11  ;;  %v3615_v1 = vld [vmem:[%s5372_s12] ss:$0 sm:$0xff]  ;;  %s4531_s12 = scalar_lea.vmem %s3557_s23, 32 }
0x58b7   :  { %p4532_p0 = scmp.ne.s32.totalorder %s3557_s23, %s4531_s12  ;;  %p4537_p2 = scmp.lt.s32.totalorder %s4531_s12, %s4531_s12 }
0x58b9   :  { %4176 = vmatpush3.bf16.msra.mxu0 %v4262_v39  ;;  %p4538_p3 = por %p4537_p2, %p4536_p1 }
0x58bb   :  { %p4539_p4 = pnand %p4538_p3, %p4532_p0 }
0x58bc   :  { %4178 = vmatmul.mubr.msk.bf16.vlgmr.msra.gmra.mrb[80].mxu0 %vm2974_vm8, %v3385_v41 }
0x593f   :  { %v2913_v48 = vpop.f32.mrb[72].mxu0 }
0x5940   :  { %v4083_v49 = vpop.f32.mrb[73].mxu0  ;;  %v2914_v62 = vadd.f32 %v3615_v1, %v2913_v48 }
0x5941   :  { %v2916_v50 = vpop.f32.mrb[74].mxu0 }
0x5942   :  { %v4084_v51 = vpop.f32.mrb[75].mxu0 }
0x594f   :  { %v3012_v13 = vpop.f32.mrb[76].mxu0 }
0x5950   :  { %v4095_v53 = vpop.f32.mrb[77].mxu0 }
0x5951   :  { %v3015_v54 = vpop.f32.mrb[78].mxu0 }
0x5952   :  { %v4096_v55 = vpop.f32.mrb[79].mxu0 }
0x596b   :  { %v3232_v57 = vpop.f32.mrb[72].mxu1 }
0x596c   :  { %v4201_v56 = vadd.f32 %v3232_v57, %v3012_v13  ;;  %v4131_v10 = vpop.f32.mrb[73].mxu1 }
0x596d   :  { %v3235_v52 = vpop.f32.mrb[74].mxu1 }
0x596e   :  { %v4132_v37 = vpop.f32.mrb[75].mxu1 }
0x598f   :  { %v3423_v59 = vpop.f32.mrb[80].mxu0 }
0x5990   :  { %v3431_v60 = vrot.slane %v3423_v59, 7  ;;  %v4179_v61 = vpop.f32.mrb[81].mxu0 }
0x5991   :  { %v3426_v63 = vpop.f32.mrb[82].mxu0 }
0x5992   :  { %v3434_v0 = vsel %vm3433_vm9, %v4201_v56, %v3431_v60  ;;  %v4180_v3 = vpop.f32.mrb[83].mxu0 }
0x5993   :  { %v3435_v4 = vadd.f32 %v3434_v0, %v2914_v62 }
0x5995   :  { %v3436_v22 = vmax.f32 %v3435_v4, 0.0 }
0x5997   :  { %v3437_v7 = vpack.c.bf16 %v3436_v22, %v3436_v22 }
0x5999   :  { %4198 = vmatmul.mubr.bf16.vlgmr.msra.gmra.mrb[76].mxu1 %v3437_v7 }
0x5a6c   :  { %v3543_v12 = vpop.f32.mrb[76].mxu1 }
0x5a6d   :  { %v3544_v58 = vadd.f32 %v3643_v8, %v3543_v12  ;;  %v4199_v16 = vpop.f32.mrb[77].mxu1 }
0x5a6e   :  { %v3546_v9 = vpop.f32.mrb[78].mxu1 }
0x5a6f   :  { %3549 = vst [vmem:[#allocation2] sm:$0x3] %v3544_v58  ;;  %v4200_v18 = vpop.f32.mrb[79].mxu1 }
0x5a70   :  { %4542 = shalt.err (!%p4539_p4)
}
0x5a71   :  { %s4543_s14 = scalar_lea.hbm %s5375_s15, 32 }
0x5a72   :  { %p4544_p5 = scmp.ne.s32.totalorder %s5375_s15, %s4543_s14  ;;  %p4547_p6 = scmp.lt.u32.totalorder %s4543_s14, %s5375_s15 }
0x5a74   :  { %p4549_p7 = pnand %p4547_p6, %p4544_p5 }
0x5a76   :  { %4552 = shalt.err (!%p4549_p7)
}
0x5a77   :  { %3559 = dma.vmem_to_hbm [thread:$0]  %s3557_s23, 32, %s5375_s15, [#allocation3]  }
0x5a78   :  { %4553 = dma.done.wait [#allocation3], 32  }
0x5a79   :  { %4554 = vsyncadd [#allocation3], 4294967264 }
0x5a7a   :  { %3563 = vsyncpa [#allocation3], 1 }

</bundles_post_ra>
